<compile_context>
chip_gen: v7x
topology: tpu7x:2x2x1
jax: 0.10.0
libtpu: 0.0.40
codegen_flags: <defaults>
</compile_context>

<pallas_src>
import numpy as np
import jax
import jax.numpy as jnp
from jax import lax
from jax.experimental import pallas as pl
from jax.experimental.pallas import tpu as pltpu


def _round_up(n, m):
    return ((n + m - 1) // m) * m


# ---------------------------------------------------------------------------
# Fully fused forward kernel (both hops, all heads, all etypes)
# ---------------------------------------------------------------------------

def _build_kernel(cfg, graph):
    ntypes = graph["ntypes"]
    canon = graph["canonical_etypes"]
    T, E = len(ntypes), len(canon)
    K, H = cfg["K_length"], cfg["num_heads"]
    D, OD = cfg["embedding_dim"], cfg["out_dim"]
    KQ = cfg["kq_linear_out_dim"]
    Ntot = graph["ntot"]
    assert OD == D, "add_init / output accumulation require out_dim == embedding_dim"

    nt_idx = {nt: i for i, nt in enumerate(ntypes)}
    e_src = [nt_idx[s] for (s, _, _) in canon]
    e_dst = [nt_idx[d] for (_, _, d) in canon]
    # per-dst-ntype groups of etype indices (graph-attention softmax groups), static Python
    dst_groups = [[e for e in range(E) if e_dst[e] == t] for t in range(T)]
    inv_sqrt_kq = float(KQ) ** -0.5
    maxnorm = float(cfg["max_norm"])

    def kernel(h0_ref, mask_ref, sel_ref, rowm_ref, primm_ref, wrow_ref,
               wc_ref, asrc_ref, adst_ref, wk_ref, wq_ref, weff_ref, beff_ref,
               o_ref):
        f32 = jnp.float32
        dn_rr = (((1,), (1,)), ((), ()))   # x @ W^T   (contract last dims)
        dn_cc = (((0,), (0,)), ((), ()))   # alpha^T h (contract first dims)

        h0 = h0_ref[...]                   # (Ntot, D) initial embedding slab (padded rows zero)
        sel = sel_ref[...]                 # (T, Ntot)  rows = 1/count on real rows of that ntype
        rowm = rowm_ref[...]               # (Ntot, 1)  1.0 on real rows
        primm = primm_ref[...]             # (Ntot, 1)  1.0 on real primary rows

        h = h0
        out_acc = h0                       # output_embs starts as the initial h_dict
        for k in range(K):                 # hops, fully fused & unrolled
            # graph_aggregation='mean' per ntype (padding excluded via sel)
            gf = lax.dot_general(sel, h, (((1,), (0,)), ((), ())),
                                 preferred_element_type=f32)           # (T, D)
            new = jnp.zeros((Ntot, OD), f32)
            for hd in range(H):
                w = k * H + hd
                # ---- etype-invariant context attention (hoisted out of the etype loop) ----
                c = lax.dot_general(h, wc_ref[w], dn_rr,
                                    preferred_element_type=f32)        # (Ntot, C)  c_linear
                s_src = jnp.sum(c * asrc_ref[w], axis=-1, keepdims=True)   # (Ntot, 1)
                s_dst = lax.dot_general(adst_ref[w], c, dn_rr,
                                        preferred_element_type=f32)    # (1, Ntot)
                ca = s_src + s_dst                                      # attn_fc(cat(C_u, C_v))
                act = jnp.maximum(ca, 0.01 * ca)                        # leaky_relu(0.01)

                # ---- graph-attention scalars g_A (softmax over etypes sharing a dst ntype) ----
                kg = lax.dot_general(gf, wk_ref[w], dn_rr, preferred_element_type=f32)  # (T, KQ)
                qg = lax.dot_general(gf, wq_ref[w], dn_rr, preferred_element_type=f32)  # (T, KQ)
                gA = [None] * E
                for t in range(T):
                    grp = dst_groups[t]
                    if not grp:
                        continue
                    zs = [jnp.sum(kg[e_src[e]:e_src[e] + 1, :] * qg[t:t + 1, :],
                                  axis=-1, keepdims=True) * inv_sqrt_kq
                          for e in grp]                                 # each (1, 1)
                    m = zs[0]
                    for z in zs[1:]:
                        m = jnp.maximum(m, z)
                    ex = [jnp.exp(z - m) for z in zs]
                    den = ex[0]
                    for v in ex[1:]:
                        den = den + v
                    for i, e in enumerate(grp):
                        gA[e] = ex[i] / den

                # ---- per-etype masked softmax over src + attention-weighted aggregation ----
                agg_acc = jnp.zeros((Ntot, D), f32)
                for e in range(E):
                    msk = mask_ref[e]                                   # (Ntot, Ntot)
                    logits = jnp.where(msk > 0.0, act, -1e30)
                    mmax = jnp.max(logits, axis=0, keepdims=True)
                    # `* msk` after exp is load-bearing: fully-masked dst columns (other ntype /
                    # padding) would otherwise get a bogus uniform softmax from the sentinel.
                    p = jnp.exp(logits - mmax) * msk
                    ssum = jnp.sum(p, axis=0, keepdims=True)
                    ssum = jnp.where(ssum <= 0.0, 1.0, ssum)            # dst nodes w/o in-edges
                    alpha = p * pl.reciprocal(ssum, approx=True)        # EUP reciprocal
                    agg = lax.dot_general(alpha, h, dn_cc,
                                          preferred_element_type=f32)   # (Ntot, D)
                    agg_acc = agg_acc + gA[e] * agg                      # multi_update_all 'sum'

                # folded per-head fc + merge='linear' projection (one matmul per head)
                new = new + lax.dot_general(agg_acc, weff_ref[w], dn_rr,
                                            preferred_element_type=f32)  # (Ntot, OD)

            new = (new + beff_ref[k]) * rowm        # folded biases; keep padded rows zero
            new = new + h0 * primm                  # enable_add_init on the primary type
            h = new
            out_acc = out_acc + h * wrow_ref[k]     # output_embs += h * softmax(loss_weight)[:,k]

        # torch.renorm(p=2, dim=0, maxnorm): per-row L2 renorm
        nrm = jnp.sqrt(jnp.sum(out_acc * out_acc, axis=-1, keepdims=True))
        scale = jnp.where(nrm > maxnorm, maxnorm / (nrm + 1e-7), 1.0)
        o_ref[...] = out_acc * scale

    return kernel


# ---------------------------------------------------------------------------
# Forward wrapper (one pallas_call + a handful of tiny XLA glue ops)
# ---------------------------------------------------------------------------

def build_forward(cfg, graph):
    ntypes = graph["ntypes"]
    T = len(ntypes)
    K, H = cfg["K_length"], cfg["num_heads"]
    D, OD = cfg["embedding_dim"], cfg["out_dim"]
    C, KQ = cfg["c_linear_out_dim"], cfg["kq_linear_out_dim"]
    ho = OD // H
    Ntot = graph["ntot"]
    primary = cfg["primary_type"]
    p_idx = ntypes.index(primary)

    # Static selector constants (graph-structure only, built once on the host).
    selb = np.zeros((Ntot, T), np.float32)          # binary ntype indicator for real rows
    sel = np.zeros((T, Ntot), np.float32)           # 1/count rows -> per-ntype mean via one dot
    for t, nt in enumerate(ntypes):
        off, n = graph["offsets"][nt], graph["num_nodes"][nt]
        selb[off:off + n, t] = 1.0
        sel[t, off:off + n] = 1.0 / n
    row_mask = selb.sum(axis=1, keepdims=True)      # (Ntot, 1)
    prim_mask = selb[:, p_idx:p_idx + 1].copy()     # (Ntot, 1)

    kernel = _build_kernel(cfg, graph)
    vspec = pl.BlockSpec(memory_space=pltpu.MemorySpace.VMEM)
    call = pl.pallas_call(
        kernel,
        out_shape=jax.ShapeDtypeStruct((Ntot, OD), jnp.float32),
        in_specs=[vspec] * 13,
        out_specs=vspec,
    )

    def forward(params, mask_stack):
        # Initial feature slab (auxiliary_embedding='emb'), zero-padded per ntype.
        parts = []
        for nt in ntypes:
            x = params["primary_emb"] if nt == primary else params["aux_emb"][nt]
            pad = graph["padded_nodes"][nt] - x.shape[0]
            if pad:
                x = jnp.pad(x, ((0, pad), (0, 0)))
            parts.append(x)
        h0 = jnp.concatenate(parts, axis=0)                              # (Ntot, D)

        # Loss-weight softmax, expanded to a per-row weight per hop.
        w_sm = jax.nn.softmax(params["loss_weight"], axis=-1)            # (T, K)
        wrow = jnp.einsum("nt,tk->kn", selb, w_sm)[:, :, None]           # (K, Ntot, 1)

        # Fold per-head fc + merge='linear' into per-head effective weights / one bias.
        wm_r = params["Wm"].reshape(K, OD, H, ho)
        weff = jnp.einsum("kohc,khcd->khod", wm_r, params["Wfc"]).reshape(K * H, OD, D)
        beff = (params["bm"] +
                jnp.einsum("kohc,khc->ko", wm_r, params["bfc"])).reshape(K, 1, OD)

        a_src = params["Wa"][..., :C].reshape(K * H, 1, C)
        a_dst = params["Wa"][..., C:].reshape(K * H, 1, C)
        wc = params["Wc"].reshape(K * H, C, D)
        wk = params["Wk"].reshape(K * H, KQ, D)
        wq = params["Wq"].reshape(K * H, KQ, D)

        out_slab = call(h0, mask_stack,
                        jnp.asarray(sel), jnp.asarray(row_mask), jnp.asarray(prim_mask),
                        wrow, wc, a_src, a_dst, wk, wq, weff, beff)

        out = {}
        for nt in ntypes:
            off, n = graph["offsets"][nt], graph["num_nodes"][nt]
            out[nt] = out_slab[off:off + n]
        return out

    return jax.jit(forward)


# ---------------------------------------------------------------------------
# Deterministic parameter / graph construction
# ---------------------------------------------------------------------------

def init_params(key, cfg, graph):
    d = cfg["embedding_dim"]
    kq = cfg["kq_linear_out_dim"]
    c = cfg["c_linear_out_dim"]
    od = cfg["out_dim"]
    nh = cfg["num_heads"]
    K = cfg["K_length"]
    ho = od // nh
    counter = [0]

    def nxt(shape, scale=0.1):
        counter[0] += 1
        k = jax.random.fold_in(key, counter[0])
        return (scale * jax.random.normal(k, shape)).astype(jnp.float32)

    return {
        "primary_emb": nxt((graph["num_nodes"][cfg["primary_type"]], d), 1.0),
        "aux_emb": {nt: nxt((graph["num_nodes"][nt], d), 1.0)
                    for nt in graph["ntypes"] if nt != cfg["primary_type"]},
        # nn.Parameter(torch.ones(n_ntypes, K_length))
        "loss_weight": jnp.ones((len(graph["ntypes"]), K), jnp.float32),
        # stacked per-(hop, head) weights
        "Wk": nxt((K, nh, kq, d)),          # k_linear (bias=False)
        "Wq": nxt((K, nh, kq, d)),          # q_linear (bias=False)
        "Wc": nxt((K, nh, c, d)),           # c_linear (bias=False)
        "Wa": nxt((K, nh, 1, 2 * c)),       # attn_fc  (bias=False)
        "Wfc": nxt((K, nh, ho, d)),         # per-head fc
        "bfc": nxt((K, nh, ho)),
        "Wm": nxt((K, od, od)),             # merge='linear'
        "bm": nxt((K, od)),
    }


def make_adj(key, n_src, n_dst):
    m = jax.random.bernoulli(key, 0.5, (n_src, n_dst)).astype(jnp.float32)
    # guarantee every dst node has at least one incoming edge for this etype
    idx_dst = jnp.arange(n_dst)
    idx_src = idx_dst % n_src
    return m.at[idx_src, idx_dst].set(1.0)


if __name__ == "__main__":
    key = jax.random.PRNGKey(0)

    N_USER, N_ITEM, D = 16, 12, 32
    cfg = dict(primary_type="user", K_length=2, num_heads=2,
               embedding_dim=D, in_dim=D, out_dim=D,
               kq_linear_out_dim=16, c_linear_out_dim=16,
               add_init=True, max_norm=4.0)

    ntypes = ["user", "item"]
    canonical_etypes = [("user", "u2u", "user"),
                        ("user", "rates", "item"),
                        ("item", "rated_by", "user"),
                        ("item", "i2i", "item")]
    num_nodes = {"user": N_USER, "item": N_ITEM}
    padded_nodes = {nt: _round_up(num_nodes[nt], 8) for nt in ntypes}
    offsets, ntot = {}, 0
    for nt in ntypes:
        offsets[nt] = ntot
        ntot += padded_nodes[nt]

    graph = {"ntypes": ntypes, "canonical_etypes": canonical_etypes,
             "num_nodes": num_nodes, "padded_nodes": padded_nodes,
             "offsets": offsets, "ntot": ntot}

    # Adjacency packed once into a padded stacked mask (reused by every hop / head).
    mask_stack = jnp.zeros((len(canonical_etypes), ntot, ntot), jnp.float32)
    for i, (s, e, d) in enumerate(canonical_etypes):
        adj = make_adj(jax.random.fold_in(key, 1000 + i), num_nodes[s], num_nodes[d])
        mask_stack = mask_stack.at[
            i,
            offsets[s]:offsets[s] + num_nodes[s],
            offsets[d]:offsets[d] + num_nodes[d]].set(adj)

    params = init_params(key, cfg, graph)
    forward = build_forward(cfg, graph)

    out = forward(params, mask_stack)
    for nt in ntypes:
        jax.block_until_ready(out[nt])
        assert out[nt].shape == (num_nodes[nt], D)
        assert bool(jnp.all(jnp.isfinite(out[nt])))

    print("KERNEL_OK")
</pallas_src>

<mosaic_0001>
module attributes {stable_mosaic.version = 11 : i64} {
  func.func @kernel(%arg0: memref<32x32xf32, #tpu.memory_space<vmem>>, %arg1: memref<4x32x32xf32, #tpu.memory_space<vmem>>, %arg2: memref<2x32xf32, #tpu.memory_space<vmem>>, %arg3: memref<32x1xf32, #tpu.memory_space<vmem>>, %arg4: memref<32x1xf32, #tpu.memory_space<vmem>>, %arg5: memref<2x32x1xf32, #tpu.memory_space<vmem>>, %arg6: memref<4x16x32xf32, #tpu.memory_space<vmem>>, %arg7: memref<4x1x16xf32, #tpu.memory_space<vmem>>, %arg8: memref<4x1x16xf32, #tpu.memory_space<vmem>>, %arg9: memref<4x16x32xf32, #tpu.memory_space<vmem>>, %arg10: memref<4x16x32xf32, #tpu.memory_space<vmem>>, %arg11: memref<4x32x32xf32, #tpu.memory_space<vmem>>, %arg12: memref<2x1x32xf32, #tpu.memory_space<vmem>>, %arg13: memref<32x32xf32, #tpu.memory_space<vmem>>) attributes {dimension_semantics = [], scalar_prefetch = 0 : i64, scratch_operands = 0 : i64, tpu.core_type = #tpu.core_type<tc>} {
    %c0 = arith.constant 0 : index
    %c0_0 = arith.constant 0 : index
    %0 = vector.load %arg0[%c0, %c0_0] : memref<32x32xf32, #tpu.memory_space<vmem>>, vector<32x32xf32>
    %c0_1 = arith.constant 0 : index
    %c0_2 = arith.constant 0 : index
    %1 = vector.load %arg2[%c0_1, %c0_2] : memref<2x32xf32, #tpu.memory_space<vmem>>, vector<2x32xf32>
    %c0_3 = arith.constant 0 : index
    %c0_4 = arith.constant 0 : index
    %2 = vector.load %arg3[%c0_3, %c0_4] : memref<32x1xf32, #tpu.memory_space<vmem>>, vector<32x1xf32>
    %c0_5 = arith.constant 0 : index
    %c0_6 = arith.constant 0 : index
    %3 = vector.load %arg4[%c0_5, %c0_6] : memref<32x1xf32, #tpu.memory_space<vmem>>, vector<32x1xf32>
    %cst = arith.constant dense<0.000000e+00> : vector<2x32xf32>
    %4 = tpu.matmul %1, %0, %cst {dimension_numbers = #tpu.dot_dimension_numbers<[1], [0], [0], [1], [0, 0, 1, 1], [], []>} : vector<2x32xf32>, vector<32x32xf32>, vector<2x32xf32> -> vector<2x32xf32>
    %cst_7 = arith.constant 0.000000e+00 : f32
    %5 = vector.broadcast %cst_7 : f32 to vector<32x32xf32>
    %c0_8 = arith.constant 0 : index
    %c0_9 = arith.constant 0 : index
    %c0_10 = arith.constant 0 : index
    %6 = vector.load %arg6[%c0_8, %c0_9, %c0_10] : memref<4x16x32xf32, #tpu.memory_space<vmem>>, vector<1x16x32xf32>
    %7 = vector.shape_cast %6 : vector<1x16x32xf32> to vector<16x32xf32>
    %cst_11 = arith.constant dense<0.000000e+00> : vector<32x16xf32>
    %8 = tpu.matmul %0, %7, %cst_11 {dimension_numbers = #tpu.dot_dimension_numbers<[1], [1], [0], [0], [0, 0, 1, 0], [], []>} : vector<32x32xf32>, vector<16x32xf32>, vector<32x16xf32> -> vector<32x16xf32>
    %c0_12 = arith.constant 0 : index
    %c0_13 = arith.constant 0 : index
    %c0_14 = arith.constant 0 : index
    %9 = vector.load %arg7[%c0_12, %c0_13, %c0_14] : memref<4x1x16xf32, #tpu.memory_space<vmem>>, vector<1x1x16xf32>
    %10 = vector.shape_cast %9 : vector<1x1x16xf32> to vector<1x16xf32>
    %11 = vector.broadcast %10 : vector<1x16xf32> to vector<32x16xf32>
    %12 = arith.mulf %8, %11 : vector<32x16xf32>
    %cst_15 = arith.constant dense<0.000000e+00> : vector<32xf32>
    %13 = vector.multi_reduction <add>, %12, %cst_15 [1] : vector<32x16xf32> to vector<32xf32>
    %14 = vector.shape_cast %13 : vector<32xf32> to vector<32x1xf32>
    %c0_16 = arith.constant 0 : index
    %c0_17 = arith.constant 0 : index
    %c0_18 = arith.constant 0 : index
    %15 = vector.load %arg8[%c0_16, %c0_17, %c0_18] : memref<4x1x16xf32, #tpu.memory_space<vmem>>, vector<1x1x16xf32>
    %16 = vector.shape_cast %15 : vector<1x1x16xf32> to vector<1x16xf32>
    %cst_19 = arith.constant dense<0.000000e+00> : vector<1x32xf32>
    %17 = tpu.matmul %16, %8, %cst_19 {dimension_numbers = #tpu.dot_dimension_numbers<[1], [1], [0], [0], [0, 0, 1, 0], [], []>} : vector<1x16xf32>, vector<32x16xf32>, vector<1x32xf32> -> vector<1x32xf32>
    %18 = vector.broadcast %14 : vector<32x1xf32> to vector<32x32xf32>
    %19 = vector.broadcast %17 : vector<1x32xf32> to vector<32x32xf32>
    %20 = arith.addf %18, %19 : vector<32x32xf32>
    %cst_20 = arith.constant 0.00999999977 : f32
    %21 = vector.broadcast %cst_20 : f32 to vector<32x32xf32>
    %22 = arith.mulf %21, %20 : vector<32x32xf32>
    %23 = arith.maximumf %20, %22 : vector<32x32xf32>
    %c0_21 = arith.constant 0 : index
    %c0_22 = arith.constant 0 : index
    %c0_23 = arith.constant 0 : index
    %24 = vector.load %arg9[%c0_21, %c0_22, %c0_23] : memref<4x16x32xf32, #tpu.memory_space<vmem>>, vector<1x16x32xf32>
    %25 = vector.shape_cast %24 : vector<1x16x32xf32> to vector<16x32xf32>
    %cst_24 = arith.constant dense<0.000000e+00> : vector<2x16xf32>
    %26 = tpu.matmul %4, %25, %cst_24 {dimension_numbers = #tpu.dot_dimension_numbers<[1], [1], [0], [0], [0, 0, 1, 0], [], []>} : vector<2x32xf32>, vector<16x32xf32>, vector<2x16xf32> -> vector<2x16xf32>
    %c0_25 = arith.constant 0 : index
    %c0_26 = arith.constant 0 : index
    %c0_27 = arith.constant 0 : index
    %27 = vector.load %arg10[%c0_25, %c0_26, %c0_27] : memref<4x16x32xf32, #tpu.memory_space<vmem>>, vector<1x16x32xf32>
    %28 = vector.shape_cast %27 : vector<1x16x32xf32> to vector<16x32xf32>
    %cst_28 = arith.constant dense<0.000000e+00> : vector<2x16xf32>
    %29 = tpu.matmul %4, %28, %cst_28 {dimension_numbers = #tpu.dot_dimension_numbers<[1], [1], [0], [0], [0, 0, 1, 0], [], []>} : vector<2x32xf32>, vector<16x32xf32>, vector<2x16xf32> -> vector<2x16xf32>
    %30 = vector.extract_strided_slice %26 {offsets = [0, 0], sizes = [1, 16], strides = [1, 1]} : vector<2x16xf32> to vector<1x16xf32>
    %31 = vector.extract_strided_slice %29 {offsets = [0, 0], sizes = [1, 16], strides = [1, 1]} : vector<2x16xf32> to vector<1x16xf32>
    %32 = arith.mulf %30, %31 : vector<1x16xf32>
    %cst_29 = arith.constant dense<0.000000e+00> : vector<1xf32>
    %33 = vector.multi_reduction <add>, %32, %cst_29 [1] : vector<1x16xf32> to vector<1xf32>
    %34 = vector.shape_cast %33 : vector<1xf32> to vector<1x1xf32>
    %cst_30 = arith.constant 2.500000e-01 : f32
    %35 = vector.broadcast %cst_30 : f32 to vector<1x1xf32>
    %36 = arith.mulf %34, %35 : vector<1x1xf32>
    %37 = vector.extract_strided_slice %26 {offsets = [1, 0], sizes = [1, 16], strides = [1, 1]} : vector<2x16xf32> to vector<1x16xf32>
    %38 = vector.extract_strided_slice %29 {offsets = [0, 0], sizes = [1, 16], strides = [1, 1]} : vector<2x16xf32> to vector<1x16xf32>
    %39 = arith.mulf %37, %38 : vector<1x16xf32>
    %cst_31 = arith.constant dense<0.000000e+00> : vector<1xf32>
    %40 = vector.multi_reduction <add>, %39, %cst_31 [1] : vector<1x16xf32> to vector<1xf32>
    %41 = vector.shape_cast %40 : vector<1xf32> to vector<1x1xf32>
    %cst_32 = arith.constant 2.500000e-01 : f32
    %42 = vector.broadcast %cst_32 : f32 to vector<1x1xf32>
    %43 = arith.mulf %41, %42 : vector<1x1xf32>
    %44 = arith.maximumf %36, %43 : vector<1x1xf32>
    %45 = arith.subf %36, %44 : vector<1x1xf32>
    %46 = math.exp %45 : vector<1x1xf32>
    %47 = arith.subf %43, %44 : vector<1x1xf32>
    %48 = math.exp %47 : vector<1x1xf32>
    %49 = arith.addf %46, %48 : vector<1x1xf32>
    %50 = arith.divf %46, %49 : vector<1x1xf32>
    %51 = arith.divf %48, %49 : vector<1x1xf32>
    %52 = vector.extract_strided_slice %26 {offsets = [0, 0], sizes = [1, 16], strides = [1, 1]} : vector<2x16xf32> to vector<1x16xf32>
    %53 = vector.extract_strided_slice %29 {offsets = [1, 0], sizes = [1, 16], strides = [1, 1]} : vector<2x16xf32> to vector<1x16xf32>
    %54 = arith.mulf %52, %53 : vector<1x16xf32>
    %cst_33 = arith.constant dense<0.000000e+00> : vector<1xf32>
    %55 = vector.multi_reduction <add>, %54, %cst_33 [1] : vector<1x16xf32> to vector<1xf32>
    %56 = vector.shape_cast %55 : vector<1xf32> to vector<1x1xf32>
    %cst_34 = arith.constant 2.500000e-01 : f32
    %57 = vector.broadcast %cst_34 : f32 to vector<1x1xf32>
    %58 = arith.mulf %56, %57 : vector<1x1xf32>
    %59 = vector.extract_strided_slice %26 {offsets = [1, 0], sizes = [1, 16], strides = [1, 1]} : vector<2x16xf32> to vector<1x16xf32>
    %60 = vector.extract_strided_slice %29 {offsets = [1, 0], sizes = [1, 16], strides = [1, 1]} : vector<2x16xf32> to vector<1x16xf32>
    %61 = arith.mulf %59, %60 : vector<1x16xf32>
    %cst_35 = arith.constant dense<0.000000e+00> : vector<1xf32>
    %62 = vector.multi_reduction <add>, %61, %cst_35 [1] : vector<1x16xf32> to vector<1xf32>
    %63 = vector.shape_cast %62 : vector<1xf32> to vector<1x1xf32>
    %cst_36 = arith.constant 2.500000e-01 : f32
    %64 = vector.broadcast %cst_36 : f32 to vector<1x1xf32>
    %65 = arith.mulf %63, %64 : vector<1x1xf32>
    %66 = arith.maximumf %58, %65 : vector<1x1xf32>
    %67 = arith.subf %58, %66 : vector<1x1xf32>
    %68 = math.exp %67 : vector<1x1xf32>
    %69 = arith.subf %65, %66 : vector<1x1xf32>
    %70 = math.exp %69 : vector<1x1xf32>
    %71 = arith.addf %68, %70 : vector<1x1xf32>
    %72 = arith.divf %68, %71 : vector<1x1xf32>
    %73 = arith.divf %70, %71 : vector<1x1xf32>
    %cst_37 = arith.constant 0.000000e+00 : f32
    %74 = vector.broadcast %cst_37 : f32 to vector<32x32xf32>
    %c0_38 = arith.constant 0 : index
    %c0_39 = arith.constant 0 : index
    %c0_40 = arith.constant 0 : index
    %75 = vector.load %arg1[%c0_38, %c0_39, %c0_40] : memref<4x32x32xf32, #tpu.memory_space<vmem>>, vector<1x32x32xf32>
    %76 = vector.shape_cast %75 : vector<1x32x32xf32> to vector<32x32xf32>
    %cst_41 = arith.constant 0.000000e+00 : f32
    %77 = vector.broadcast %cst_41 : f32 to vector<32x32xf32>
    %78 = arith.cmpf ogt, %76, %77 : vector<32x32xf32>
    %cst_42 = arith.constant -1.000000e+30 : f32
    %79 = vector.broadcast %cst_42 : f32 to vector<32x32xf32>
    %80 = arith.select %78, %23, %79 : vector<32x32xi1>, vector<32x32xf32>
    %cst_43 = arith.constant dense<0xFF800000> : vector<32xf32>
    %81 = vector.multi_reduction <maximumf>, %80, %cst_43 [0] : vector<32x32xf32> to vector<32xf32>
    %82 = vector.shape_cast %81 : vector<32xf32> to vector<1x32xf32>
    %83 = vector.broadcast %82 : vector<1x32xf32> to vector<32x32xf32>
    %84 = arith.subf %80, %83 : vector<32x32xf32>
    %85 = math.exp %84 : vector<32x32xf32>
    %86 = arith.mulf %85, %76 : vector<32x32xf32>
    %cst_44 = arith.constant dense<0.000000e+00> : vector<32xf32>
    %87 = vector.multi_reduction <add>, %86, %cst_44 [0] : vector<32x32xf32> to vector<32xf32>
    %88 = vector.shape_cast %87 : vector<32xf32> to vector<1x32xf32>
    %cst_45 = arith.constant 0.000000e+00 : f32
    %89 = vector.broadcast %cst_45 : f32 to vector<1x32xf32>
    %90 = arith.cmpf ole, %88, %89 : vector<1x32xf32>
    %cst_46 = arith.constant 1.000000e+00 : f32
    %91 = vector.broadcast %cst_46 : f32 to vector<1x32xf32>
    %92 = arith.select %90, %91, %88 : vector<1x32xi1>, vector<1x32xf32>
    %93 = tpu.reciprocal %92 {approx = true} : vector<1x32xf32> -> vector<1x32xf32>
    %94 = vector.broadcast %93 : vector<1x32xf32> to vector<32x32xf32>
    %95 = arith.mulf %86, %94 : vector<32x32xf32>
    %cst_47 = arith.constant dense<0.000000e+00> : vector<32x32xf32>
    %96 = tpu.matmul %95, %0, %cst_47 {dimension_numbers = #tpu.dot_dimension_numbers<[0], [0], [1], [1], [0, 1, 1, 1], [], []>} : vector<32x32xf32>, vector<32x32xf32>, vector<32x32xf32> -> vector<32x32xf32>
    %97 = vector.broadcast %50 : vector<1x1xf32> to vector<32x32xf32>
    %98 = arith.mulf %97, %96 : vector<32x32xf32>
    %99 = arith.addf %74, %98 : vector<32x32xf32>
    %c1 = arith.constant 1 : index
    %c0_48 = arith.constant 0 : index
    %c0_49 = arith.constant 0 : index
    %100 = vector.load %arg1[%c1, %c0_48, %c0_49] : memref<4x32x32xf32, #tpu.memory_space<vmem>>, vector<1x32x32xf32>
    %101 = vector.shape_cast %100 : vector<1x32x32xf32> to vector<32x32xf32>
    %cst_50 = arith.constant 0.000000e+00 : f32
    %102 = vector.broadcast %cst_50 : f32 to vector<32x32xf32>
    %103 = arith.cmpf ogt, %101, %102 : vector<32x32xf32>
    %cst_51 = arith.constant -1.000000e+30 : f32
    %104 = vector.broadcast %cst_51 : f32 to vector<32x32xf32>
    %105 = arith.select %103, %23, %104 : vector<32x32xi1>, vector<32x32xf32>
    %cst_52 = arith.constant dense<0xFF800000> : vector<32xf32>
    %106 = vector.multi_reduction <maximumf>, %105, %cst_52 [0] : vector<32x32xf32> to vector<32xf32>
    %107 = vector.shape_cast %106 : vector<32xf32> to vector<1x32xf32>
    %108 = vector.broadcast %107 : vector<1x32xf32> to vector<32x32xf32>
    %109 = arith.subf %105, %108 : vector<32x32xf32>
    %110 = math.exp %109 : vector<32x32xf32>
    %111 = arith.mulf %110, %101 : vector<32x32xf32>
    %cst_53 = arith.constant dense<0.000000e+00> : vector<32xf32>
    %112 = vector.multi_reduction <add>, %111, %cst_53 [0] : vector<32x32xf32> to vector<32xf32>
    %113 = vector.shape_cast %112 : vector<32xf32> to vector<1x32xf32>
    %cst_54 = arith.constant 0.000000e+00 : f32
    %114 = vector.broadcast %cst_54 : f32 to vector<1x32xf32>
    %115 = arith.cmpf ole, %113, %114 : vector<1x32xf32>
    %cst_55 = arith.constant 1.000000e+00 : f32
    %116 = vector.broadcast %cst_55 : f32 to vector<1x32xf32>
    %117 = arith.select %115, %116, %113 : vector<1x32xi1>, vector<1x32xf32>
    %118 = tpu.reciprocal %117 {approx = true} : vector<1x32xf32> -> vector<1x32xf32>
    %119 = vector.broadcast %118 : vector<1x32xf32> to vector<32x32xf32>
    %120 = arith.mulf %111, %119 : vector<32x32xf32>
    %cst_56 = arith.constant dense<0.000000e+00> : vector<32x32xf32>
    %121 = tpu.matmul %120, %0, %cst_56 {dimension_numbers = #tpu.dot_dimension_numbers<[0], [0], [1], [1], [0, 1, 1, 1], [], []>} : vector<32x32xf32>, vector<32x32xf32>, vector<32x32xf32> -> vector<32x32xf32>
    %122 = vector.broadcast %72 : vector<1x1xf32> to vector<32x32xf32>
    %123 = arith.mulf %122, %121 : vector<32x32xf32>
    %124 = arith.addf %99, %123 : vector<32x32xf32>
    %c2 = arith.constant 2 : index
    %c0_57 = arith.constant 0 : index
    %c0_58 = arith.constant 0 : index
    %125 = vector.load %arg1[%c2, %c0_57, %c0_58] : memref<4x32x32xf32, #tpu.memory_space<vmem>>, vector<1x32x32xf32>
    %126 = vector.shape_cast %125 : vector<1x32x32xf32> to vector<32x32xf32>
    %cst_59 = arith.constant 0.000000e+00 : f32
    %127 = vector.broadcast %cst_59 : f32 to vector<32x32xf32>
    %128 = arith.cmpf ogt, %126, %127 : vector<32x32xf32>
    %cst_60 = arith.constant -1.000000e+30 : f32
    %129 = vector.broadcast %cst_60 : f32 to vector<32x32xf32>
    %130 = arith.select %128, %23, %129 : vector<32x32xi1>, vector<32x32xf32>
    %cst_61 = arith.constant dense<0xFF800000> : vector<32xf32>
    %131 = vector.multi_reduction <maximumf>, %130, %cst_61 [0] : vector<32x32xf32> to vector<32xf32>
    %132 = vector.shape_cast %131 : vector<32xf32> to vector<1x32xf32>
    %133 = vector.broadcast %132 : vector<1x32xf32> to vector<32x32xf32>
    %134 = arith.subf %130, %133 : vector<32x32xf32>
    %135 = math.exp %134 : vector<32x32xf32>
    %136 = arith.mulf %135, %126 : vector<32x32xf32>
    %cst_62 = arith.constant dense<0.000000e+00> : vector<32xf32>
    %137 = vector.multi_reduction <add>, %136, %cst_62 [0] : vector<32x32xf32> to vector<32xf32>
    %138 = vector.shape_cast %137 : vector<32xf32> to vector<1x32xf32>
    %cst_63 = arith.constant 0.000000e+00 : f32
    %139 = vector.broadcast %cst_63 : f32 to vector<1x32xf32>
    %140 = arith.cmpf ole, %138, %139 : vector<1x32xf32>
    %cst_64 = arith.constant 1.000000e+00 : f32
    %141 = vector.broadcast %cst_64 : f32 to vector<1x32xf32>
    %142 = arith.select %140, %141, %138 : vector<1x32xi1>, vector<1x32xf32>
    %143 = tpu.reciprocal %142 {approx = true} : vector<1x32xf32> -> vector<1x32xf32>
    %144 = vector.broadcast %143 : vector<1x32xf32> to vector<32x32xf32>
    %145 = arith.mulf %136, %144 : vector<32x32xf32>
    %cst_65 = arith.constant dense<0.000000e+00> : vector<32x32xf32>
    %146 = tpu.matmul %145, %0, %cst_65 {dimension_numbers = #tpu.dot_dimension_numbers<[0], [0], [1], [1], [0, 1, 1, 1], [], []>} : vector<32x32xf32>, vector<32x32xf32>, vector<32x32xf32> -> vector<32x32xf32>
    %147 = vector.broadcast %51 : vector<1x1xf32> to vector<32x32xf32>
    %148 = arith.mulf %147, %146 : vector<32x32xf32>
    %149 = arith.addf %124, %148 : vector<32x32xf32>
    %c3 = arith.constant 3 : index
    %c0_66 = arith.constant 0 : index
    %c0_67 = arith.constant 0 : index
    %150 = vector.load %arg1[%c3, %c0_66, %c0_67] : memref<4x32x32xf32, #tpu.memory_space<vmem>>, vector<1x32x32xf32>
    %151 = vector.shape_cast %150 : vector<1x32x32xf32> to vector<32x32xf32>
    %cst_68 = arith.constant 0.000000e+00 : f32
    %152 = vector.broadcast %cst_68 : f32 to vector<32x32xf32>
    %153 = arith.cmpf ogt, %151, %152 : vector<32x32xf32>
    %cst_69 = arith.constant -1.000000e+30 : f32
    %154 = vector.broadcast %cst_69 : f32 to vector<32x32xf32>
    %155 = arith.select %153, %23, %154 : vector<32x32xi1>, vector<32x32xf32>
    %cst_70 = arith.constant dense<0xFF800000> : vector<32xf32>
    %156 = vector.multi_reduction <maximumf>, %155, %cst_70 [0] : vector<32x32xf32> to vector<32xf32>
    %157 = vector.shape_cast %156 : vector<32xf32> to vector<1x32xf32>
    %158 = vector.broadcast %157 : vector<1x32xf32> to vector<32x32xf32>
    %159 = arith.subf %155, %158 : vector<32x32xf32>
    %160 = math.exp %159 : vector<32x32xf32>
    %161 = arith.mulf %160, %151 : vector<32x32xf32>
    %cst_71 = arith.constant dense<0.000000e+00> : vector<32xf32>
    %162 = vector.multi_reduction <add>, %161, %cst_71 [0] : vector<32x32xf32> to vector<32xf32>
    %163 = vector.shape_cast %162 : vector<32xf32> to vector<1x32xf32>
    %cst_72 = arith.constant 0.000000e+00 : f32
    %164 = vector.broadcast %cst_72 : f32 to vector<1x32xf32>
    %165 = arith.cmpf ole, %163, %164 : vector<1x32xf32>
    %cst_73 = arith.constant 1.000000e+00 : f32
    %166 = vector.broadcast %cst_73 : f32 to vector<1x32xf32>
    %167 = arith.select %165, %166, %163 : vector<1x32xi1>, vector<1x32xf32>
    %168 = tpu.reciprocal %167 {approx = true} : vector<1x32xf32> -> vector<1x32xf32>
    %169 = vector.broadcast %168 : vector<1x32xf32> to vector<32x32xf32>
    %170 = arith.mulf %161, %169 : vector<32x32xf32>
    %cst_74 = arith.constant dense<0.000000e+00> : vector<32x32xf32>
    %171 = tpu.matmul %170, %0, %cst_74 {dimension_numbers = #tpu.dot_dimension_numbers<[0], [0], [1], [1], [0, 1, 1, 1], [], []>} : vector<32x32xf32>, vector<32x32xf32>, vector<32x32xf32> -> vector<32x32xf32>
    %172 = vector.broadcast %73 : vector<1x1xf32> to vector<32x32xf32>
    %173 = arith.mulf %172, %171 : vector<32x32xf32>
    %174 = arith.addf %149, %173 : vector<32x32xf32>
    %c0_75 = arith.constant 0 : index
    %c0_76 = arith.constant 0 : index
    %c0_77 = arith.constant 0 : index
    %175 = vector.load %arg11[%c0_75, %c0_76, %c0_77] : memref<4x32x32xf32, #tpu.memory_space<vmem>>, vector<1x32x32xf32>
    %176 = vector.shape_cast %175 : vector<1x32x32xf32> to vector<32x32xf32>
    %cst_78 = arith.constant dense<0.000000e+00> : vector<32x32xf32>
    %177 = tpu.matmul %174, %176, %cst_78 {dimension_numbers = #tpu.dot_dimension_numbers<[1], [1], [0], [0], [0, 0, 1, 0], [], []>} : vector<32x32xf32>, vector<32x32xf32>, vector<32x32xf32> -> vector<32x32xf32>
    %178 = arith.addf %5, %177 : vector<32x32xf32>
    %c1_79 = arith.constant 1 : index
    %c0_80 = arith.constant 0 : index
    %c0_81 = arith.constant 0 : index
    %179 = vector.load %arg6[%c1_79, %c0_80, %c0_81] : memref<4x16x32xf32, #tpu.memory_space<vmem>>, vector<1x16x32xf32>
    %180 = vector.shape_cast %179 : vector<1x16x32xf32> to vector<16x32xf32>
    %cst_82 = arith.constant dense<0.000000e+00> : vector<32x16xf32>
    %181 = tpu.matmul %0, %180, %cst_82 {dimension_numbers = #tpu.dot_dimension_numbers<[1], [1], [0], [0], [0, 0, 1, 0], [], []>} : vector<32x32xf32>, vector<16x32xf32>, vector<32x16xf32> -> vector<32x16xf32>
    %c1_83 = arith.constant 1 : index
    %c0_84 = arith.constant 0 : index
    %c0_85 = arith.constant 0 : index
    %182 = vector.load %arg7[%c1_83, %c0_84, %c0_85] : memref<4x1x16xf32, #tpu.memory_space<vmem>>, vector<1x1x16xf32>
    %183 = vector.shape_cast %182 : vector<1x1x16xf32> to vector<1x16xf32>
    %184 = vector.broadcast %183 : vector<1x16xf32> to vector<32x16xf32>
    %185 = arith.mulf %181, %184 : vector<32x16xf32>
    %cst_86 = arith.constant dense<0.000000e+00> : vector<32xf32>
    %186 = vector.multi_reduction <add>, %185, %cst_86 [1] : vector<32x16xf32> to vector<32xf32>
    %187 = vector.shape_cast %186 : vector<32xf32> to vector<32x1xf32>
    %c1_87 = arith.constant 1 : index
    %c0_88 = arith.constant 0 : index
    %c0_89 = arith.constant 0 : index
    %188 = vector.load %arg8[%c1_87, %c0_88, %c0_89] : memref<4x1x16xf32, #tpu.memory_space<vmem>>, vector<1x1x16xf32>
    %189 = vector.shape_cast %188 : vector<1x1x16xf32> to vector<1x16xf32>
    %cst_90 = arith.constant dense<0.000000e+00> : vector<1x32xf32>
    %190 = tpu.matmul %189, %181, %cst_90 {dimension_numbers = #tpu.dot_dimension_numbers<[1], [1], [0], [0], [0, 0, 1, 0], [], []>} : vector<1x16xf32>, vector<32x16xf32>, vector<1x32xf32> -> vector<1x32xf32>
    %191 = vector.broadcast %187 : vector<32x1xf32> to vector<32x32xf32>
    %192 = vector.broadcast %190 : vector<1x32xf32> to vector<32x32xf32>
    %193 = arith.addf %191, %192 : vector<32x32xf32>
    %cst_91 = arith.constant 0.00999999977 : f32
    %194 = vector.broadcast %cst_91 : f32 to vector<32x32xf32>
    %195 = arith.mulf %194, %193 : vector<32x32xf32>
    %196 = arith.maximumf %193, %195 : vector<32x32xf32>
    %c1_92 = arith.constant 1 : index
    %c0_93 = arith.constant 0 : index
    %c0_94 = arith.constant 0 : index
    %197 = vector.load %arg9[%c1_92, %c0_93, %c0_94] : memref<4x16x32xf32, #tpu.memory_space<vmem>>, vector<1x16x32xf32>
    %198 = vector.shape_cast %197 : vector<1x16x32xf32> to vector<16x32xf32>
    %cst_95 = arith.constant dense<0.000000e+00> : vector<2x16xf32>
    %199 = tpu.matmul %4, %198, %cst_95 {dimension_numbers = #tpu.dot_dimension_numbers<[1], [1], [0], [0], [0, 0, 1, 0], [], []>} : vector<2x32xf32>, vector<16x32xf32>, vector<2x16xf32> -> vector<2x16xf32>
    %c1_96 = arith.constant 1 : index
    %c0_97 = arith.constant 0 : index
    %c0_98 = arith.constant 0 : index
    %200 = vector.load %arg10[%c1_96, %c0_97, %c0_98] : memref<4x16x32xf32, #tpu.memory_space<vmem>>, vector<1x16x32xf32>
    %201 = vector.shape_cast %200 : vector<1x16x32xf32> to vector<16x32xf32>
    %cst_99 = arith.constant dense<0.000000e+00> : vector<2x16xf32>
    %202 = tpu.matmul %4, %201, %cst_99 {dimension_numbers = #tpu.dot_dimension_numbers<[1], [1], [0], [0], [0, 0, 1, 0], [], []>} : vector<2x32xf32>, vector<16x32xf32>, vector<2x16xf32> -> vector<2x16xf32>
    %203 = vector.extract_strided_slice %199 {offsets = [0, 0], sizes = [1, 16], strides = [1, 1]} : vector<2x16xf32> to vector<1x16xf32>
    %204 = vector.extract_strided_slice %202 {offsets = [0, 0], sizes = [1, 16], strides = [1, 1]} : vector<2x16xf32> to vector<1x16xf32>
    %205 = arith.mulf %203, %204 : vector<1x16xf32>
    %cst_100 = arith.constant dense<0.000000e+00> : vector<1xf32>
    %206 = vector.multi_reduction <add>, %205, %cst_100 [1] : vector<1x16xf32> to vector<1xf32>
    %207 = vector.shape_cast %206 : vector<1xf32> to vector<1x1xf32>
    %cst_101 = arith.constant 2.500000e-01 : f32
    %208 = vector.broadcast %cst_101 : f32 to vector<1x1xf32>
    %209 = arith.mulf %207, %208 : vector<1x1xf32>
    %210 = vector.extract_strided_slice %199 {offsets = [1, 0], sizes = [1, 16], strides = [1, 1]} : vector<2x16xf32> to vector<1x16xf32>
    %211 = vector.extract_strided_slice %202 {offsets = [0, 0], sizes = [1, 16], strides = [1, 1]} : vector<2x16xf32> to vector<1x16xf32>
    %212 = arith.mulf %210, %211 : vector<1x16xf32>
    %cst_102 = arith.constant dense<0.000000e+00> : vector<1xf32>
    %213 = vector.multi_reduction <add>, %212, %cst_102 [1] : vector<1x16xf32> to vector<1xf32>
    %214 = vector.shape_cast %213 : vector<1xf32> to vector<1x1xf32>
    %cst_103 = arith.constant 2.500000e-01 : f32
    %215 = vector.broadcast %cst_103 : f32 to vector<1x1xf32>
    %216 = arith.mulf %214, %215 : vector<1x1xf32>
    %217 = arith.maximumf %209, %216 : vector<1x1xf32>
    %218 = arith.subf %209, %217 : vector<1x1xf32>
    %219 = math.exp %218 : vector<1x1xf32>
    %220 = arith.subf %216, %217 : vector<1x1xf32>
    %221 = math.exp %220 : vector<1x1xf32>
    %222 = arith.addf %219, %221 : vector<1x1xf32>
    %223 = arith.divf %219, %222 : vector<1x1xf32>
    %224 = arith.divf %221, %222 : vector<1x1xf32>
    %225 = vector.extract_strided_slice %199 {offsets = [0, 0], sizes = [1, 16], strides = [1, 1]} : vector<2x16xf32> to vector<1x16xf32>
    %226 = vector.extract_strided_slice %202 {offsets = [1, 0], sizes = [1, 16], strides = [1, 1]} : vector<2x16xf32> to vector<1x16xf32>
    %227 = arith.mulf %225, %226 : vector<1x16xf32>
    %cst_104 = arith.constant dense<0.000000e+00> : vector<1xf32>
    %228 = vector.multi_reduction <add>, %227, %cst_104 [1] : vector<1x16xf32> to vector<1xf32>
    %229 = vector.shape_cast %228 : vector<1xf32> to vector<1x1xf32>
    %cst_105 = arith.constant 2.500000e-01 : f32
    %230 = vector.broadcast %cst_105 : f32 to vector<1x1xf32>
    %231 = arith.mulf %229, %230 : vector<1x1xf32>
    %232 = vector.extract_strided_slice %199 {offsets = [1, 0], sizes = [1, 16], strides = [1, 1]} : vector<2x16xf32> to vector<1x16xf32>
    %233 = vector.extract_strided_slice %202 {offsets = [1, 0], sizes = [1, 16], strides = [1, 1]} : vector<2x16xf32> to vector<1x16xf32>
    %234 = arith.mulf %232, %233 : vector<1x16xf32>
    %cst_106 = arith.constant dense<0.000000e+00> : vector<1xf32>
    %235 = vector.multi_reduction <add>, %234, %cst_106 [1] : vector<1x16xf32> to vector<1xf32>
    %236 = vector.shape_cast %235 : vector<1xf32> to vector<1x1xf32>
    %cst_107 = arith.constant 2.500000e-01 : f32
    %237 = vector.broadcast %cst_107 : f32 to vector<1x1xf32>
    %238 = arith.mulf %236, %237 : vector<1x1xf32>
    %239 = arith.maximumf %231, %238 : vector<1x1xf32>
    %240 = arith.subf %231, %239 : vector<1x1xf32>
    %241 = math.exp %240 : vector<1x1xf32>
    %242 = arith.subf %238, %239 : vector<1x1xf32>
    %243 = math.exp %242 : vector<1x1xf32>
    %244 = arith.addf %241, %243 : vector<1x1xf32>
    %245 = arith.divf %241, %244 : vector<1x1xf32>
    %246 = arith.divf %243, %244 : vector<1x1xf32>
    %cst_108 = arith.constant 0.000000e+00 : f32
    %247 = vector.broadcast %cst_108 : f32 to vector<32x32xf32>
    %c0_109 = arith.constant 0 : index
    %c0_110 = arith.constant 0 : index
    %c0_111 = arith.constant 0 : index
    %248 = vector.load %arg1[%c0_109, %c0_110, %c0_111] : memref<4x32x32xf32, #tpu.memory_space<vmem>>, vector<1x32x32xf32>
    %249 = vector.shape_cast %248 : vector<1x32x32xf32> to vector<32x32xf32>
    %cst_112 = arith.constant 0.000000e+00 : f32
    %250 = vector.broadcast %cst_112 : f32 to vector<32x32xf32>
    %251 = arith.cmpf ogt, %249, %250 : vector<32x32xf32>
    %cst_113 = arith.constant -1.000000e+30 : f32
    %252 = vector.broadcast %cst_113 : f32 to vector<32x32xf32>
    %253 = arith.select %251, %196, %252 : vector<32x32xi1>, vector<32x32xf32>
    %cst_114 = arith.constant dense<0xFF800000> : vector<32xf32>
    %254 = vector.multi_reduction <maximumf>, %253, %cst_114 [0] : vector<32x32xf32> to vector<32xf32>
    %255 = vector.shape_cast %254 : vector<32xf32> to vector<1x32xf32>
    %256 = vector.broadcast %255 : vector<1x32xf32> to vector<32x32xf32>
    %257 = arith.subf %253, %256 : vector<32x32xf32>
    %258 = math.exp %257 : vector<32x32xf32>
    %259 = arith.mulf %258, %249 : vector<32x32xf32>
    %cst_115 = arith.constant dense<0.000000e+00> : vector<32xf32>
    %260 = vector.multi_reduction <add>, %259, %cst_115 [0] : vector<32x32xf32> to vector<32xf32>
    %261 = vector.shape_cast %260 : vector<32xf32> to vector<1x32xf32>
    %cst_116 = arith.constant 0.000000e+00 : f32
    %262 = vector.broadcast %cst_116 : f32 to vector<1x32xf32>
    %263 = arith.cmpf ole, %261, %262 : vector<1x32xf32>
    %cst_117 = arith.constant 1.000000e+00 : f32
    %264 = vector.broadcast %cst_117 : f32 to vector<1x32xf32>
    %265 = arith.select %263, %264, %261 : vector<1x32xi1>, vector<1x32xf32>
    %266 = tpu.reciprocal %265 {approx = true} : vector<1x32xf32> -> vector<1x32xf32>
    %267 = vector.broadcast %266 : vector<1x32xf32> to vector<32x32xf32>
    %268 = arith.mulf %259, %267 : vector<32x32xf32>
    %cst_118 = arith.constant dense<0.000000e+00> : vector<32x32xf32>
    %269 = tpu.matmul %268, %0, %cst_118 {dimension_numbers = #tpu.dot_dimension_numbers<[0], [0], [1], [1], [0, 1, 1, 1], [], []>} : vector<32x32xf32>, vector<32x32xf32>, vector<32x32xf32> -> vector<32x32xf32>
    %270 = vector.broadcast %223 : vector<1x1xf32> to vector<32x32xf32>
    %271 = arith.mulf %270, %269 : vector<32x32xf32>
    %272 = arith.addf %247, %271 : vector<32x32xf32>
    %c1_119 = arith.constant 1 : index
    %c0_120 = arith.constant 0 : index
    %c0_121 = arith.constant 0 : index
    %273 = vector.load %arg1[%c1_119, %c0_120, %c0_121] : memref<4x32x32xf32, #tpu.memory_space<vmem>>, vector<1x32x32xf32>
    %274 = vector.shape_cast %273 : vector<1x32x32xf32> to vector<32x32xf32>
    %cst_122 = arith.constant 0.000000e+00 : f32
    %275 = vector.broadcast %cst_122 : f32 to vector<32x32xf32>
    %276 = arith.cmpf ogt, %274, %275 : vector<32x32xf32>
    %cst_123 = arith.constant -1.000000e+30 : f32
    %277 = vector.broadcast %cst_123 : f32 to vector<32x32xf32>
    %278 = arith.select %276, %196, %277 : vector<32x32xi1>, vector<32x32xf32>
    %cst_124 = arith.constant dense<0xFF800000> : vector<32xf32>
    %279 = vector.multi_reduction <maximumf>, %278, %cst_124 [0] : vector<32x32xf32> to vector<32xf32>
    %280 = vector.shape_cast %279 : vector<32xf32> to vector<1x32xf32>
    %281 = vector.broadcast %280 : vector<1x32xf32> to vector<32x32xf32>
    %282 = arith.subf %278, %281 : vector<32x32xf32>
    %283 = math.exp %282 : vector<32x32xf32>
    %284 = arith.mulf %283, %274 : vector<32x32xf32>
    %cst_125 = arith.constant dense<0.000000e+00> : vector<32xf32>
    %285 = vector.multi_reduction <add>, %284, %cst_125 [0] : vector<32x32xf32> to vector<32xf32>
    %286 = vector.shape_cast %285 : vector<32xf32> to vector<1x32xf32>
    %cst_126 = arith.constant 0.000000e+00 : f32
    %287 = vector.broadcast %cst_126 : f32 to vector<1x32xf32>
    %288 = arith.cmpf ole, %286, %287 : vector<1x32xf32>
    %cst_127 = arith.constant 1.000000e+00 : f32
    %289 = vector.broadcast %cst_127 : f32 to vector<1x32xf32>
    %290 = arith.select %288, %289, %286 : vector<1x32xi1>, vector<1x32xf32>
    %291 = tpu.reciprocal %290 {approx = true} : vector<1x32xf32> -> vector<1x32xf32>
    %292 = vector.broadcast %291 : vector<1x32xf32> to vector<32x32xf32>
    %293 = arith.mulf %284, %292 : vector<32x32xf32>
    %cst_128 = arith.constant dense<0.000000e+00> : vector<32x32xf32>
    %294 = tpu.matmul %293, %0, %cst_128 {dimension_numbers = #tpu.dot_dimension_numbers<[0], [0], [1], [1], [0, 1, 1, 1], [], []>} : vector<32x32xf32>, vector<32x32xf32>, vector<32x32xf32> -> vector<32x32xf32>
    %295 = vector.broadcast %245 : vector<1x1xf32> to vector<32x32xf32>
    %296 = arith.mulf %295, %294 : vector<32x32xf32>
    %297 = arith.addf %272, %296 : vector<32x32xf32>
    %c2_129 = arith.constant 2 : index
    %c0_130 = arith.constant 0 : index
    %c0_131 = arith.constant 0 : index
    %298 = vector.load %arg1[%c2_129, %c0_130, %c0_131] : memref<4x32x32xf32, #tpu.memory_space<vmem>>, vector<1x32x32xf32>
    %299 = vector.shape_cast %298 : vector<1x32x32xf32> to vector<32x32xf32>
    %cst_132 = arith.constant 0.000000e+00 : f32
    %300 = vector.broadcast %cst_132 : f32 to vector<32x32xf32>
    %301 = arith.cmpf ogt, %299, %300 : vector<32x32xf32>
    %cst_133 = arith.constant -1.000000e+30 : f32
    %302 = vector.broadcast %cst_133 : f32 to vector<32x32xf32>
    %303 = arith.select %301, %196, %302 : vector<32x32xi1>, vector<32x32xf32>
    %cst_134 = arith.constant dense<0xFF800000> : vector<32xf32>
    %304 = vector.multi_reduction <maximumf>, %303, %cst_134 [0] : vector<32x32xf32> to vector<32xf32>
    %305 = vector.shape_cast %304 : vector<32xf32> to vector<1x32xf32>
    %306 = vector.broadcast %305 : vector<1x32xf32> to vector<32x32xf32>
    %307 = arith.subf %303, %306 : vector<32x32xf32>
    %308 = math.exp %307 : vector<32x32xf32>
    %309 = arith.mulf %308, %299 : vector<32x32xf32>
    %cst_135 = arith.constant dense<0.000000e+00> : vector<32xf32>
    %310 = vector.multi_reduction <add>, %309, %cst_135 [0] : vector<32x32xf32> to vector<32xf32>
    %311 = vector.shape_cast %310 : vector<32xf32> to vector<1x32xf32>
    %cst_136 = arith.constant 0.000000e+00 : f32
    %312 = vector.broadcast %cst_136 : f32 to vector<1x32xf32>
    %313 = arith.cmpf ole, %311, %312 : vector<1x32xf32>
    %cst_137 = arith.constant 1.000000e+00 : f32
    %314 = vector.broadcast %cst_137 : f32 to vector<1x32xf32>
    %315 = arith.select %313, %314, %311 : vector<1x32xi1>, vector<1x32xf32>
    %316 = tpu.reciprocal %315 {approx = true} : vector<1x32xf32> -> vector<1x32xf32>
    %317 = vector.broadcast %316 : vector<1x32xf32> to vector<32x32xf32>
    %318 = arith.mulf %309, %317 : vector<32x32xf32>
    %cst_138 = arith.constant dense<0.000000e+00> : vector<32x32xf32>
    %319 = tpu.matmul %318, %0, %cst_138 {dimension_numbers = #tpu.dot_dimension_numbers<[0], [0], [1], [1], [0, 1, 1, 1], [], []>} : vector<32x32xf32>, vector<32x32xf32>, vector<32x32xf32> -> vector<32x32xf32>
    %320 = vector.broadcast %224 : vector<1x1xf32> to vector<32x32xf32>
    %321 = arith.mulf %320, %319 : vector<32x32xf32>
    %322 = arith.addf %297, %321 : vector<32x32xf32>
    %c3_139 = arith.constant 3 : index
    %c0_140 = arith.constant 0 : index
    %c0_141 = arith.constant 0 : index
    %323 = vector.load %arg1[%c3_139, %c0_140, %c0_141] : memref<4x32x32xf32, #tpu.memory_space<vmem>>, vector<1x32x32xf32>
    %324 = vector.shape_cast %323 : vector<1x32x32xf32> to vector<32x32xf32>
    %cst_142 = arith.constant 0.000000e+00 : f32
    %325 = vector.broadcast %cst_142 : f32 to vector<32x32xf32>
    %326 = arith.cmpf ogt, %324, %325 : vector<32x32xf32>
    %cst_143 = arith.constant -1.000000e+30 : f32
    %327 = vector.broadcast %cst_143 : f32 to vector<32x32xf32>
    %328 = arith.select %326, %196, %327 : vector<32x32xi1>, vector<32x32xf32>
    %cst_144 = arith.constant dense<0xFF800000> : vector<32xf32>
    %329 = vector.multi_reduction <maximumf>, %328, %cst_144 [0] : vector<32x32xf32> to vector<32xf32>
    %330 = vector.shape_cast %329 : vector<32xf32> to vector<1x32xf32>
    %331 = vector.broadcast %330 : vector<1x32xf32> to vector<32x32xf32>
    %332 = arith.subf %328, %331 : vector<32x32xf32>
    %333 = math.exp %332 : vector<32x32xf32>
    %334 = arith.mulf %333, %324 : vector<32x32xf32>
    %cst_145 = arith.constant dense<0.000000e+00> : vector<32xf32>
    %335 = vector.multi_reduction <add>, %334, %cst_145 [0] : vector<32x32xf32> to vector<32xf32>
    %336 = vector.shape_cast %335 : vector<32xf32> to vector<1x32xf32>
    %cst_146 = arith.constant 0.000000e+00 : f32
    %337 = vector.broadcast %cst_146 : f32 to vector<1x32xf32>
    %338 = arith.cmpf ole, %336, %337 : vector<1x32xf32>
    %cst_147 = arith.constant 1.000000e+00 : f32
    %339 = vector.broadcast %cst_147 : f32 to vector<1x32xf32>
    %340 = arith.select %338, %339, %336 : vector<1x32xi1>, vector<1x32xf32>
    %341 = tpu.reciprocal %340 {approx = true} : vector<1x32xf32> -> vector<1x32xf32>
    %342 = vector.broadcast %341 : vector<1x32xf32> to vector<32x32xf32>
    %343 = arith.mulf %334, %342 : vector<32x32xf32>
    %cst_148 = arith.constant dense<0.000000e+00> : vector<32x32xf32>
    %344 = tpu.matmul %343, %0, %cst_148 {dimension_numbers = #tpu.dot_dimension_numbers<[0], [0], [1], [1], [0, 1, 1, 1], [], []>} : vector<32x32xf32>, vector<32x32xf32>, vector<32x32xf32> -> vector<32x32xf32>
    %345 = vector.broadcast %246 : vector<1x1xf32> to vector<32x32xf32>
    %346 = arith.mulf %345, %344 : vector<32x32xf32>
    %347 = arith.addf %322, %346 : vector<32x32xf32>
    %c1_149 = arith.constant 1 : index
    %c0_150 = arith.constant 0 : index
    %c0_151 = arith.constant 0 : index
    %348 = vector.load %arg11[%c1_149, %c0_150, %c0_151] : memref<4x32x32xf32, #tpu.memory_space<vmem>>, vector<1x32x32xf32>
    %349 = vector.shape_cast %348 : vector<1x32x32xf32> to vector<32x32xf32>
    %cst_152 = arith.constant dense<0.000000e+00> : vector<32x32xf32>
    %350 = tpu.matmul %347, %349, %cst_152 {dimension_numbers = #tpu.dot_dimension_numbers<[1], [1], [0], [0], [0, 0, 1, 0], [], []>} : vector<32x32xf32>, vector<32x32xf32>, vector<32x32xf32> -> vector<32x32xf32>
    %351 = arith.addf %178, %350 : vector<32x32xf32>
    %c0_153 = arith.constant 0 : index
    %c0_154 = arith.constant 0 : index
    %c0_155 = arith.constant 0 : index
    %352 = vector.load %arg12[%c0_153, %c0_154, %c0_155] : memref<2x1x32xf32, #tpu.memory_space<vmem>>, vector<1x1x32xf32>
    %353 = vector.shape_cast %352 : vector<1x1x32xf32> to vector<1x32xf32>
    %354 = vector.broadcast %353 : vector<1x32xf32> to vector<32x32xf32>
    %355 = arith.addf %351, %354 : vector<32x32xf32>
    %356 = vector.broadcast %2 : vector<32x1xf32> to vector<32x32xf32>
    %357 = arith.mulf %355, %356 : vector<32x32xf32>
    %358 = vector.broadcast %3 : vector<32x1xf32> to vector<32x32xf32>
    %359 = arith.mulf %0, %358 : vector<32x32xf32>
    %360 = arith.addf %357, %359 : vector<32x32xf32>
    %c0_156 = arith.constant 0 : index
    %c0_157 = arith.constant 0 : index
    %c0_158 = arith.constant 0 : index
    %361 = vector.load %arg5[%c0_156, %c0_157, %c0_158] : memref<2x32x1xf32, #tpu.memory_space<vmem>>, vector<1x32x1xf32>
    %362 = vector.shape_cast %361 : vector<1x32x1xf32> to vector<32x1xf32>
    %363 = vector.broadcast %362 : vector<32x1xf32> to vector<32x32xf32>
    %364 = arith.mulf %360, %363 : vector<32x32xf32>
    %365 = arith.addf %0, %364 : vector<32x32xf32>
    %cst_159 = arith.constant dense<0.000000e+00> : vector<2x32xf32>
    %366 = tpu.matmul %1, %360, %cst_159 {dimension_numbers = #tpu.dot_dimension_numbers<[1], [0], [0], [1], [0, 0, 1, 1], [], []>} : vector<2x32xf32>, vector<32x32xf32>, vector<2x32xf32> -> vector<2x32xf32>
    %cst_160 = arith.constant 0.000000e+00 : f32
    %367 = vector.broadcast %cst_160 : f32 to vector<32x32xf32>
    %c2_161 = arith.constant 2 : index
    %c0_162 = arith.constant 0 : index
    %c0_163 = arith.constant 0 : index
    %368 = vector.load %arg6[%c2_161, %c0_162, %c0_163] : memref<4x16x32xf32, #tpu.memory_space<vmem>>, vector<1x16x32xf32>
    %369 = vector.shape_cast %368 : vector<1x16x32xf32> to vector<16x32xf32>
    %cst_164 = arith.constant dense<0.000000e+00> : vector<32x16xf32>
    %370 = tpu.matmul %360, %369, %cst_164 {dimension_numbers = #tpu.dot_dimension_numbers<[1], [1], [0], [0], [0, 0, 1, 0], [], []>} : vector<32x32xf32>, vector<16x32xf32>, vector<32x16xf32> -> vector<32x16xf32>
    %c2_165 = arith.constant 2 : index
    %c0_166 = arith.constant 0 : index
    %c0_167 = arith.constant 0 : index
    %371 = vector.load %arg7[%c2_165, %c0_166, %c0_167] : memref<4x1x16xf32, #tpu.memory_space<vmem>>, vector<1x1x16xf32>
    %372 = vector.shape_cast %371 : vector<1x1x16xf32> to vector<1x16xf32>
    %373 = vector.broadcast %372 : vector<1x16xf32> to vector<32x16xf32>
    %374 = arith.mulf %370, %373 : vector<32x16xf32>
    %cst_168 = arith.constant dense<0.000000e+00> : vector<32xf32>
    %375 = vector.multi_reduction <add>, %374, %cst_168 [1] : vector<32x16xf32> to vector<32xf32>
    %376 = vector.shape_cast %375 : vector<32xf32> to vector<32x1xf32>
    %c2_169 = arith.constant 2 : index
    %c0_170 = arith.constant 0 : index
    %c0_171 = arith.constant 0 : index
    %377 = vector.load %arg8[%c2_169, %c0_170, %c0_171] : memref<4x1x16xf32, #tpu.memory_space<vmem>>, vector<1x1x16xf32>
    %378 = vector.shape_cast %377 : vector<1x1x16xf32> to vector<1x16xf32>
    %cst_172 = arith.constant dense<0.000000e+00> : vector<1x32xf32>
    %379 = tpu.matmul %378, %370, %cst_172 {dimension_numbers = #tpu.dot_dimension_numbers<[1], [1], [0], [0], [0, 0, 1, 0], [], []>} : vector<1x16xf32>, vector<32x16xf32>, vector<1x32xf32> -> vector<1x32xf32>
    %380 = vector.broadcast %376 : vector<32x1xf32> to vector<32x32xf32>
    %381 = vector.broadcast %379 : vector<1x32xf32> to vector<32x32xf32>
    %382 = arith.addf %380, %381 : vector<32x32xf32>
    %cst_173 = arith.constant 0.00999999977 : f32
    %383 = vector.broadcast %cst_173 : f32 to vector<32x32xf32>
    %384 = arith.mulf %383, %382 : vector<32x32xf32>
    %385 = arith.maximumf %382, %384 : vector<32x32xf32>
    %c2_174 = arith.constant 2 : index
    %c0_175 = arith.constant 0 : index
    %c0_176 = arith.constant 0 : index
    %386 = vector.load %arg9[%c2_174, %c0_175, %c0_176] : memref<4x16x32xf32, #tpu.memory_space<vmem>>, vector<1x16x32xf32>
    %387 = vector.shape_cast %386 : vector<1x16x32xf32> to vector<16x32xf32>
    %cst_177 = arith.constant dense<0.000000e+00> : vector<2x16xf32>
    %388 = tpu.matmul %366, %387, %cst_177 {dimension_numbers = #tpu.dot_dimension_numbers<[1], [1], [0], [0], [0, 0, 1, 0], [], []>} : vector<2x32xf32>, vector<16x32xf32>, vector<2x16xf32> -> vector<2x16xf32>
    %c2_178 = arith.constant 2 : index
    %c0_179 = arith.constant 0 : index
    %c0_180 = arith.constant 0 : index
    %389 = vector.load %arg10[%c2_178, %c0_179, %c0_180] : memref<4x16x32xf32, #tpu.memory_space<vmem>>, vector<1x16x32xf32>
    %390 = vector.shape_cast %389 : vector<1x16x32xf32> to vector<16x32xf32>
    %cst_181 = arith.constant dense<0.000000e+00> : vector<2x16xf32>
    %391 = tpu.matmul %366, %390, %cst_181 {dimension_numbers = #tpu.dot_dimension_numbers<[1], [1], [0], [0], [0, 0, 1, 0], [], []>} : vector<2x32xf32>, vector<16x32xf32>, vector<2x16xf32> -> vector<2x16xf32>
    %392 = vector.extract_strided_slice %388 {offsets = [0, 0], sizes = [1, 16], strides = [1, 1]} : vector<2x16xf32> to vector<1x16xf32>
    %393 = vector.extract_strided_slice %391 {offsets = [0, 0], sizes = [1, 16], strides = [1, 1]} : vector<2x16xf32> to vector<1x16xf32>
    %394 = arith.mulf %392, %393 : vector<1x16xf32>
    %cst_182 = arith.constant dense<0.000000e+00> : vector<1xf32>
    %395 = vector.multi_reduction <add>, %394, %cst_182 [1] : vector<1x16xf32> to vector<1xf32>
    %396 = vector.shape_cast %395 : vector<1xf32> to vector<1x1xf32>
    %cst_183 = arith.constant 2.500000e-01 : f32
    %397 = vector.broadcast %cst_183 : f32 to vector<1x1xf32>
    %398 = arith.mulf %396, %397 : vector<1x1xf32>
    %399 = vector.extract_strided_slice %388 {offsets = [1, 0], sizes = [1, 16], strides = [1, 1]} : vector<2x16xf32> to vector<1x16xf32>
    %400 = vector.extract_strided_slice %391 {offsets = [0, 0], sizes = [1, 16], strides = [1, 1]} : vector<2x16xf32> to vector<1x16xf32>
    %401 = arith.mulf %399, %400 : vector<1x16xf32>
    %cst_184 = arith.constant dense<0.000000e+00> : vector<1xf32>
    %402 = vector.multi_reduction <add>, %401, %cst_184 [1] : vector<1x16xf32> to vector<1xf32>
    %403 = vector.shape_cast %402 : vector<1xf32> to vector<1x1xf32>
    %cst_185 = arith.constant 2.500000e-01 : f32
    %404 = vector.broadcast %cst_185 : f32 to vector<1x1xf32>
    %405 = arith.mulf %403, %404 : vector<1x1xf32>
    %406 = arith.maximumf %398, %405 : vector<1x1xf32>
    %407 = arith.subf %398, %406 : vector<1x1xf32>
    %408 = math.exp %407 : vector<1x1xf32>
    %409 = arith.subf %405, %406 : vector<1x1xf32>
    %410 = math.exp %409 : vector<1x1xf32>
    %411 = arith.addf %408, %410 : vector<1x1xf32>
    %412 = arith.divf %408, %411 : vector<1x1xf32>
    %413 = arith.divf %410, %411 : vector<1x1xf32>
    %414 = vector.extract_strided_slice %388 {offsets = [0, 0], sizes = [1, 16], strides = [1, 1]} : vector<2x16xf32> to vector<1x16xf32>
    %415 = vector.extract_strided_slice %391 {offsets = [1, 0], sizes = [1, 16], strides = [1, 1]} : vector<2x16xf32> to vector<1x16xf32>
    %416 = arith.mulf %414, %415 : vector<1x16xf32>
    %cst_186 = arith.constant dense<0.000000e+00> : vector<1xf32>
    %417 = vector.multi_reduction <add>, %416, %cst_186 [1] : vector<1x16xf32> to vector<1xf32>
    %418 = vector.shape_cast %417 : vector<1xf32> to vector<1x1xf32>
    %cst_187 = arith.constant 2.500000e-01 : f32
    %419 = vector.broadcast %cst_187 : f32 to vector<1x1xf32>
    %420 = arith.mulf %418, %419 : vector<1x1xf32>
    %421 = vector.extract_strided_slice %388 {offsets = [1, 0], sizes = [1, 16], strides = [1, 1]} : vector<2x16xf32> to vector<1x16xf32>
    %422 = vector.extract_strided_slice %391 {offsets = [1, 0], sizes = [1, 16], strides = [1, 1]} : vector<2x16xf32> to vector<1x16xf32>
    %423 = arith.mulf %421, %422 : vector<1x16xf32>
    %cst_188 = arith.constant dense<0.000000e+00> : vector<1xf32>
    %424 = vector.multi_reduction <add>, %423, %cst_188 [1] : vector<1x16xf32> to vector<1xf32>
    %425 = vector.shape_cast %424 : vector<1xf32> to vector<1x1xf32>
    %cst_189 = arith.constant 2.500000e-01 : f32
    %426 = vector.broadcast %cst_189 : f32 to vector<1x1xf32>
    %427 = arith.mulf %425, %426 : vector<1x1xf32>
    %428 = arith.maximumf %420, %427 : vector<1x1xf32>
    %429 = arith.subf %420, %428 : vector<1x1xf32>
    %430 = math.exp %429 : vector<1x1xf32>
    %431 = arith.subf %427, %428 : vector<1x1xf32>
    %432 = math.exp %431 : vector<1x1xf32>
    %433 = arith.addf %430, %432 : vector<1x1xf32>
    %434 = arith.divf %430, %433 : vector<1x1xf32>
    %435 = arith.divf %432, %433 : vector<1x1xf32>
    %cst_190 = arith.constant 0.000000e+00 : f32
    %436 = vector.broadcast %cst_190 : f32 to vector<32x32xf32>
    %c0_191 = arith.constant 0 : index
    %c0_192 = arith.constant 0 : index
    %c0_193 = arith.constant 0 : index
    %437 = vector.load %arg1[%c0_191, %c0_192, %c0_193] : memref<4x32x32xf32, #tpu.memory_space<vmem>>, vector<1x32x32xf32>
    %438 = vector.shape_cast %437 : vector<1x32x32xf32> to vector<32x32xf32>
    %cst_194 = arith.constant 0.000000e+00 : f32
    %439 = vector.broadcast %cst_194 : f32 to vector<32x32xf32>
    %440 = arith.cmpf ogt, %438, %439 : vector<32x32xf32>
    %cst_195 = arith.constant -1.000000e+30 : f32
    %441 = vector.broadcast %cst_195 : f32 to vector<32x32xf32>
    %442 = arith.select %440, %385, %441 : vector<32x32xi1>, vector<32x32xf32>
    %cst_196 = arith.constant dense<0xFF800000> : vector<32xf32>
    %443 = vector.multi_reduction <maximumf>, %442, %cst_196 [0] : vector<32x32xf32> to vector<32xf32>
    %444 = vector.shape_cast %443 : vector<32xf32> to vector<1x32xf32>
    %445 = vector.broadcast %444 : vector<1x32xf32> to vector<32x32xf32>
    %446 = arith.subf %442, %445 : vector<32x32xf32>
    %447 = math.exp %446 : vector<32x32xf32>
    %448 = arith.mulf %447, %438 : vector<32x32xf32>
    %cst_197 = arith.constant dense<0.000000e+00> : vector<32xf32>
    %449 = vector.multi_reduction <add>, %448, %cst_197 [0] : vector<32x32xf32> to vector<32xf32>
    %450 = vector.shape_cast %449 : vector<32xf32> to vector<1x32xf32>
    %cst_198 = arith.constant 0.000000e+00 : f32
    %451 = vector.broadcast %cst_198 : f32 to vector<1x32xf32>
    %452 = arith.cmpf ole, %450, %451 : vector<1x32xf32>
    %cst_199 = arith.constant 1.000000e+00 : f32
    %453 = vector.broadcast %cst_199 : f32 to vector<1x32xf32>
    %454 = arith.select %452, %453, %450 : vector<1x32xi1>, vector<1x32xf32>
    %455 = tpu.reciprocal %454 {approx = true} : vector<1x32xf32> -> vector<1x32xf32>
    %456 = vector.broadcast %455 : vector<1x32xf32> to vector<32x32xf32>
    %457 = arith.mulf %448, %456 : vector<32x32xf32>
    %cst_200 = arith.constant dense<0.000000e+00> : vector<32x32xf32>
    %458 = tpu.matmul %457, %360, %cst_200 {dimension_numbers = #tpu.dot_dimension_numbers<[0], [0], [1], [1], [0, 1, 1, 1], [], []>} : vector<32x32xf32>, vector<32x32xf32>, vector<32x32xf32> -> vector<32x32xf32>
    %459 = vector.broadcast %412 : vector<1x1xf32> to vector<32x32xf32>
    %460 = arith.mulf %459, %458 : vector<32x32xf32>
    %461 = arith.addf %436, %460 : vector<32x32xf32>
    %c1_201 = arith.constant 1 : index
    %c0_202 = arith.constant 0 : index
    %c0_203 = arith.constant 0 : index
    %462 = vector.load %arg1[%c1_201, %c0_202, %c0_203] : memref<4x32x32xf32, #tpu.memory_space<vmem>>, vector<1x32x32xf32>
    %463 = vector.shape_cast %462 : vector<1x32x32xf32> to vector<32x32xf32>
    %cst_204 = arith.constant 0.000000e+00 : f32
    %464 = vector.broadcast %cst_204 : f32 to vector<32x32xf32>
    %465 = arith.cmpf ogt, %463, %464 : vector<32x32xf32>
    %cst_205 = arith.constant -1.000000e+30 : f32
    %466 = vector.broadcast %cst_205 : f32 to vector<32x32xf32>
    %467 = arith.select %465, %385, %466 : vector<32x32xi1>, vector<32x32xf32>
    %cst_206 = arith.constant dense<0xFF800000> : vector<32xf32>
    %468 = vector.multi_reduction <maximumf>, %467, %cst_206 [0] : vector<32x32xf32> to vector<32xf32>
    %469 = vector.shape_cast %468 : vector<32xf32> to vector<1x32xf32>
    %470 = vector.broadcast %469 : vector<1x32xf32> to vector<32x32xf32>
    %471 = arith.subf %467, %470 : vector<32x32xf32>
    %472 = math.exp %471 : vector<32x32xf32>
    %473 = arith.mulf %472, %463 : vector<32x32xf32>
    %cst_207 = arith.constant dense<0.000000e+00> : vector<32xf32>
    %474 = vector.multi_reduction <add>, %473, %cst_207 [0] : vector<32x32xf32> to vector<32xf32>
    %475 = vector.shape_cast %474 : vector<32xf32> to vector<1x32xf32>
    %cst_208 = arith.constant 0.000000e+00 : f32
    %476 = vector.broadcast %cst_208 : f32 to vector<1x32xf32>
    %477 = arith.cmpf ole, %475, %476 : vector<1x32xf32>
    %cst_209 = arith.constant 1.000000e+00 : f32
    %478 = vector.broadcast %cst_209 : f32 to vector<1x32xf32>
    %479 = arith.select %477, %478, %475 : vector<1x32xi1>, vector<1x32xf32>
    %480 = tpu.reciprocal %479 {approx = true} : vector<1x32xf32> -> vector<1x32xf32>
    %481 = vector.broadcast %480 : vector<1x32xf32> to vector<32x32xf32>
    %482 = arith.mulf %473, %481 : vector<32x32xf32>
    %cst_210 = arith.constant dense<0.000000e+00> : vector<32x32xf32>
    %483 = tpu.matmul %482, %360, %cst_210 {dimension_numbers = #tpu.dot_dimension_numbers<[0], [0], [1], [1], [0, 1, 1, 1], [], []>} : vector<32x32xf32>, vector<32x32xf32>, vector<32x32xf32> -> vector<32x32xf32>
    %484 = vector.broadcast %434 : vector<1x1xf32> to vector<32x32xf32>
    %485 = arith.mulf %484, %483 : vector<32x32xf32>
    %486 = arith.addf %461, %485 : vector<32x32xf32>
    %c2_211 = arith.constant 2 : index
    %c0_212 = arith.constant 0 : index
    %c0_213 = arith.constant 0 : index
    %487 = vector.load %arg1[%c2_211, %c0_212, %c0_213] : memref<4x32x32xf32, #tpu.memory_space<vmem>>, vector<1x32x32xf32>
    %488 = vector.shape_cast %487 : vector<1x32x32xf32> to vector<32x32xf32>
    %cst_214 = arith.constant 0.000000e+00 : f32
    %489 = vector.broadcast %cst_214 : f32 to vector<32x32xf32>
    %490 = arith.cmpf ogt, %488, %489 : vector<32x32xf32>
    %cst_215 = arith.constant -1.000000e+30 : f32
    %491 = vector.broadcast %cst_215 : f32 to vector<32x32xf32>
    %492 = arith.select %490, %385, %491 : vector<32x32xi1>, vector<32x32xf32>
    %cst_216 = arith.constant dense<0xFF800000> : vector<32xf32>
    %493 = vector.multi_reduction <maximumf>, %492, %cst_216 [0] : vector<32x32xf32> to vector<32xf32>
    %494 = vector.shape_cast %493 : vector<32xf32> to vector<1x32xf32>
    %495 = vector.broadcast %494 : vector<1x32xf32> to vector<32x32xf32>
    %496 = arith.subf %492, %495 : vector<32x32xf32>
    %497 = math.exp %496 : vector<32x32xf32>
    %498 = arith.mulf %497, %488 : vector<32x32xf32>
    %cst_217 = arith.constant dense<0.000000e+00> : vector<32xf32>
    %499 = vector.multi_reduction <add>, %498, %cst_217 [0] : vector<32x32xf32> to vector<32xf32>
    %500 = vector.shape_cast %499 : vector<32xf32> to vector<1x32xf32>
    %cst_218 = arith.constant 0.000000e+00 : f32
    %501 = vector.broadcast %cst_218 : f32 to vector<1x32xf32>
    %502 = arith.cmpf ole, %500, %501 : vector<1x32xf32>
    %cst_219 = arith.constant 1.000000e+00 : f32
    %503 = vector.broadcast %cst_219 : f32 to vector<1x32xf32>
    %504 = arith.select %502, %503, %500 : vector<1x32xi1>, vector<1x32xf32>
    %505 = tpu.reciprocal %504 {approx = true} : vector<1x32xf32> -> vector<1x32xf32>
    %506 = vector.broadcast %505 : vector<1x32xf32> to vector<32x32xf32>
    %507 = arith.mulf %498, %506 : vector<32x32xf32>
    %cst_220 = arith.constant dense<0.000000e+00> : vector<32x32xf32>
    %508 = tpu.matmul %507, %360, %cst_220 {dimension_numbers = #tpu.dot_dimension_numbers<[0], [0], [1], [1], [0, 1, 1, 1], [], []>} : vector<32x32xf32>, vector<32x32xf32>, vector<32x32xf32> -> vector<32x32xf32>
    %509 = vector.broadcast %413 : vector<1x1xf32> to vector<32x32xf32>
    %510 = arith.mulf %509, %508 : vector<32x32xf32>
    %511 = arith.addf %486, %510 : vector<32x32xf32>
    %c3_221 = arith.constant 3 : index
    %c0_222 = arith.constant 0 : index
    %c0_223 = arith.constant 0 : index
    %512 = vector.load %arg1[%c3_221, %c0_222, %c0_223] : memref<4x32x32xf32, #tpu.memory_space<vmem>>, vector<1x32x32xf32>
    %513 = vector.shape_cast %512 : vector<1x32x32xf32> to vector<32x32xf32>
    %cst_224 = arith.constant 0.000000e+00 : f32
    %514 = vector.broadcast %cst_224 : f32 to vector<32x32xf32>
    %515 = arith.cmpf ogt, %513, %514 : vector<32x32xf32>
    %cst_225 = arith.constant -1.000000e+30 : f32
    %516 = vector.broadcast %cst_225 : f32 to vector<32x32xf32>
    %517 = arith.select %515, %385, %516 : vector<32x32xi1>, vector<32x32xf32>
    %cst_226 = arith.constant dense<0xFF800000> : vector<32xf32>
    %518 = vector.multi_reduction <maximumf>, %517, %cst_226 [0] : vector<32x32xf32> to vector<32xf32>
    %519 = vector.shape_cast %518 : vector<32xf32> to vector<1x32xf32>
    %520 = vector.broadcast %519 : vector<1x32xf32> to vector<32x32xf32>
    %521 = arith.subf %517, %520 : vector<32x32xf32>
    %522 = math.exp %521 : vector<32x32xf32>
    %523 = arith.mulf %522, %513 : vector<32x32xf32>
    %cst_227 = arith.constant dense<0.000000e+00> : vector<32xf32>
    %524 = vector.multi_reduction <add>, %523, %cst_227 [0] : vector<32x32xf32> to vector<32xf32>
    %525 = vector.shape_cast %524 : vector<32xf32> to vector<1x32xf32>
    %cst_228 = arith.constant 0.000000e+00 : f32
    %526 = vector.broadcast %cst_228 : f32 to vector<1x32xf32>
    %527 = arith.cmpf ole, %525, %526 : vector<1x32xf32>
    %cst_229 = arith.constant 1.000000e+00 : f32
    %528 = vector.broadcast %cst_229 : f32 to vector<1x32xf32>
    %529 = arith.select %527, %528, %525 : vector<1x32xi1>, vector<1x32xf32>
    %530 = tpu.reciprocal %529 {approx = true} : vector<1x32xf32> -> vector<1x32xf32>
    %531 = vector.broadcast %530 : vector<1x32xf32> to vector<32x32xf32>
    %532 = arith.mulf %523, %531 : vector<32x32xf32>
    %cst_230 = arith.constant dense<0.000000e+00> : vector<32x32xf32>
    %533 = tpu.matmul %532, %360, %cst_230 {dimension_numbers = #tpu.dot_dimension_numbers<[0], [0], [1], [1], [0, 1, 1, 1], [], []>} : vector<32x32xf32>, vector<32x32xf32>, vector<32x32xf32> -> vector<32x32xf32>
    %534 = vector.broadcast %435 : vector<1x1xf32> to vector<32x32xf32>
    %535 = arith.mulf %534, %533 : vector<32x32xf32>
    %536 = arith.addf %511, %535 : vector<32x32xf32>
    %c2_231 = arith.constant 2 : index
    %c0_232 = arith.constant 0 : index
    %c0_233 = arith.constant 0 : index
    %537 = vector.load %arg11[%c2_231, %c0_232, %c0_233] : memref<4x32x32xf32, #tpu.memory_space<vmem>>, vector<1x32x32xf32>
    %538 = vector.shape_cast %537 : vector<1x32x32xf32> to vector<32x32xf32>
    %cst_234 = arith.constant dense<0.000000e+00> : vector<32x32xf32>
    %539 = tpu.matmul %536, %538, %cst_234 {dimension_numbers = #tpu.dot_dimension_numbers<[1], [1], [0], [0], [0, 0, 1, 0], [], []>} : vector<32x32xf32>, vector<32x32xf32>, vector<32x32xf32> -> vector<32x32xf32>
    %540 = arith.addf %367, %539 : vector<32x32xf32>
    %c3_235 = arith.constant 3 : index
    %c0_236 = arith.constant 0 : index
    %c0_237 = arith.constant 0 : index
    %541 = vector.load %arg6[%c3_235, %c0_236, %c0_237] : memref<4x16x32xf32, #tpu.memory_space<vmem>>, vector<1x16x32xf32>
    %542 = vector.shape_cast %541 : vector<1x16x32xf32> to vector<16x32xf32>
    %cst_238 = arith.constant dense<0.000000e+00> : vector<32x16xf32>
    %543 = tpu.matmul %360, %542, %cst_238 {dimension_numbers = #tpu.dot_dimension_numbers<[1], [1], [0], [0], [0, 0, 1, 0], [], []>} : vector<32x32xf32>, vector<16x32xf32>, vector<32x16xf32> -> vector<32x16xf32>
    %c3_239 = arith.constant 3 : index
    %c0_240 = arith.constant 0 : index
    %c0_241 = arith.constant 0 : index
    %544 = vector.load %arg7[%c3_239, %c0_240, %c0_241] : memref<4x1x16xf32, #tpu.memory_space<vmem>>, vector<1x1x16xf32>
    %545 = vector.shape_cast %544 : vector<1x1x16xf32> to vector<1x16xf32>
    %546 = vector.broadcast %545 : vector<1x16xf32> to vector<32x16xf32>
    %547 = arith.mulf %543, %546 : vector<32x16xf32>
    %cst_242 = arith.constant dense<0.000000e+00> : vector<32xf32>
    %548 = vector.multi_reduction <add>, %547, %cst_242 [1] : vector<32x16xf32> to vector<32xf32>
    %549 = vector.shape_cast %548 : vector<32xf32> to vector<32x1xf32>
    %c3_243 = arith.constant 3 : index
    %c0_244 = arith.constant 0 : index
    %c0_245 = arith.constant 0 : index
    %550 = vector.load %arg8[%c3_243, %c0_244, %c0_245] : memref<4x1x16xf32, #tpu.memory_space<vmem>>, vector<1x1x16xf32>
    %551 = vector.shape_cast %550 : vector<1x1x16xf32> to vector<1x16xf32>
    %cst_246 = arith.constant dense<0.000000e+00> : vector<1x32xf32>
    %552 = tpu.matmul %551, %543, %cst_246 {dimension_numbers = #tpu.dot_dimension_numbers<[1], [1], [0], [0], [0, 0, 1, 0], [], []>} : vector<1x16xf32>, vector<32x16xf32>, vector<1x32xf32> -> vector<1x32xf32>
    %553 = vector.broadcast %549 : vector<32x1xf32> to vector<32x32xf32>
    %554 = vector.broadcast %552 : vector<1x32xf32> to vector<32x32xf32>
    %555 = arith.addf %553, %554 : vector<32x32xf32>
    %cst_247 = arith.constant 0.00999999977 : f32
    %556 = vector.broadcast %cst_247 : f32 to vector<32x32xf32>
    %557 = arith.mulf %556, %555 : vector<32x32xf32>
    %558 = arith.maximumf %555, %557 : vector<32x32xf32>
    %c3_248 = arith.constant 3 : index
    %c0_249 = arith.constant 0 : index
    %c0_250 = arith.constant 0 : index
    %559 = vector.load %arg9[%c3_248, %c0_249, %c0_250] : memref<4x16x32xf32, #tpu.memory_space<vmem>>, vector<1x16x32xf32>
    %560 = vector.shape_cast %559 : vector<1x16x32xf32> to vector<16x32xf32>
    %cst_251 = arith.constant dense<0.000000e+00> : vector<2x16xf32>
    %561 = tpu.matmul %366, %560, %cst_251 {dimension_numbers = #tpu.dot_dimension_numbers<[1], [1], [0], [0], [0, 0, 1, 0], [], []>} : vector<2x32xf32>, vector<16x32xf32>, vector<2x16xf32> -> vector<2x16xf32>
    %c3_252 = arith.constant 3 : index
    %c0_253 = arith.constant 0 : index
    %c0_254 = arith.constant 0 : index
    %562 = vector.load %arg10[%c3_252, %c0_253, %c0_254] : memref<4x16x32xf32, #tpu.memory_space<vmem>>, vector<1x16x32xf32>
    %563 = vector.shape_cast %562 : vector<1x16x32xf32> to vector<16x32xf32>
    %cst_255 = arith.constant dense<0.000000e+00> : vector<2x16xf32>
    %564 = tpu.matmul %366, %563, %cst_255 {dimension_numbers = #tpu.dot_dimension_numbers<[1], [1], [0], [0], [0, 0, 1, 0], [], []>} : vector<2x32xf32>, vector<16x32xf32>, vector<2x16xf32> -> vector<2x16xf32>
    %565 = vector.extract_strided_slice %561 {offsets = [0, 0], sizes = [1, 16], strides = [1, 1]} : vector<2x16xf32> to vector<1x16xf32>
    %566 = vector.extract_strided_slice %564 {offsets = [0, 0], sizes = [1, 16], strides = [1, 1]} : vector<2x16xf32> to vector<1x16xf32>
    %567 = arith.mulf %565, %566 : vector<1x16xf32>
    %cst_256 = arith.constant dense<0.000000e+00> : vector<1xf32>
    %568 = vector.multi_reduction <add>, %567, %cst_256 [1] : vector<1x16xf32> to vector<1xf32>
    %569 = vector.shape_cast %568 : vector<1xf32> to vector<1x1xf32>
    %cst_257 = arith.constant 2.500000e-01 : f32
    %570 = vector.broadcast %cst_257 : f32 to vector<1x1xf32>
    %571 = arith.mulf %569, %570 : vector<1x1xf32>
    %572 = vector.extract_strided_slice %561 {offsets = [1, 0], sizes = [1, 16], strides = [1, 1]} : vector<2x16xf32> to vector<1x16xf32>
    %573 = vector.extract_strided_slice %564 {offsets = [0, 0], sizes = [1, 16], strides = [1, 1]} : vector<2x16xf32> to vector<1x16xf32>
    %574 = arith.mulf %572, %573 : vector<1x16xf32>
    %cst_258 = arith.constant dense<0.000000e+00> : vector<1xf32>
    %575 = vector.multi_reduction <add>, %574, %cst_258 [1] : vector<1x16xf32> to vector<1xf32>
    %576 = vector.shape_cast %575 : vector<1xf32> to vector<1x1xf32>
    %cst_259 = arith.constant 2.500000e-01 : f32
    %577 = vector.broadcast %cst_259 : f32 to vector<1x1xf32>
    %578 = arith.mulf %576, %577 : vector<1x1xf32>
    %579 = arith.maximumf %571, %578 : vector<1x1xf32>
    %580 = arith.subf %571, %579 : vector<1x1xf32>
    %581 = math.exp %580 : vector<1x1xf32>
    %582 = arith.subf %578, %579 : vector<1x1xf32>
    %583 = math.exp %582 : vector<1x1xf32>
    %584 = arith.addf %581, %583 : vector<1x1xf32>
    %585 = arith.divf %581, %584 : vector<1x1xf32>
    %586 = arith.divf %583, %584 : vector<1x1xf32>
    %587 = vector.extract_strided_slice %561 {offsets = [0, 0], sizes = [1, 16], strides = [1, 1]} : vector<2x16xf32> to vector<1x16xf32>
    %588 = vector.extract_strided_slice %564 {offsets = [1, 0], sizes = [1, 16], strides = [1, 1]} : vector<2x16xf32> to vector<1x16xf32>
    %589 = arith.mulf %587, %588 : vector<1x16xf32>
    %cst_260 = arith.constant dense<0.000000e+00> : vector<1xf32>
    %590 = vector.multi_reduction <add>, %589, %cst_260 [1] : vector<1x16xf32> to vector<1xf32>
    %591 = vector.shape_cast %590 : vector<1xf32> to vector<1x1xf32>
    %cst_261 = arith.constant 2.500000e-01 : f32
    %592 = vector.broadcast %cst_261 : f32 to vector<1x1xf32>
    %593 = arith.mulf %591, %592 : vector<1x1xf32>
    %594 = vector.extract_strided_slice %561 {offsets = [1, 0], sizes = [1, 16], strides = [1, 1]} : vector<2x16xf32> to vector<1x16xf32>
    %595 = vector.extract_strided_slice %564 {offsets = [1, 0], sizes = [1, 16], strides = [1, 1]} : vector<2x16xf32> to vector<1x16xf32>
    %596 = arith.mulf %594, %595 : vector<1x16xf32>
    %cst_262 = arith.constant dense<0.000000e+00> : vector<1xf32>
    %597 = vector.multi_reduction <add>, %596, %cst_262 [1] : vector<1x16xf32> to vector<1xf32>
    %598 = vector.shape_cast %597 : vector<1xf32> to vector<1x1xf32>
    %cst_263 = arith.constant 2.500000e-01 : f32
    %599 = vector.broadcast %cst_263 : f32 to vector<1x1xf32>
    %600 = arith.mulf %598, %599 : vector<1x1xf32>
    %601 = arith.maximumf %593, %600 : vector<1x1xf32>
    %602 = arith.subf %593, %601 : vector<1x1xf32>
    %603 = math.exp %602 : vector<1x1xf32>
    %604 = arith.subf %600, %601 : vector<1x1xf32>
    %605 = math.exp %604 : vector<1x1xf32>
    %606 = arith.addf %603, %605 : vector<1x1xf32>
    %607 = arith.divf %603, %606 : vector<1x1xf32>
    %608 = arith.divf %605, %606 : vector<1x1xf32>
    %cst_264 = arith.constant 0.000000e+00 : f32
    %609 = vector.broadcast %cst_264 : f32 to vector<32x32xf32>
    %c0_265 = arith.constant 0 : index
    %c0_266 = arith.constant 0 : index
    %c0_267 = arith.constant 0 : index
    %610 = vector.load %arg1[%c0_265, %c0_266, %c0_267] : memref<4x32x32xf32, #tpu.memory_space<vmem>>, vector<1x32x32xf32>
    %611 = vector.shape_cast %610 : vector<1x32x32xf32> to vector<32x32xf32>
    %cst_268 = arith.constant 0.000000e+00 : f32
    %612 = vector.broadcast %cst_268 : f32 to vector<32x32xf32>
    %613 = arith.cmpf ogt, %611, %612 : vector<32x32xf32>
    %cst_269 = arith.constant -1.000000e+30 : f32
    %614 = vector.broadcast %cst_269 : f32 to vector<32x32xf32>
    %615 = arith.select %613, %558, %614 : vector<32x32xi1>, vector<32x32xf32>
    %cst_270 = arith.constant dense<0xFF800000> : vector<32xf32>
    %616 = vector.multi_reduction <maximumf>, %615, %cst_270 [0] : vector<32x32xf32> to vector<32xf32>
    %617 = vector.shape_cast %616 : vector<32xf32> to vector<1x32xf32>
    %618 = vector.broadcast %617 : vector<1x32xf32> to vector<32x32xf32>
    %619 = arith.subf %615, %618 : vector<32x32xf32>
    %620 = math.exp %619 : vector<32x32xf32>
    %621 = arith.mulf %620, %611 : vector<32x32xf32>
    %cst_271 = arith.constant dense<0.000000e+00> : vector<32xf32>
    %622 = vector.multi_reduction <add>, %621, %cst_271 [0] : vector<32x32xf32> to vector<32xf32>
    %623 = vector.shape_cast %622 : vector<32xf32> to vector<1x32xf32>
    %cst_272 = arith.constant 0.000000e+00 : f32
    %624 = vector.broadcast %cst_272 : f32 to vector<1x32xf32>
    %625 = arith.cmpf ole, %623, %624 : vector<1x32xf32>
    %cst_273 = arith.constant 1.000000e+00 : f32
    %626 = vector.broadcast %cst_273 : f32 to vector<1x32xf32>
    %627 = arith.select %625, %626, %623 : vector<1x32xi1>, vector<1x32xf32>
    %628 = tpu.reciprocal %627 {approx = true} : vector<1x32xf32> -> vector<1x32xf32>
    %629 = vector.broadcast %628 : vector<1x32xf32> to vector<32x32xf32>
    %630 = arith.mulf %621, %629 : vector<32x32xf32>
    %cst_274 = arith.constant dense<0.000000e+00> : vector<32x32xf32>
    %631 = tpu.matmul %630, %360, %cst_274 {dimension_numbers = #tpu.dot_dimension_numbers<[0], [0], [1], [1], [0, 1, 1, 1], [], []>} : vector<32x32xf32>, vector<32x32xf32>, vector<32x32xf32> -> vector<32x32xf32>
    %632 = vector.broadcast %585 : vector<1x1xf32> to vector<32x32xf32>
    %633 = arith.mulf %632, %631 : vector<32x32xf32>
    %634 = arith.addf %609, %633 : vector<32x32xf32>
    %c1_275 = arith.constant 1 : index
    %c0_276 = arith.constant 0 : index
    %c0_277 = arith.constant 0 : index
    %635 = vector.load %arg1[%c1_275, %c0_276, %c0_277] : memref<4x32x32xf32, #tpu.memory_space<vmem>>, vector<1x32x32xf32>
    %636 = vector.shape_cast %635 : vector<1x32x32xf32> to vector<32x32xf32>
    %cst_278 = arith.constant 0.000000e+00 : f32
    %637 = vector.broadcast %cst_278 : f32 to vector<32x32xf32>
    %638 = arith.cmpf ogt, %636, %637 : vector<32x32xf32>
    %cst_279 = arith.constant -1.000000e+30 : f32
    %639 = vector.broadcast %cst_279 : f32 to vector<32x32xf32>
    %640 = arith.select %638, %558, %639 : vector<32x32xi1>, vector<32x32xf32>
    %cst_280 = arith.constant dense<0xFF800000> : vector<32xf32>
    %641 = vector.multi_reduction <maximumf>, %640, %cst_280 [0] : vector<32x32xf32> to vector<32xf32>
    %642 = vector.shape_cast %641 : vector<32xf32> to vector<1x32xf32>
    %643 = vector.broadcast %642 : vector<1x32xf32> to vector<32x32xf32>
    %644 = arith.subf %640, %643 : vector<32x32xf32>
    %645 = math.exp %644 : vector<32x32xf32>
    %646 = arith.mulf %645, %636 : vector<32x32xf32>
    %cst_281 = arith.constant dense<0.000000e+00> : vector<32xf32>
    %647 = vector.multi_reduction <add>, %646, %cst_281 [0] : vector<32x32xf32> to vector<32xf32>
    %648 = vector.shape_cast %647 : vector<32xf32> to vector<1x32xf32>
    %cst_282 = arith.constant 0.000000e+00 : f32
    %649 = vector.broadcast %cst_282 : f32 to vector<1x32xf32>
    %650 = arith.cmpf ole, %648, %649 : vector<1x32xf32>
    %cst_283 = arith.constant 1.000000e+00 : f32
    %651 = vector.broadcast %cst_283 : f32 to vector<1x32xf32>
    %652 = arith.select %650, %651, %648 : vector<1x32xi1>, vector<1x32xf32>
    %653 = tpu.reciprocal %652 {approx = true} : vector<1x32xf32> -> vector<1x32xf32>
    %654 = vector.broadcast %653 : vector<1x32xf32> to vector<32x32xf32>
    %655 = arith.mulf %646, %654 : vector<32x32xf32>
    %cst_284 = arith.constant dense<0.000000e+00> : vector<32x32xf32>
    %656 = tpu.matmul %655, %360, %cst_284 {dimension_numbers = #tpu.dot_dimension_numbers<[0], [0], [1], [1], [0, 1, 1, 1], [], []>} : vector<32x32xf32>, vector<32x32xf32>, vector<32x32xf32> -> vector<32x32xf32>
    %657 = vector.broadcast %607 : vector<1x1xf32> to vector<32x32xf32>
    %658 = arith.mulf %657, %656 : vector<32x32xf32>
    %659 = arith.addf %634, %658 : vector<32x32xf32>
    %c2_285 = arith.constant 2 : index
    %c0_286 = arith.constant 0 : index
    %c0_287 = arith.constant 0 : index
    %660 = vector.load %arg1[%c2_285, %c0_286, %c0_287] : memref<4x32x32xf32, #tpu.memory_space<vmem>>, vector<1x32x32xf32>
    %661 = vector.shape_cast %660 : vector<1x32x32xf32> to vector<32x32xf32>
    %cst_288 = arith.constant 0.000000e+00 : f32
    %662 = vector.broadcast %cst_288 : f32 to vector<32x32xf32>
    %663 = arith.cmpf ogt, %661, %662 : vector<32x32xf32>
    %cst_289 = arith.constant -1.000000e+30 : f32
    %664 = vector.broadcast %cst_289 : f32 to vector<32x32xf32>
    %665 = arith.select %663, %558, %664 : vector<32x32xi1>, vector<32x32xf32>
    %cst_290 = arith.constant dense<0xFF800000> : vector<32xf32>
    %666 = vector.multi_reduction <maximumf>, %665, %cst_290 [0] : vector<32x32xf32> to vector<32xf32>
    %667 = vector.shape_cast %666 : vector<32xf32> to vector<1x32xf32>
    %668 = vector.broadcast %667 : vector<1x32xf32> to vector<32x32xf32>
    %669 = arith.subf %665, %668 : vector<32x32xf32>
    %670 = math.exp %669 : vector<32x32xf32>
    %671 = arith.mulf %670, %661 : vector<32x32xf32>
    %cst_291 = arith.constant dense<0.000000e+00> : vector<32xf32>
    %672 = vector.multi_reduction <add>, %671, %cst_291 [0] : vector<32x32xf32> to vector<32xf32>
    %673 = vector.shape_cast %672 : vector<32xf32> to vector<1x32xf32>
    %cst_292 = arith.constant 0.000000e+00 : f32
    %674 = vector.broadcast %cst_292 : f32 to vector<1x32xf32>
    %675 = arith.cmpf ole, %673, %674 : vector<1x32xf32>
    %cst_293 = arith.constant 1.000000e+00 : f32
    %676 = vector.broadcast %cst_293 : f32 to vector<1x32xf32>
    %677 = arith.select %675, %676, %673 : vector<1x32xi1>, vector<1x32xf32>
    %678 = tpu.reciprocal %677 {approx = true} : vector<1x32xf32> -> vector<1x32xf32>
    %679 = vector.broadcast %678 : vector<1x32xf32> to vector<32x32xf32>
    %680 = arith.mulf %671, %679 : vector<32x32xf32>
    %cst_294 = arith.constant dense<0.000000e+00> : vector<32x32xf32>
    %681 = tpu.matmul %680, %360, %cst_294 {dimension_numbers = #tpu.dot_dimension_numbers<[0], [0], [1], [1], [0, 1, 1, 1], [], []>} : vector<32x32xf32>, vector<32x32xf32>, vector<32x32xf32> -> vector<32x32xf32>
    %682 = vector.broadcast %586 : vector<1x1xf32> to vector<32x32xf32>
    %683 = arith.mulf %682, %681 : vector<32x32xf32>
    %684 = arith.addf %659, %683 : vector<32x32xf32>
    %c3_295 = arith.constant 3 : index
    %c0_296 = arith.constant 0 : index
    %c0_297 = arith.constant 0 : index
    %685 = vector.load %arg1[%c3_295, %c0_296, %c0_297] : memref<4x32x32xf32, #tpu.memory_space<vmem>>, vector<1x32x32xf32>
    %686 = vector.shape_cast %685 : vector<1x32x32xf32> to vector<32x32xf32>
    %cst_298 = arith.constant 0.000000e+00 : f32
    %687 = vector.broadcast %cst_298 : f32 to vector<32x32xf32>
    %688 = arith.cmpf ogt, %686, %687 : vector<32x32xf32>
    %cst_299 = arith.constant -1.000000e+30 : f32
    %689 = vector.broadcast %cst_299 : f32 to vector<32x32xf32>
    %690 = arith.select %688, %558, %689 : vector<32x32xi1>, vector<32x32xf32>
    %cst_300 = arith.constant dense<0xFF800000> : vector<32xf32>
    %691 = vector.multi_reduction <maximumf>, %690, %cst_300 [0] : vector<32x32xf32> to vector<32xf32>
    %692 = vector.shape_cast %691 : vector<32xf32> to vector<1x32xf32>
    %693 = vector.broadcast %692 : vector<1x32xf32> to vector<32x32xf32>
    %694 = arith.subf %690, %693 : vector<32x32xf32>
    %695 = math.exp %694 : vector<32x32xf32>
    %696 = arith.mulf %695, %686 : vector<32x32xf32>
    %cst_301 = arith.constant dense<0.000000e+00> : vector<32xf32>
    %697 = vector.multi_reduction <add>, %696, %cst_301 [0] : vector<32x32xf32> to vector<32xf32>
    %698 = vector.shape_cast %697 : vector<32xf32> to vector<1x32xf32>
    %cst_302 = arith.constant 0.000000e+00 : f32
    %699 = vector.broadcast %cst_302 : f32 to vector<1x32xf32>
    %700 = arith.cmpf ole, %698, %699 : vector<1x32xf32>
    %cst_303 = arith.constant 1.000000e+00 : f32
    %701 = vector.broadcast %cst_303 : f32 to vector<1x32xf32>
    %702 = arith.select %700, %701, %698 : vector<1x32xi1>, vector<1x32xf32>
    %703 = tpu.reciprocal %702 {approx = true} : vector<1x32xf32> -> vector<1x32xf32>
    %704 = vector.broadcast %703 : vector<1x32xf32> to vector<32x32xf32>
    %705 = arith.mulf %696, %704 : vector<32x32xf32>
    %cst_304 = arith.constant dense<0.000000e+00> : vector<32x32xf32>
    %706 = tpu.matmul %705, %360, %cst_304 {dimension_numbers = #tpu.dot_dimension_numbers<[0], [0], [1], [1], [0, 1, 1, 1], [], []>} : vector<32x32xf32>, vector<32x32xf32>, vector<32x32xf32> -> vector<32x32xf32>
    %707 = vector.broadcast %608 : vector<1x1xf32> to vector<32x32xf32>
    %708 = arith.mulf %707, %706 : vector<32x32xf32>
    %709 = arith.addf %684, %708 : vector<32x32xf32>
    %c3_305 = arith.constant 3 : index
    %c0_306 = arith.constant 0 : index
    %c0_307 = arith.constant 0 : index
    %710 = vector.load %arg11[%c3_305, %c0_306, %c0_307] : memref<4x32x32xf32, #tpu.memory_space<vmem>>, vector<1x32x32xf32>
    %711 = vector.shape_cast %710 : vector<1x32x32xf32> to vector<32x32xf32>
    %cst_308 = arith.constant dense<0.000000e+00> : vector<32x32xf32>
    %712 = tpu.matmul %709, %711, %cst_308 {dimension_numbers = #tpu.dot_dimension_numbers<[1], [1], [0], [0], [0, 0, 1, 0], [], []>} : vector<32x32xf32>, vector<32x32xf32>, vector<32x32xf32> -> vector<32x32xf32>
    %713 = arith.addf %540, %712 : vector<32x32xf32>
    %c1_309 = arith.constant 1 : index
    %c0_310 = arith.constant 0 : index
    %c0_311 = arith.constant 0 : index
    %714 = vector.load %arg12[%c1_309, %c0_310, %c0_311] : memref<2x1x32xf32, #tpu.memory_space<vmem>>, vector<1x1x32xf32>
    %715 = vector.shape_cast %714 : vector<1x1x32xf32> to vector<1x32xf32>
    %716 = vector.broadcast %715 : vector<1x32xf32> to vector<32x32xf32>
    %717 = arith.addf %713, %716 : vector<32x32xf32>
    %718 = vector.broadcast %2 : vector<32x1xf32> to vector<32x32xf32>
    %719 = arith.mulf %717, %718 : vector<32x32xf32>
    %720 = vector.broadcast %3 : vector<32x1xf32> to vector<32x32xf32>
    %721 = arith.mulf %0, %720 : vector<32x32xf32>
    %722 = arith.addf %719, %721 : vector<32x32xf32>
    %c1_312 = arith.constant 1 : index
    %c0_313 = arith.constant 0 : index
    %c0_314 = arith.constant 0 : index
    %723 = vector.load %arg5[%c1_312, %c0_313, %c0_314] : memref<2x32x1xf32, #tpu.memory_space<vmem>>, vector<1x32x1xf32>
    %724 = vector.shape_cast %723 : vector<1x32x1xf32> to vector<32x1xf32>
    %725 = vector.broadcast %724 : vector<32x1xf32> to vector<32x32xf32>
    %726 = arith.mulf %722, %725 : vector<32x32xf32>
    %727 = arith.addf %365, %726 : vector<32x32xf32>
    %728 = arith.mulf %727, %727 : vector<32x32xf32>
    %cst_315 = arith.constant dense<0.000000e+00> : vector<32xf32>
    %729 = vector.multi_reduction <add>, %728, %cst_315 [1] : vector<32x32xf32> to vector<32xf32>
    %730 = vector.shape_cast %729 : vector<32xf32> to vector<32x1xf32>
    %731 = math.sqrt %730 : vector<32x1xf32>
    %cst_316 = arith.constant 4.000000e+00 : f32
    %732 = vector.broadcast %cst_316 : f32 to vector<32x1xf32>
    %733 = arith.cmpf ogt, %731, %732 : vector<32x1xf32>
    %cst_317 = arith.constant 1.000000e-07 : f32
    %734 = vector.broadcast %cst_317 : f32 to vector<32x1xf32>
    %735 = arith.addf %731, %734 : vector<32x1xf32>
    %cst_318 = arith.constant 4.000000e+00 : f32
    %736 = vector.broadcast %cst_318 : f32 to vector<32x1xf32>
    %737 = arith.divf %736, %735 : vector<32x1xf32>
    %cst_319 = arith.constant 1.000000e+00 : f32
    %738 = vector.broadcast %cst_319 : f32 to vector<32x1xf32>
    %739 = arith.select %733, %737, %738 : vector<32x1xi1>, vector<32x1xf32>
    %740 = vector.broadcast %739 : vector<32x1xf32> to vector<32x32xf32>
    %741 = arith.mulf %727, %740 : vector<32x32xf32>
    %c0_320 = arith.constant 0 : index
    %c0_321 = arith.constant 0 : index
    %742 = vector.load %arg13[%c0_320, %c0_321] : memref<32x32xf32, #tpu.memory_space<vmem>>, vector<32x32xf32>
    tpu.vector_store %arg13[%c0_320, %c0_321], %741 {strides = array<i32>} : memref<32x32xf32, #tpu.memory_space<vmem>>, vector<32x32xf32>,
    return
  }
}

</mosaic_0001>

<bundles_post_ra>
// kernel: forward.1
= control target key start
LH: loop header
LB: loop body
LE: loop exit
PB: predicated region body
PF: predicated region fallthrough
CT: control target
= control target key end

     0   :  { %vm57_vm0 = vcmask 261120   ;;  %v9401_v9 = vmov 0.0|0.0   ;;  %vm9395_vm2 = vmmov 0   ;;  %v9399_v11 = vmov 0.0   ;;  %s9380_s6 = inlined_call_operand.vmem [shape: f32[4,16,32], index: 6, kind: input, shape index: {}]   ;;  %s9381_s0 = inlined_call_operand.vmem [shape: f32[32,32], index: 0, kind: input, shape index: {}]   ;;  %s9382_s7 = inlined_call_operand.vmem [shape: f32[4,1,16], index: 7, kind: input, shape index: {}]   ;;  %s9383_s8 = inlined_call_operand.vmem [shape: f32[4,1,16], index: 8, kind: input, shape index: {}]   ;;  %s9384_s2 = inlined_call_operand.vmem [shape: f32[2,32], index: 2, kind: input, shape index: {}]   ;;  %s9385_s1 = inlined_call_operand.vmem [shape: f32[4,32,32], index: 1, kind: input, shape index: {}]   ;;  %s9386_s9 = inlined_call_operand.vmem [shape: f32[4,16,32], index: 9, kind: input, shape index: {}]   ;;  %s9387_s10 = inlined_call_operand.vmem [shape: f32[4,16,32], index: 10, kind: input, shape index: {}]   ;;  %s9388_s11 = inlined_call_operand.vmem [shape: f32[4,32,32], index: 11, kind: input, shape index: {}]   ;;  %s9389_s3 = inlined_call_operand.vmem [shape: f32[32,1], index: 3, kind: input, shape index: {}]   ;;  %s9390_s4 = inlined_call_operand.vmem [shape: f32[32,1], index: 4, kind: input, shape index: {}]   ;;  %s9391_s12 = inlined_call_operand.vmem [shape: f32[2,1,32], index: 12, kind: input, shape index: {}]   ;;  %s9392_s5 = inlined_call_operand.vmem [shape: f32[2,32,1], index: 5, kind: input, shape index: {}]   ;;  %s9393_s13 = inlined_call_operand.vmem [shape: f32[32,32], index: 13, kind: output, shape index: {}]  }
   0x1   :  { %v131_v0 = vld [vmem:[%s9380_s6] sm:$0xff]  ;;  %v132_v1 = vld [vmem:[%s9380_s6 + $0x8] sm:$0xff]  ;;  %vm7449_vm1 = vmpackc.low %vm57_vm0, %vm57_vm0  ;;  %6764 = vmatprep.subr.bf16.mxu0 %v9401_v9  ;;  %6330 = vmatprep.mubr.msk.f32.mxu0 %vm9395_vm2, %v9399_v11  ;;  %vm9394_vm3 = vcmask 130048   ;;  %v9481_v15 = vmov 0  ;;  %v346_v30 = vlaneseq }
   0x2   :  { %v6770_v3 = vpack.c.bf16 %v132_v1, %v131_v0  ;;  %v7456_v4 = vld [vmem:[%s9381_s0] sm:$0xff]  ;;  %v7467_v5 = vld [vmem:[%s9381_s0 + $0x8] sm:$0xff]  ;;  %v7472_v6 = vld [vmem:[%s9381_s0 + $0x10] sm:$0xff] }
   0x3   :  { %6337 = vmatprep.mubr.msk.f32.mxu1 %vm57_vm0, %v7456_v4  ;;  %9478 = vst [vmem:[#allocation2_spill] sm:$0xff] %v7467_v5  ;;  %9479 = vst [vmem:[#allocation3_spill] sm:$0xff] %v7472_v6  ;;  %v7481_v7 = vld [vmem:[%s9381_s0 + $0x18] sm:$0xff]  ;;  %v7487_v8 = vpack.c.bf16 %v7467_v5, %v7456_v4  ;;  %v5866_v12 = vld [vmem:[%s9382_s7] ss:$0 sm:$0xff]  ;;  %v347_v31 = vshrl.u32 %v346_v30, 7 }
   0x4   :  { %6772 = vmatprep.subr.msk.bf16.mxu1 %vm7449_vm1, %v6770_v3  ;;  %9480 = vst [vmem:[#allocation4_spill] sm:$0xff] %v7481_v7  ;;  %v7493_v10 = vpack.c.bf16 %v7481_v7, %v7472_v6  ;;  %vm7508_vm4 = vmpackc.low %vm9394_vm3, %vm9394_vm3  ;;  %v260_v28 = vld [vmem:[%s9383_s8] sm:$0x1]  ;;  %v7541_v35 = vld [vmem:[%s9385_s1 + $0x18] sm:$0xff] }
   0x5   :  { %6775 = vmatpush3.bf16.xpose.msk.msra.mxu1 %vm7449_vm1, %v6770_v3  ;;  %6766 = vmatpush3.bf16.msra.mxu0 %v7487_v8  ;;  %v9482_v15 = vsel %vm7508_vm4, 4294967295, %v9481_v15  ;;  %v48_v29 = vld [vmem:[%s9384_s2] sm:$0x3]  ;;  %v7536_v34 = vsub.s32 0, %v347_v31  ;;  %9485 = vst [vmem:[#allocation7_spill] sm:$0xff] %v7541_v35  ;;  %v7546_v36 = vld [vmem:[%s9385_s1 + $0x38] sm:$0xff] }
   0x6   :  { %6776 = vmatprep.subr.bf16.mxu1 %v9401_v9  ;;  %6767 = vmatprep.subr.bf16.mxu0 %v9401_v9  ;;  %9483 = vst [vmem:[#allocation5_spill] sm:$0xff] %v9482_v15  ;;  %9486 = vst [vmem:[#allocation8_spill] sm:$0xff] %v7546_v36  ;;  %v7551_v37 = vld [vmem:[%s9385_s1 + $0x58] sm:$0xff]  ;;  %v7561_v39 = vld [vmem:[%s9385_s1 + $0x40] sm:$0xff]  ;;  %vm602_vm5 = vcmp.gt.f32.partialorder %v7541_v35, 0.0  ;;  %vm805_vm6 = vcmp.gt.f32.partialorder %v7546_v36, 0.0 }
   0x7   :  { %9484 = vst [vmem:[#allocation6_spill] sm:$0xff] %v7536_v34  ;;  %9487 = vst [vmem:[#allocation9_spill] sm:$0xff] %v7551_v37  ;;  %v7556_v38 = vld [vmem:[%s9385_s1 + $0x78] sm:$0xff]  ;;  %v7566_v40 = vld [vmem:[%s9385_s1 + $0x48] sm:$0xff]  ;;  %vm9398_vm7 = vcmp.gt.f32.partialorder %v7551_v37, 0.0  ;;  %vm9397_vm9 = vcmp.gt.f32.partialorder %v7561_v39, 0.0 }
   0x8   :  { %9488 = vst [vmem:[#allocation10_spill] sm:$0xff] %v7556_v38  ;;  %9489 = vst [vmem:[#allocation11_spill] sm:$0xff] %v7561_v39  ;;  %v7574_v44 = vld [vmem:[%s9385_s1 + $0x50] sm:$0xff]  ;;  %v7579_v45 = vld [vmem:[%s9385_s1] sm:$0xff]  ;;  %vm1006_vm10 = vcmp.gt.f32.partialorder %v7566_v40, 0.0 }
   0x9   :  { %6769 = vmatpush3.bf16.msra.mxu0 %v7493_v10  ;;  %9490 = vst [vmem:[#allocation12_spill] sm:$0xff] %v7566_v40  ;;  %9491 = vst [vmem:[#allocation13_spill] sm:$0xff] %v7574_v44  ;;  %v7584_v46 = vld [vmem:[%s9385_s1 + $0x8] sm:$0xff]  ;;  %v7593_v49 = vld [vmem:[%s9385_s1 + $0x10] sm:$0xff]  ;;  %vm1007_vm11 = vcmp.gt.f32.partialorder %v7574_v44, 0.0 }
   0xa   :  { %6793 = vmatprep.subr.bf16.mxu0 %v7487_v8  ;;  %9492 = vst [vmem:[#allocation14_spill] sm:$0xff] %v7579_v45  ;;  %9493 = vst [vmem:[#allocation15_spill] sm:$0xff] %v7584_v46  ;;  %v7598_v54 = vld [vmem:[%s9385_s1 + $0x60] sm:$0xff]  ;;  %v7603_v55 = vld [vmem:[%s9385_s1 + $0x68] sm:$0xff]  ;;  %vm601_vm14 = vcmp.gt.f32.partialorder %v7593_v49, 0.0 }
   0xb   :  { %9494 = vst [vmem:[#allocation16_spill] sm:$0xff] %v7593_v49  ;;  %9495 = vst [vmem:[#allocation17_spill] sm:$0xff] %v7598_v54  ;;  %v7608_v56 = vld [vmem:[%s9385_s1 + $0x70] sm:$0xff]  ;;  %v7616_v57 = vld [vmem:[%s9385_s1 + $0x20] sm:$0xff]  ;;  %vm9410_vm15 = vcmp.gt.f32.partialorder %v7598_v54, 0.0 }
   0xc   :  { %6338 = vmatmul.mubr.msk.f32.vlgmr.msra.gmra.mrb[0].mxu1 %vm57_vm0, %v7467_v5  ;;  %6331 = vmatmul.mubr.msk.f32.vlgmr.msra.gmra.mrb[0].mxu0 %vm57_vm0, %v48_v29  ;;  %9496 = vst [vmem:[#allocation18_spill] sm:$0xff] %v7603_v55  ;;  %9497 = vst [vmem:[#allocation19_spill] sm:$0xff] %v7608_v56  ;;  %v7621_v58 = vld [vmem:[%s9385_s1 + $0x28] sm:$0xff]  ;;  %v7626_v59 = vld [vmem:[%s9385_s1 + $0x30] sm:$0xff]  ;;  %vm802_vm13 = vcmp.gt.f32.partialorder %v7616_v57, 0.0 }
   0xd   :  { %6340 = vmatprep.mubr.msk.f32.mxu1 %vm57_vm0, %v7472_v6  ;;  %6795 = vmatpush3.bf16.msra.mxu0 %v7487_v8  ;;  %9498 = vst [vmem:[#allocation20_spill] sm:$0xff] %v7616_v57  ;;  %9499 = vst [vmem:[#allocation21_spill] sm:$0xff] %v7621_v58  ;;  %vm803_vm12 = vcmp.gt.f32.partialorder %v7621_v58, 0.0  ;;  %vm804_vm8 = vcmp.gt.f32.partialorder %v7626_v59, 0.0  ;;  %v6079_v2 = vld [vmem:[%s9391_s12 + $0x1] ss:$0 sm:$0xff] }
   0xe   :  { %6797 = vmatprep.subr.bf16.mxu0 %v7493_v10  ;;  %9500 = vst [vmem:[#allocation22_spill] sm:$0xff] %v7626_v59 }
  0x10   :  { %6341 = vmatmul.mubr.msk.f32.gmra.mrb[2].mxu1 %vm57_vm0, %v7481_v7 }
  0x11   :  { %6351 = vmatprep.mubr.msk.f32.mxu1 %vm9395_vm2, %v9399_v11  ;;  %6799 = vmatpush3.bf16.msra.mxu0 %v7493_v10 }
  0x12   :  { %6809 = vmatprep.subr.bf16.mxu0 %v7487_v8 }
  0xdf   :  { %v6339_v13 = vpop.f32.mrb[0].mxu1 }
  0xe0   :  { %v217_v14 = vpop.f32.mrb[1].mxu1  ;;  %v244_v18 = vmul.f32 %v6339_v13, %v5866_v12 }
  0xe1   :  { %v6777_v16 = vpack.c.bf16 %v6339_v13, %v217_v14  ;;  %v243_v17 = vmul.f32 %v5866_v12, %v217_v14 }
  0xe2   :  { %v251_v25 = vsel %vm9394_vm3, %v244_v18, 0.0 }
  0xe3   :  { %v6342_v19 = vpop.f32.mrb[2].mxu1  ;;  %6779 = vmatpush3.bf16.xpose.msk.msra.mxu1 %vm7508_vm4, %v6777_v16  ;;  %v248_v20 = vsel %vm9394_vm3, %v243_v17, 0.0 }
  0xe4   :  { %249 = vadd.xlane.f32.xlu0 %v248_v20  ;;  %v227_v21 = vpop.f32.mrb[3].mxu1  ;;  %6780 = vmatprep.subr.bf16.mxu1 %v9401_v9  ;;  %v246_v22 = vmul.f32 %v6342_v19, %v5866_v12 }
  0xe5   :  { %v6781_v23 = vpack.c.bf16 %v6342_v19, %v227_v21  ;;  %v245_v24 = vmul.f32 %v5866_v12, %v227_v21 }
  0xe6   :  { %v257_v27 = vsel %vm9394_vm3, %v246_v22, 0.0 }
  0xe7   :  { %v254_v26 = vsel %vm9394_vm3, %v245_v24, 0.0 }
  0xe8   :  { %252 = vadd.xlane.f32.xlu0 %v251_v25  ;;  %255 = vadd.xlane.f32.xlu1 %v254_v26 }
  0xeb   :  { %6783 = vmatpush3.bf16.xpose.msk.msra.mxu1 %vm7508_vm4, %v6781_v23 }
  0xec   :  { %258 = vadd.xlane.f32.xlu1 %v257_v27  ;;  %6784 = vmatprep.subr.bf16.mxu1 %v9401_v9 }
  0xf2   :  { %6352 = vmatmul.mubr.msk.f32.vlgmr.msra.gmra.mrb[4].mxu1 %vm9394_vm3, %v260_v28  ;;  %vm9412_vm3 = vcmp.gt.f32.partialorder %v7603_v55, 0.0 }
  0xf3   :  { %6358 = vmatprep.mubr.msk.f32.mxu1 %vm9395_vm2, %v9399_v11  ;;  %vm9411_vm2 = vcmp.gt.f32.partialorder %v7608_v56, 0.0 }
 0x171   :  { %v250_v32 = vpop.xlane.xlu0 %249 }
 0x175   :  { %v256_v33 = vpop.xlane.xlu1 %255  ;;  %v253_v47 = vpop.xlane.xlu0 %252 }
 0x179   :  { %v259_v48 = vpop.xlane.xlu1 %258 }
 0x1c5   :  { %v342_v41 = vpop.f32.mrb[4].mxu1 }
 0x1c6   :  { %v349_v42 = vrot.slane %v342_v41, %v7536_v34  ;;  %v6353_v43 = vpop.f32.mrb[5].mxu1 }
 0x1c8   :  { %v350_v50 = vadd.f32 %v349_v42, %v250_v32  ;;  %v351_v51 = vadd.f32 %v349_v42, %v253_v47  ;;  %v352_v52 = vadd.f32 %v349_v42, %v256_v33  ;;  %v353_v53 = vadd.f32 %v349_v42, %v259_v48 }
 0x1ca   :  { %v354_v60 = vmul.f32 0.01, %v350_v50  ;;  %v355_v61 = vmul.f32 0.01, %v351_v51  ;;  %v356_v62 = vmul.f32 0.01, %v352_v52 }
 0x1cb   :  { %v357_v63 = vmul.f32 0.01, %v353_v53 }
 0x1cc   :  { %v358_v0 = vmax.f32 %v350_v50, %v354_v60  ;;  %v359_v1 = vmax.f32 %v351_v51, %v355_v61  ;;  %v360_v3 = vmax.f32 %v352_v52, %v356_v62 }
 0x1cd   :  { %v361_v12 = vmax.f32 %v353_v53, %v357_v63 }
 0x1ce   :  { %v7637_v13 = vsel %vm9397_vm9, %v358_v0, -1e+30  ;;  %v7641_v14 = vsel %vm1006_vm10, %v359_v1, -1e+30  ;;  %v7645_v16 = vsel %vm1007_vm11, %v360_v3, -1e+30 }
 0x1cf   :  { %v7649_v17 = vsel %vm602_vm5, %v361_v12, -1e+30  ;;  %v7653_v18 = vsel %vm805_vm6, %v361_v12, -1e+30  ;;  %v7657_v19 = vsel %vm9398_vm7, %v361_v12, -1e+30 }
 0x1d0   :  { %v610_v20 = vsel %vm57_vm0, %v7649_v17, -inf  ;;  %v813_v21 = vsel %vm57_vm0, %v7653_v18, -inf  ;;  %v1016_v22 = vsel %vm57_vm0, %v7657_v19, -inf  ;;  %vm9501_vm9 = vcmp.gt.f32.partialorder %v7556_v38, 0.0 }
 0x1d1   :  { %v7667_v23 = vsel %vm9501_vm9, %v361_v12, -1e+30  ;;  %v1013_v25 = vsel %vm57_vm0, %v7637_v13, -inf  ;;  %v1014_v26 = vsel %vm57_vm0, %v7641_v14, -inf  ;;  %v1015_v27 = vsel %vm57_vm0, %v7645_v16, -inf }
 0x1d2   :  { %v1220_v24 = vsel %vm57_vm0, %v7667_v23, -inf  ;;  %v1017_v28 = vmax.f32 %v1013_v25, %v1014_v26  ;;  %v1018_v29 = vmax.f32 %v1015_v27, %v1016_v22  ;;  %vm9502_vm7 = vcmp.gt.f32.partialorder %v7579_v45, 0.0 }
 0x1d3   :  { %v7679_v30 = vsel %vm9502_vm7, %v358_v0, -1e+30  ;;  %vm9503_vm9 = vcmp.gt.f32.partialorder %v7584_v46, 0.0  ;;  %v7687_v32 = vsel %vm601_vm14, %v360_v3, -1e+30 }
 0x1d4   :  { %v7683_v31 = vsel %vm9503_vm9, %v359_v1, -1e+30  ;;  %v607_v33 = vsel %vm57_vm0, %v7679_v30, -inf  ;;  %v7695_v42 = vsel %vm9410_vm15, %v358_v0, -1e+30  ;;  %v1019_v43 = vmax.f32 %v1017_v28, %v1018_v29 }
 0x1d5   :  { %v608_v41 = vsel %vm57_vm0, %v7683_v31, -inf  ;;  %v609_v47 = vsel %vm57_vm0, %v7687_v32, -inf  ;;  %v7701_v50 = vsel %vm9412_vm3, %v359_v1, -1e+30  ;;  %v7705_v52 = vsel %vm9411_vm2, %v360_v3, -1e+30 }
 0x1d6   :  { %v611_v48 = vmax.f32 %v607_v33, %v608_v41  ;;  %v612_v51 = vmax.f32 %v609_v47, %v610_v20  ;;  %v1217_v53 = vsel %vm57_vm0, %v7695_v42, -inf  ;;  %v1218_v60 = vsel %vm57_vm0, %v7701_v50, -inf }
 0x1d7   :  { %v1020_v61 = vrot.slane %v1019_v43, 4  ;;  %v1219_v62 = vsel %vm57_vm0, %v7705_v52, -inf  ;;  %v1221_v63 = vmax.f32 %v1217_v53, %v1218_v60  ;;  %v7715_v12 = vsel %vm802_vm13, %v358_v0, -1e+30 }
 0x1d8   :  { %v613_v20 = vmax.f32 %v611_v48, %v612_v51  ;;  %v1222_v22 = vmax.f32 %v1219_v62, %v1220_v24  ;;  %v7719_v25 = vsel %vm803_vm12, %v359_v1, -1e+30  ;;  %v7723_v26 = vsel %vm804_vm8, %v360_v3, -1e+30 }
 0x1d9   :  { %v1021_v27 = vmax.f32 %v1019_v43, %v1020_v61  ;;  %v810_v28 = vsel %vm57_vm0, %v7715_v12, -inf  ;;  %v811_v29 = vsel %vm57_vm0, %v7719_v25, -inf  ;;  %v812_v0 = vsel %vm57_vm0, %v7723_v26, -inf }
 0x1da   :  { %v614_v33 = vrot.slane %v613_v20, 4  ;;  %v1223_v24 = vmax.f32 %v1221_v63, %v1222_v22  ;;  %v814_v41 = vmax.f32 %v810_v28, %v811_v29  ;;  %v815_v47 = vmax.f32 %v812_v0, %v813_v21 }
 0x1db   :  { %v1022_v1 = vrot.slane %v1021_v27, 2 }
 0x1dc   :  { %v615_v48 = vmax.f32 %v613_v20, %v614_v33  ;;  %v1224_v51 = vrot.slane %v1223_v24, 4  ;;  %v816_v53 = vmax.f32 %v814_v41, %v815_v47 }
 0x1dd   :  { %v1023_v3 = vmax.f32 %v1021_v27, %v1022_v1 }
 0x1de   :  { %v616_v60 = vrot.slane %v615_v48, 2  ;;  %v1225_v43 = vmax.f32 %v1223_v24, %v1224_v51  ;;  %v817_v61 = vrot.slane %v816_v53, 4 }
 0x1df   :  { %v1024_v62 = vrot.slane %v1023_v3, 1 }
 0x1e0   :  { %v617_v11 = vmax.f32 %v615_v48, %v616_v60  ;;  %v1226_v9 = vrot.slane %v1225_v43, 2  ;;  %v818_v34 = vmax.f32 %v816_v53, %v817_v61 }
 0x1e1   :  { %v1025_v15 = vmax.f32 %v1023_v3, %v1024_v62 }
 0x1e2   :  { %v618_v7 = vrot.slane %v617_v11, 1  ;;  %v1227_v6 = vmax.f32 %v1225_v43, %v1226_v9  ;;  %v819_v5 = vrot.slane %v818_v34, 2 }
 0x1e3   :  { %v1026_v63 = vsub.f32 %v7637_v13, %v1025_v15  ;;  %v1027_v21 = vsub.f32 %v7641_v14, %v1025_v15  ;;  %v1028_v20 = vsub.f32 %v7645_v16, %v1025_v15  ;;  %v1029_v22 = vsub.f32 %v7657_v19, %v1025_v15 }
 0x1e4   :  { %v619_v27 = vmax.f32 %v617_v11, %v618_v7  ;;  %v1228_v28 = vrot.slane %v1227_v6, 1  ;;  %v820_v29 = vmax.f32 %v818_v34, %v819_v5 }
 0x1e5   :  { %v1030_v0 = vmul.f32 1.442695, %v1026_v63  ;;  %v1032_v33 = vmul.f32 1.442695, %v1027_v21  ;;  %v1034_v24 = vmul.f32 1.442695, %v1028_v20 }
 0x1e6   :  { %v1036_v41 = vmul.f32 1.442695, %v1029_v22  ;;  %v620_v47 = vsub.f32 %v7679_v30, %v619_v27  ;;  %v621_v9 = vsub.f32 %v7683_v31, %v619_v27  ;;  %v622_v1 = vsub.f32 %v7687_v32, %v619_v27 }
 0x1e7   :  { %7086 = vpow2.f32 %v1030_v0  ;;  %v623_v13 = vsub.f32 %v7649_v17, %v619_v27  ;;  %v1229_v14 = vmax.f32 %v1227_v6, %v1228_v28  ;;  %v821_v16 = vrot.slane %v820_v29, 1 }
 0x1e8   :  { %7088 = vpow2.f32 %v1032_v33  ;;  %v624_v15 = vmul.f32 1.442695, %v620_v47  ;;  %v626_v7 = vmul.f32 1.442695, %v621_v9  ;;  %v628_v11 = vmul.f32 1.442695, %v622_v1 }
 0x1e9   :  { %7090 = vpow2.f32 %v1034_v24  ;;  %v630_v5 = vmul.f32 1.442695, %v623_v13  ;;  %v1230_v34 = vsub.f32 %v7695_v42, %v1229_v14  ;;  %v1231_v19 = vsub.f32 %v7701_v50, %v1229_v14 }
 0x1ea   :  { %7092 = vpow2.f32 %v1036_v41  ;;  %v1232_v30 = vsub.f32 %v7705_v52, %v1229_v14  ;;  %v1233_v31 = vsub.f32 %v7667_v23, %v1229_v14  ;;  %v822_v32 = vmax.f32 %v820_v29, %v821_v16 }
 0x1eb   :  { %7094 = vpow2.f32 %v624_v15  ;;  %v1234_v17 = vmul.f32 1.442695, %v1230_v34  ;;  %v1236_v6 = vmul.f32 1.442695, %v1231_v19 }
 0x1ec   :  { %7096 = vpow2.f32 %v626_v7  ;;  %v823_v48 = vsub.f32 %v7715_v12, %v822_v32  ;;  %v1238_v51 = vmul.f32 1.442695, %v1232_v30  ;;  %v824_v53 = vsub.f32 %v7719_v25, %v822_v32 }
 0x1ed   :  { %7098 = vpow2.f32 %v628_v11  ;;  %v825_v42 = vsub.f32 %v7723_v26, %v822_v32  ;;  %v1240_v50 = vmul.f32 1.442695, %v1233_v31  ;;  %v826_v3 = vsub.f32 %v7653_v18, %v822_v32 }
 0x1ee   :  { %7100 = vpow2.f32 %v630_v5  ;;  %v827_v52 = vmul.f32 1.442695, %v823_v48  ;;  %v829_v23 = vmul.f32 1.442695, %v824_v53 }
 0x1ef   :  { %7102 = vpow2.f32 %v1234_v17  ;;  %v831_v43 = vmul.f32 1.442695, %v825_v42  ;;  %v833_v62 = vmul.f32 1.442695, %v826_v3 }
 0x1f0   :  { %7104 = vpow2.f32 %v1236_v6 }
 0x1f1   :  { %v7087_v60 = vpop.eup %7086  ;;  %7106 = vpow2.f32 %v1238_v51 }
 0x1f2   :  { %v7089_v61 = vpop.eup %7088  ;;  %v7748_v12 = vmul.f32 %v7087_v60, %v7561_v39  ;;  %7108 = vpow2.f32 %v1240_v50 }
 0x1f3   :  { %v7091_v25 = vpop.eup %7090  ;;  %v7751_v26 = vmul.f32 %v7089_v61, %v7566_v40  ;;  %7110 = vpow2.f32 %v827_v52 }
 0x1f4   :  { %v7093_v63 = vpop.eup %7092  ;;  %v7754_v18 = vmul.f32 %v7091_v25, %v7574_v44  ;;  %v1042_v21 = vsel %vm57_vm0, %v7748_v12, 0.0  ;;  %7112 = vpow2.f32 %v829_v23 }
 0x1f5   :  { %v7095_v20 = vpop.eup %7094  ;;  %v7759_v22 = vmul.f32 %v7093_v63, %v7551_v37  ;;  %v1043_v27 = vsel %vm57_vm0, %v7751_v26, 0.0  ;;  %7114 = vpow2.f32 %v831_v43 }
 0x1f6   :  { %v7097_v28 = vpop.eup %7096  ;;  %v1044_v29 = vadd.f32 %v1043_v27, %v1042_v21  ;;  %v7764_v0 = vmul.f32 %v7095_v20, %v7579_v45  ;;  %7116 = vpow2.f32 %v833_v62  ;;  %v1045_v24 = vsel %vm57_vm0, %v7754_v18, 0.0 }
 0x1f7   :  { %v7099_v33 = vpop.eup %7098  ;;  %v7769_v41 = vmul.f32 %v7097_v28, %v7584_v46  ;;  %v1047_v16 = vsel %vm57_vm0, %v7759_v22, 0.0 }
 0x1f8   :  { %v7101_v47 = vpop.eup %7100  ;;  %v1046_v9 = vadd.f32 %v1045_v24, %v1044_v29  ;;  %v7772_v1 = vmul.f32 %v7099_v33, %v7593_v49  ;;  %v636_v13 = vsel %vm57_vm0, %v7764_v0, 0.0 }
 0x1f9   :  { %v7103_v14 = vpop.eup %7102  ;;  %v7779_v15 = vmul.f32 %v7101_v47, %v7541_v35  ;;  %v637_v7 = vsel %vm57_vm0, %v7769_v41, 0.0 }
 0x1fa   :  { %v7105_v11 = vpop.eup %7104  ;;  %v1048_v5 = vadd.f32 %v1047_v16, %v1046_v9  ;;  %v638_v34 = vadd.f32 %v637_v7, %v636_v13  ;;  %v7784_v19 = vmul.f32 %v7103_v14, %v7598_v54  ;;  %v639_v31 = vsel %vm57_vm0, %v7772_v1, 0.0 }
 0x1fb   :  { %v7107_v30 = vpop.eup %7106  ;;  %v7789_v32 = vmul.f32 %v7105_v11, %v7603_v55  ;;  %v641_v50 = vsel %vm57_vm0, %v7779_v15, 0.0 }
 0x1fc   :  { %v7109_v17 = vpop.eup %7108  ;;  %v1049_v6 = vrot.slane %v1048_v5, 4  ;;  %v640_v48 = vadd.f32 %v639_v31, %v638_v34  ;;  %v7792_v51 = vmul.f32 %v7107_v30, %v7608_v56  ;;  %v1246_v53 = vsel %vm57_vm0, %v7784_v19, 0.0 }
 0x1fd   :  { %v7111_v42 = vpop.eup %7110  ;;  %v7799_v3 = vmul.f32 %v7109_v17, %v7556_v38  ;;  %v1247_v52 = vsel %vm57_vm0, %v7789_v32, 0.0 }
 0x1fe   :  { %v7113_v23 = vpop.eup %7112  ;;  %v1050_v60 = vadd.f32 %v1049_v6, %v1048_v5  ;;  %v642_v43 = vadd.f32 %v641_v50, %v640_v48  ;;  %v1248_v61 = vadd.f32 %v1247_v52, %v1246_v53  ;;  %v1249_v25 = vsel %vm57_vm0, %v7792_v51, 0.0 }
 0x1ff   :  { %v7115_v62 = vpop.eup %7114  ;;  %v7806_v63 = vmul.f32 %v7111_v42, %v7616_v57  ;;  %v7809_v21 = vmul.f32 %v7113_v23, %v7621_v58  ;;  %v1251_v24 = vsel %vm57_vm0, %v7799_v3, 0.0 }
 0x200   :  { %v7117_v20 = vpop.eup %7116  ;;  %v1051_v27 = vrot.slane %v1050_v60, 2  ;;  %v643_v28 = vrot.slane %v642_v43, 4  ;;  %v1250_v29 = vadd.f32 %v1249_v25, %v1248_v61  ;;  %v7812_v33 = vmul.f32 %v7115_v62, %v7626_v59 }
 0x201   :  { %v7817_v47 = vmul.f32 %v7117_v20, %v7546_v36  ;;  %v839_v9 = vsel %vm57_vm0, %v7806_v63, 0.0  ;;  %v840_v13 = vsel %vm57_vm0, %v7809_v21, 0.0 }
 0x202   :  { %v1052_v14 = vadd.f32 %v1051_v27, %v1050_v60  ;;  %v644_v16 = vadd.f32 %v643_v28, %v642_v43  ;;  %v1252_v7 = vadd.f32 %v1251_v24, %v1250_v29  ;;  %v841_v11 = vadd.f32 %v840_v13, %v839_v9 }
 0x203   :  { %v842_v5 = vsel %vm57_vm0, %v7812_v33, 0.0  ;;  %v844_v6 = vsel %vm57_vm0, %v7817_v47, 0.0 }
 0x204   :  { %v1053_v34 = vrot.slane %v1052_v14, 1  ;;  %v645_v30 = vrot.slane %v644_v16, 2  ;;  %v1253_v31 = vrot.slane %v1252_v7, 4  ;;  %v843_v17 = vadd.f32 %v842_v5, %v841_v11 }
 0x206   :  { %v1054_v48 = vadd.f32 %v1053_v34, %v1052_v14  ;;  %v646_v53 = vadd.f32 %v645_v30, %v644_v16  ;;  %v1254_v42 = vadd.f32 %v1253_v31, %v1252_v7  ;;  %v845_v50 = vadd.f32 %v844_v6, %v843_v17 }
 0x208   :  { %vm1055_vm7 = vcmp.le.f32.partialorder %v1054_v48, 0.0  ;;  %v647_v52 = vrot.slane %v646_v53, 1  ;;  %v1255_v23 = vrot.slane %v1254_v42, 2  ;;  %v846_v60 = vrot.slane %v845_v50, 4 }
 0x209   :  { %v1056_v43 = vsel %vm1055_vm7, 1.0, %v1054_v48 }
 0x20a   :  { %7118 = vrcp.f32 %v1056_v43  ;;  %v648_v61 = vadd.f32 %v647_v52, %v646_v53  ;;  %v1256_v62 = vadd.f32 %v1255_v23, %v1254_v42  ;;  %v847_v25 = vadd.f32 %v846_v60, %v845_v50  ;;  %v127_v50 = vpop.f32.mrb[0].mxu0 }
 0x20b   :  { %v6332_v52 = vpop.f32.mrb[1].mxu0  ;;  %v9505_v23 = vmov 0.0  }
 0x20c   :  { %vm649_vm9 = vcmp.le.f32.partialorder %v648_v61, 0.0  ;;  %v1257_v20 = vrot.slane %v1256_v62, 1  ;;  %v848_v27 = vrot.slane %v847_v25, 2 }
 0x20d   :  { %v650_v28 = vsel %vm649_vm9, 1.0, %v648_v61 }
 0x20e   :  { %7120 = vrcp.f32 %v650_v28  ;;  %v1258_v29 = vadd.f32 %v1257_v20, %v1256_v62  ;;  %v849_v24 = vadd.f32 %v848_v27, %v847_v25  ;;  %v5906_v62 = vld [vmem:[%s9380_s6 + $0x10] sm:$0xff]  ;;  %v5907_v25 = vld [vmem:[%s9380_s6 + $0x18] sm:$0xff] }
 0x20f   :  { %v6824_v27 = vpack.c.bf16 %v5907_v25, %v5906_v62 }
 0x210   :  { %v850_v9 = vrot.slane %v849_v24, 1  ;;  %vm1259_vm15 = vcmp.le.f32.partialorder %v1258_v29, 0.0 }
 0x211   :  { %v1260_v7 = vsel %vm1259_vm15, 1.0, %v1258_v29  ;;  %vm9511_vm15 = vcmask 130048  }
 0x212   :  { %v851_v13 = vadd.f32 %v850_v9, %v849_v24  ;;  %7122 = vrcp.f32 %v1260_v7  ;;  %v9507_v7 = vld [vmem:[#allocation2_spill] sm:$0xff]  ;;  %vm9513_vm7 = vmmov %vm9511_vm15 }
 0x213   :  { %vm9514_vm9 = vmmov %vm9513_vm7 }
 0x214   :  { %v7119_v14 = vpop.eup %7118  ;;  %vm852_vm2 = vcmp.le.f32.partialorder %v851_v13, 0.0  ;;  %vm9515_vm3 = vmmov %vm9513_vm7 }
 0x215   :  { %v1058_v16 = vmul.f32 %v7119_v14, %v7748_v12  ;;  %v1059_v34 = vmul.f32 %v7119_v14, %v7751_v26  ;;  %v853_v30 = vsel %vm852_vm2, 1.0, %v851_v13  ;;  %v1060_v17 = vmul.f32 %v7119_v14, %v7754_v18  ;;  %v5922_v13 = vld [vmem:[%s9386_s9 + $0x10] sm:$0xff] }
 0x216   :  { %7124 = vrcp.f32 %v853_v30  ;;  %v1061_v6 = vmul.f32 %v7119_v14, %v7759_v22  ;;  %vm9506_vm2 = vmmov 0   ;;  %v5923_v14 = vld [vmem:[%s9386_s9 + $0x18] sm:$0xff] }
 0x217   :  { %1062 = vxpose.xlu1.b32.start [1/4] (short) (narrow) %v1058_v16, 32  ;;  %v6839_v16 = vpack.c.bf16 %v5923_v14, %v5922_v13 }
 0x218   :  { %v7121_v11 = vpop.eup %7120 }
 0x219   :  { %v652_v5 = vmul.f32 %v7121_v11, %v7764_v0  ;;  %v653_v31 = vmul.f32 %v7121_v11, %v7769_v41  ;;  %v654_v12 = vmul.f32 %v7121_v11, %v7772_v1  ;;  %v655_v0 = vmul.f32 %v7121_v11, %v7779_v15  ;;  %v9508_v11 = vld [vmem:[#allocation3_spill] sm:$0xff] }
 0x21b   :  { %656 = vxpose.xlu0.b32.start [1/4] (short) (narrow) %v652_v5, 32  ;;  %1063 = vxpose.xlu1.b32.cont [2/4] (short) (narrow) %v1059_v34, 32  ;;  %v5927_v5 = vld [vmem:[%s9387_s10 + $0x10] sm:$0xff] }
 0x21c   :  { %v7123_v48 = vpop.eup %7122  ;;  %v9509_v34 = vld [vmem:[#allocation4_spill] sm:$0xff] }
 0x21d   :  { %v1262_v26 = vmul.f32 %v7123_v48, %v7784_v19  ;;  %v1263_v18 = vmul.f32 %v7123_v48, %v7789_v32  ;;  %v1264_v22 = vmul.f32 %v7123_v48, %v7792_v51  ;;  %v1265_v15 = vmul.f32 %v7123_v48, %v7799_v3  ;;  %v362_v32 = vld [vmem:[%s9386_s9] sm:$0xff] }
 0x21e   :  { %v443_v3 = vld [vmem:[%s9387_s10] sm:$0xff] }
 0x21f   :  { %657 = vxpose.xlu0.b32.cont [2/4] (short) (narrow) %v653_v31, 32  ;;  %1064 = vxpose.xlu1.b32.cont [3/4] (short) (narrow) %v1060_v17, 32 }
 0x220   :  { %v7125_v53 = vpop.eup %7124 }
 0x221   :  { %v855_v41 = vmul.f32 %v7125_v53, %v7806_v63  ;;  %v856_v1 = vmul.f32 %v7125_v53, %v7809_v21  ;;  %v857_v42 = vmul.f32 %v7125_v53, %v7812_v33  ;;  %v858_v19 = vmul.f32 %v7125_v53, %v7817_v47  ;;  %v363_v63 = vld [vmem:[%s9386_s9 + $0x8] sm:$0xff] }
 0x222   :  { %v6785_v51 = vpack.c.bf16 %v363_v63, %v362_v32  ;;  %v9504_v21 = vmov 0.0|0.0   ;;  %v444_v33 = vld [vmem:[%s9387_s10 + $0x8] sm:$0xff]  ;;  %v5915_v63 = vld [vmem:[%s9382_s7 + $0x1] ss:$0 sm:$0xff] }
 0x223   :  { %658 = vxpose.xlu0.b32.cont [3/4] (short) (narrow) %v654_v12, 32  ;;  %1065 = vxpose.xlu1.b32.end [4/4] (short) (narrow) %v1061_v6, 32  ;;  %v6789_v47 = vpack.c.bf16 %v444_v33, %v443_v3 }
 0x224   :  { %6787 = vmatpush3.bf16.xpose.msk.msra.mxu1 %vm7449_vm1, %v6785_v51 }
 0x225   :  { %6788 = vmatprep.subr.bf16.mxu1 %v9504_v21 }
 0x227   :  { %659 = vxpose.xlu0.b32.end [4/4] (short) (narrow) %v655_v0, 32  ;;  %1266 = vxpose.xlu1.b32.start [1/4] (short) (narrow) %v1262_v26, 32 }
 0x22b   :  { %859 = vxpose.xlu0.b32.start [1/4] (short) (narrow) %v855_v41, 32  ;;  %1267 = vxpose.xlu1.b32.cont [2/4] (short) (narrow) %v1263_v18, 32 }
 0x22c   :  { %6359 = vmatmul.mubr.msk.f32.vlgmr.msra.gmra.mrb[6].mxu1 %vm57_vm0, %v127_v50 }
 0x22d   :  { %6791 = vmatpush3.bf16.xpose.msk.msra.mxu1 %vm7449_vm1, %v6789_v47  ;;  %6365 = vmatprep.mubr.msk.f32.mxu1 %vm9506_vm2, %v9505_v23 }
 0x22e   :  { %6801 = vmatprep.subr.bf16.mxu1 %v7487_v8 }
 0x22f   :  { %860 = vxpose.xlu0.b32.cont [2/4] (short) (narrow) %v856_v1, 32  ;;  %1268 = vxpose.xlu1.b32.cont [3/4] (short) (narrow) %v1264_v22, 32 }
 0x233   :  { %861 = vxpose.xlu0.b32.cont [3/4] (short) (narrow) %v857_v42, 32  ;;  %1269 = vxpose.xlu1.b32.end [4/4] (short) (narrow) %v1265_v15, 32 }
 0x234   :  { %6366 = vmatmul.mubr.msk.f32.vlgmr.msra.gmra.mrb[8].mxu1 %vm57_vm0, %v127_v50 }
 0x235   :  { %6803 = vmatpush3.bf16.msra.mxu1 %v7487_v8 }
 0x236   :  { %6805 = vmatprep.subr.bf16.mxu1 %v7493_v10 }
 0x237   :  { %862 = vxpose.xlu0.b32.end [4/4] (short) (narrow) %v858_v19, 32 }
 0x239   :  { %6807 = vmatpush3.bf16.msra.mxu1 %v7493_v10 }
 0x23a   :  { %6817 = vmatprep.subr.bf16.mxu1 %v7487_v8 }
 0x297   :  { %v1078_v43 = vpop.trf.xlu1 }
 0x29b   :  { %v672_v60 = vpop.trf.xlu0  ;;  %v1079_v20 = vpop.trf.xlu1 }
 0x29c   :  { %6376 = vmatprep.mubr.msk.f32.mxu0 %vm57_vm0, %v672_v60 }
 0x29f   :  { %v673_v61 = vpop.trf.xlu0  ;;  %v1080_v24 = vpop.trf.xlu1 }
 0x2a0   :  { %6377 = vmatmul.mubr.msk.f32.vlgmr.msra.gmra.mrb[2].mxu0 %vm57_vm0, %v673_v61 }
 0x2a1   :  { %6811 = vmatpush3.bf16.msra.mxu0 %v7487_v8 }
 0x2a2   :  { %6813 = vmatprep.subr.bf16.mxu0 %v7493_v10 }
 0x2a3   :  { %v674_v28 = vpop.trf.xlu0  ;;  %v1081_v9 = vpop.trf.xlu1 }
 0x2a4   :  { %6379 = vmatprep.mubr.msk.f32.mxu0 %vm57_vm0, %v674_v28 }
 0x2a5   :  { %6815 = vmatpush3.bf16.msra.mxu0 %v7493_v10 }
 0x2a6   :  { %6826 = vmatprep.subr.msk.bf16.mxu0 %vm7449_vm1, %v6824_v27 }
 0x2a7   :  { %v675_v29 = vpop.trf.xlu0  ;;  %v1282_v6 = vpop.trf.xlu1 }
 0x2a8   :  { %6380 = vmatmul.mubr.msk.f32.gmra.mrb[4].mxu0 %vm57_vm0, %v675_v29 }
 0x2a9   :  { %6404 = vmatprep.mubr.msk.f32.mxu0 %vm57_vm0, %v1078_v43 }
 0x2ab   :  { %v875_v31 = vpop.trf.xlu0  ;;  %v1283_v0 = vpop.trf.xlu1 }
 0x2ac   :  { %6405 = vmatmul.mubr.msk.f32.vlgmr.msra.gmra.mrb[6].mxu0 %vm57_vm0, %v1079_v20  ;;  %6390 = vmatprep.mubr.msk.f32.mxu1 %vm57_vm0, %v875_v31 }
 0x2ad   :  { %6407 = vmatprep.mubr.msk.f32.mxu0 %vm57_vm0, %v1080_v24  ;;  %v5916_v24 = vld [vmem:[%s9383_s8 + $0x1] sm:$0x1] }
 0x2ae   :  { %6829 = vmatpush3.bf16.xpose.msk.msra.mxu0 %vm7449_vm1, %v6824_v27 }
 0x2af   :  { %6838 = vmatprep.subr.bf16.mxu0 %v9504_v21  ;;  %v876_v17 = vpop.trf.xlu0  ;;  %v1284_v26 = vpop.trf.xlu1 }
 0x2b0   :  { %6408 = vmatmul.mubr.msk.f32.gmra.mrb[8].mxu0 %vm57_vm0, %v1081_v9  ;;  %6391 = vmatmul.mubr.msk.f32.vlgmr.msra.gmra.mrb[10].mxu1 %vm57_vm0, %v876_v17 }
 0x2b1   :  { %6428 = vmatprep.mubr.msk.f32.mxu0 %vm57_vm0, %v7456_v4  ;;  %v5928_v4 = vld [vmem:[%s9387_s10 + $0x18] sm:$0xff]  ;;  %6819 = vmatpush3.bf16.msra.mxu1 %v7487_v8 }
 0x2b2   :  { %v6843_v30 = vpack.c.bf16 %v5928_v4, %v5927_v5  ;;  %6821 = vmatprep.subr.bf16.mxu1 %v7493_v10 }
 0x2b3   :  { %v877_v12 = vpop.trf.xlu0  ;;  %v1285_v53 = vpop.trf.xlu1 }
 0x2b4   :  { %6393 = vmatprep.mubr.msk.f32.mxu1 %vm57_vm0, %v877_v12 }
 0x2b5   :  { %6429 = vmatmul.mubr.msk.f32.vlgmr.msra.gmra.mrb[10].mxu0 %vm57_vm0, %v9507_v7  ;;  %6823 = vmatpush3.bf16.msra.mxu1 %v7493_v10 }
 0x2b6   :  { %6431 = vmatprep.mubr.msk.f32.mxu0 %vm57_vm0, %v9508_v11  ;;  %6841 = vmatpush3.bf16.xpose.msk.msra.mxu0 %vm7449_vm1, %v6839_v16 }
 0x2b7   :  { %6842 = vmatprep.subr.bf16.mxu0 %v9504_v21  ;;  %6830 = vmatprep.subr.bf16.mxu1 %v9504_v21  ;;  %v878_v48 = vpop.trf.xlu0 }
 0x2b8   :  { %6394 = vmatmul.mubr.msk.f32.gmra.mrb[12].mxu1 %vm57_vm0, %v878_v48 }
 0x2b9   :  { %6432 = vmatmul.mubr.msk.f32.gmra.mrb[12].mxu0 %vm57_vm0, %v9509_v34  ;;  %6418 = vmatprep.mubr.msk.f32.mxu1 %vm57_vm0, %v1282_v6 }
 0x2ba   :  { %6449 = vmatprep.mubr.msk.f32.mxu0 %vm9506_vm2, %v9505_v23 }
 0x2bc   :  { %6419 = vmatmul.mubr.msk.f32.vlgmr.msra.gmra.mrb[14].mxu1 %vm57_vm0, %v1283_v0 }
 0x2bd   :  { %6450 = vmatmul.mubr.msk.f32.vlgmr.msra.gmra.mrb[14].mxu0 %vm57_vm0, %v127_v50  ;;  %6421 = vmatprep.mubr.msk.f32.mxu1 %vm57_vm0, %v1284_v26 }
 0x2be   :  { %6845 = vmatpush3.bf16.xpose.msk.msra.mxu0 %vm7449_vm1, %v6843_v30  ;;  %6456 = vmatprep.mubr.msk.f32.mxu0 %vm9506_vm2, %v9505_v23 }
 0x2bf   :  { %6855 = vmatprep.subr.bf16.mxu0 %v7487_v8 }
 0x2c0   :  { %6422 = vmatmul.mubr.msk.f32.gmra.mrb[16].mxu1 %vm57_vm0, %v1285_v53 }
 0x2c1   :  { %6442 = vmatprep.mubr.msk.f32.mxu1 %vm9506_vm2, %v9505_v23 }
 0x2c5   :  { %6457 = vmatmul.mubr.msk.f32.vlgmr.msra.gmra.mrb[16].mxu0 %vm57_vm0, %v127_v50 }
 0x2c6   :  { %6857 = vmatpush3.bf16.msra.mxu0 %v7487_v8 }
 0x2c7   :  { %6859 = vmatprep.subr.bf16.mxu0 %v7493_v10 }
 0x2ca   :  { %6861 = vmatpush3.bf16.msra.mxu0 %v7493_v10 }
 0x2cb   :  { %6871 = vmatprep.subr.bf16.mxu0 %v7487_v8 }
 0x2ff   :  { %v439_v9 = vpop.f32.mrb[6].mxu1 }
 0x300   :  { %v6360_v14 = vpop.f32.mrb[7].mxu1 }
 0x307   :  { %v517_v7 = vpop.f32.mrb[8].mxu1 }
 0x308   :  { %v6367_v5 = vpop.f32.mrb[9].mxu1  ;;  %v528_v34 = vrot.slane %v517_v7, 7  ;;  %v560_v30 = vrot.slane %v517_v7, 1  ;;  %v7982_v48 = vmul.f32 %v517_v7, %v439_v9 }
 0x30a   :  { %v7984_v0 = vmul.f32 %v560_v30, %v439_v9  ;;  %v7986_v26 = vmul.f32 %v528_v34, %v439_v9 }
 0x373   :  { %v7941_v41 = vpop.f32.mrb[2].mxu0 }
 0x374   :  { %v7943_v18 = vpop.f32.mrb[3].mxu0 }
 0x37b   :  { %v7945_v1 = vpop.f32.mrb[4].mxu0 }
 0x37c   :  { %v7947_v22 = vpop.f32.mrb[5].mxu0 }
 0x37f   :  { %v7949_v42 = vpop.f32.mrb[6].mxu0 }
 0x380   :  { %v7951_v15 = vpop.f32.mrb[7].mxu0 }
 0x383   :  { %v7953_v19 = vpop.f32.mrb[8].mxu0  ;;  %v7978_v31 = vpop.f32.mrb[10].mxu1 }
 0x384   :  { %9510 = vst [vmem:[#allocation2_spill] sm:$0xff] %v7953_v19  ;;  %v7955_v32 = vpop.f32.mrb[9].mxu0  ;;  %v7980_v6 = vpop.f32.mrb[11].mxu1 }
 0x388   :  { %v6430_v51 = vpop.f32.mrb[10].mxu0 }
 0x389   :  { %v1515_v3 = vmul.f32 %v6430_v51, %v5915_v63  ;;  %v1487_v33 = vpop.f32.mrb[11].mxu0 }
 0x38a   :  { %v1514_v47 = vmul.f32 %v5915_v63, %v1487_v33  ;;  %v6831_v50 = vpack.c.bf16 %v6430_v51, %v1487_v33 }
 0x38b   :  { %v1521_v52 = vsel %vm9511_vm15, %v1515_v3, 0.0  ;;  %vm9516_vm15 = vmmov %vm9515_vm3  ;;  %v7994_v3 = vpop.f32.mrb[12].mxu1 }
 0x38c   :  { %1522 = vadd.xlane.f32.xlu1 %v1521_v52  ;;  %6833 = vmatpush3.bf16.xpose.msk.msra.mxu1 %vm7508_vm4, %v6831_v50  ;;  %v1518_v43 = vsel %vm9513_vm7, %v1514_v47, 0.0  ;;  %v6433_v61 = vpop.f32.mrb[12].mxu0  ;;  %v7996_v33 = vpop.f32.mrb[13].mxu1  ;;  %vm9523_vm7 = vcmp.gt.f32.partialorder %v7584_v46, 0.0 }
 0x38d   :  { %1519 = vadd.xlane.f32.xlu0 %v1518_v43  ;;  %v1517_v62 = vmul.f32 %v6433_v61, %v5915_v63  ;;  %v1497_v25 = vpop.f32.mrb[13].mxu0  ;;  %6834 = vmatprep.subr.bf16.mxu1 %v9504_v21 }
 0x38e   :  { %v1516_v20 = vmul.f32 %v5915_v63, %v1497_v25  ;;  %v6835_v27 = vpack.c.bf16 %v6433_v61, %v1497_v25 }
 0x38f   :  { %v1527_v28 = vsel %vm9514_vm9, %v1517_v62, 0.0  ;;  %v7998_v47 = vpop.f32.mrb[14].mxu1  ;;  %vm9524_vm9 = vcmp.gt.f32.partialorder %v7551_v37, 0.0 }
 0x390   :  { %1528 = vadd.xlane.f32.xlu1 %v1527_v28  ;;  %v1524_v29 = vsel %vm9515_vm3, %v1516_v20, 0.0  ;;  %v1708_v13 = vpop.f32.mrb[14].mxu0  ;;  %9517 = vst [vmem:[#allocation3_spill] sm:$0xff] %v7998_v47  ;;  %v8000_v50 = vpop.f32.mrb[15].mxu1  ;;  %v9521_v20 = vld [vmem:[#allocation6_spill] sm:$0xff]  ;;  %vm9522_vm3 = vcmp.gt.f32.partialorder %v7579_v45, 0.0 }
 0x391   :  { %1525 = vadd.xlane.f32.xlu0 %v1524_v29  ;;  %v6451_v16 = vpop.f32.mrb[15].mxu0  ;;  %9518 = vst [vmem:[#allocation4_spill] sm:$0xff] %v8000_v50 }
 0x393   :  { %v8002_v52 = vpop.f32.mrb[16].mxu1 }
 0x394   :  { %6837 = vmatpush3.bf16.xpose.msk.msra.mxu1 %vm7508_vm4, %v6835_v27  ;;  %9519 = vst [vmem:[#allocation23_spill] sm:$0xff] %v8002_v52  ;;  %v8004_v43 = vpop.f32.mrb[17].mxu1 }
 0x395   :  { %6847 = vmatprep.subr.bf16.mxu1 %v7487_v8  ;;  %9520 = vst [vmem:[#allocation24_spill] sm:$0xff] %v8004_v43 }
 0x398   :  { %v1787_v11 = vpop.f32.mrb[16].mxu0 }
 0x399   :  { %v6458_v4 = vpop.f32.mrb[17].mxu0  ;;  %v1797_v17 = vrot.slane %v1787_v11, 7  ;;  %v1828_v12 = vrot.slane %v1787_v11, 1  ;;  %v7988_v53 = vmul.f32 %v1787_v11, %v1708_v13 }
 0x39b   :  { %6443 = vmatmul.mubr.msk.f32.vlgmr.msra.gmra.mrb[18].mxu1 %vm9516_vm15, %v5916_v24  ;;  %v7990_v63 = vmul.f32 %v1828_v12, %v1708_v13  ;;  %v7992_v51 = vmul.f32 %v1797_v17, %v1708_v13  ;;  %vm9525_vm15 = vcmp.gt.f32.partialorder %v7603_v55, 0.0 }
 0x39c   :  { %6849 = vmatpush3.bf16.msra.mxu1 %v7487_v8 }
 0x39d   :  { %6851 = vmatprep.subr.bf16.mxu1 %v7493_v10 }
 0x3a0   :  { %6853 = vmatpush3.bf16.msra.mxu1 %v7493_v10 }
 0x3a1   :  { %6863 = vmatprep.subr.bf16.mxu1 %v7487_v8 }
 0x419   :  { %v1523_v61 = vpop.xlane.xlu1 %1522 }
 0x41a   :  { %v1520_v62 = vpop.xlane.xlu0 %1519 }
 0x41d   :  { %v1529_v29 = vpop.xlane.xlu1 %1528 }
 0x41e   :  { %v1526_v24 = vpop.xlane.xlu0 %1525 }
 0x46e   :  { %v1613_v25 = vpop.f32.mrb[18].mxu1 }
 0x46f   :  { %v1620_v27 = vrot.slane %v1613_v25, %v9521_v20  ;;  %v6444_v28 = vpop.f32.mrb[19].mxu1 }
 0x471   :  { %v1621_v9 = vadd.f32 %v1620_v27, %v1520_v62  ;;  %v1622_v13 = vadd.f32 %v1620_v27, %v1523_v61  ;;  %v1623_v14 = vadd.f32 %v1620_v27, %v1526_v24  ;;  %v1624_v16 = vadd.f32 %v1620_v27, %v1529_v29 }
 0x473   :  { %v1625_v7 = vmul.f32 0.01, %v1621_v9  ;;  %v1626_v11 = vmul.f32 0.01, %v1622_v13  ;;  %v1627_v5 = vmul.f32 0.01, %v1623_v14 }
 0x474   :  { %v1628_v4 = vmul.f32 0.01, %v1624_v16 }
 0x475   :  { %v1629_v34 = vmax.f32 %v1621_v9, %v1625_v7  ;;  %v1630_v30 = vmax.f32 %v1622_v13, %v1626_v11  ;;  %v1631_v17 = vmax.f32 %v1623_v14, %v1627_v5 }
 0x476   :  { %v1632_v12 = vmax.f32 %v1624_v16, %v1628_v4 }
 0x477   :  { %v8009_v60 = vsel %vm9522_vm3, %v1629_v34, -1e+30  ;;  %v8013_v25 = vsel %vm9523_vm7, %v1630_v30, -1e+30  ;;  %v8017_v61 = vsel %vm601_vm14, %v1631_v17, -1e+30 }
 0x478   :  { %v8021_v62 = vsel %vm602_vm5, %v1632_v12, -1e+30  ;;  %v1867_v27 = vsel %vm57_vm0, %v8009_v60, -inf  ;;  %v1868_v28 = vsel %vm57_vm0, %v8013_v25, -inf  ;;  %v1869_v29 = vsel %vm57_vm0, %v8017_v61, -inf }
 0x479   :  { %v1870_v24 = vsel %vm57_vm0, %v8021_v62, -inf  ;;  %v1871_v9 = vmax.f32 %v1867_v27, %v1868_v28  ;;  %v8033_v13 = vsel %vm802_vm13, %v1629_v34, -1e+30  ;;  %v8037_v14 = vsel %vm803_vm12, %v1630_v30, -1e+30 }
 0x47a   :  { %v1872_v16 = vmax.f32 %v1869_v29, %v1870_v24  ;;  %v8041_v7 = vsel %vm804_vm8, %v1631_v17, -1e+30  ;;  %v8045_v11 = vsel %vm805_vm6, %v1632_v12, -1e+30  ;;  %v2061_v5 = vsel %vm57_vm0, %v8033_v13, -inf }
 0x47b   :  { %v2062_v4 = vsel %vm57_vm0, %v8037_v14, -inf  ;;  %v2063_v27 = vsel %vm57_vm0, %v8041_v7, -inf  ;;  %v2064_v28 = vsel %vm57_vm0, %v8045_v11, -inf  ;;  %v8057_v29 = vsel %vm1006_vm10, %v1630_v30, -1e+30 }
 0x47c   :  { %v1873_v24 = vmax.f32 %v1871_v9, %v1872_v16  ;;  %v2065_v36 = vmax.f32 %v2061_v5, %v2062_v4  ;;  %v2066_v59 = vmax.f32 %v2063_v27, %v2064_v28  ;;  %v8061_v58 = vsel %vm1007_vm11, %v1631_v17, -1e+30 }
 0x47d   :  { %v8065_v57 = vsel %vm9524_vm9, %v1632_v12, -1e+30  ;;  %v2257_v35 = vsel %vm57_vm0, %v8061_v58, -inf  ;;  %v8071_v49 = vsel %vm9525_vm15, %v1630_v30, -1e+30  ;;  %vm9526_vm3 = vcmp.gt.f32.partialorder %v7608_v56, 0.0 }
 0x47e   :  { %v1874_v40 = vrot.slane %v1873_v24, 4  ;;  %v2067_v46 = vmax.f32 %v2065_v36, %v2066_v59  ;;  %v2258_v9 = vsel %vm57_vm0, %v8065_v57, -inf  ;;  %v8077_v16 = vsel %vm9526_vm3, %v1631_v17, -1e+30 }
 0x47f   :  { %vm9527_vm7 = vcmp.gt.f32.partialorder %v7556_v38, 0.0  ;;  %v2452_v4 = vsel %vm57_vm0, %v8077_v16, -inf  ;;  %vm9528_vm9 = vcmp.gt.f32.partialorder %v7598_v54, 0.0  ;;  %v2256_v36 = vsel %vm57_vm0, %v8057_v29, -inf }
 0x480   :  { %v8081_v5 = vsel %vm9527_vm7, %v1632_v12, -1e+30  ;;  %v8087_v30 = vsel %vm9528_vm9, %v1629_v34, -1e+30  ;;  %v1875_v59 = vmax.f32 %v1873_v24, %v1874_v40  ;;  %v2068_v27 = vrot.slane %v2067_v46, 4 }
 0x481   :  { %v2453_v17 = vsel %vm57_vm0, %v8081_v5, -inf  ;;  %v2450_v28 = vsel %vm57_vm0, %v8087_v30, -inf  ;;  %v2260_v12 = vmax.f32 %v2257_v35, %v2258_v9  ;;  %v2451_v56 = vsel %vm57_vm0, %v8071_v49, -inf }
 0x482   :  { %v2455_v38 = vmax.f32 %v2452_v4, %v2453_v17  ;;  %vm9529_vm15 = vcmp.gt.f32.partialorder %v7561_v39, 0.0  ;;  %v1876_v54 = vrot.slane %v1875_v59, 2  ;;  %v2069_v37 = vmax.f32 %v2067_v46, %v2068_v27 }
 0x483   :  { %v8099_v55 = vsel %vm9529_vm15, %v1629_v34, -1e+30  ;;  %v2454_v44 = vmax.f32 %v2450_v28, %v2451_v56 }
 0x484   :  { %v2255_v40 = vsel %vm57_vm0, %v8099_v55, -inf  ;;  %v1877_v45 = vmax.f32 %v1875_v59, %v1876_v54  ;;  %v2070_v20 = vrot.slane %v2069_v37, 2 }
 0x485   :  { %v2259_v24 = vmax.f32 %v2255_v40, %v2256_v36  ;;  %v2456_v52 = vmax.f32 %v2454_v44, %v2455_v38 }
 0x486   :  { %v1878_v35 = vrot.slane %v1877_v45, 1  ;;  %v2071_v9 = vmax.f32 %v2069_v37, %v2070_v20 }
 0x487   :  { %v2261_v43 = vmax.f32 %v2259_v24, %v2260_v12  ;;  %v2457_v4 = vrot.slane %v2456_v52, 4 }
 0x488   :  { %v1879_v47 = vmax.f32 %v1877_v45, %v1878_v35  ;;  %v2072_v50 = vrot.slane %v2071_v9, 1 }
 0x489   :  { %v2262_v17 = vrot.slane %v2261_v43, 4  ;;  %v2458_v39 = vmax.f32 %v2456_v52, %v2457_v4 }
 0x48a   :  { %v1881_v19 = vsub.f32 %v8013_v25, %v1879_v47  ;;  %v1882_v46 = vsub.f32 %v8017_v61, %v1879_v47  ;;  %v1883_v56 = vsub.f32 %v8021_v62, %v1879_v47  ;;  %v2073_v27 = vmax.f32 %v2071_v9, %v2072_v50 }
 0x48b   :  { %v2263_v34 = vmax.f32 %v2261_v43, %v2262_v17  ;;  %v2459_v36 = vrot.slane %v2458_v39, 2  ;;  %v1880_v43 = vsub.f32 %v8009_v60, %v1879_v47 }
 0x48c   :  { %v1886_v59 = vmul.f32 1.442695, %v1881_v19  ;;  %v1888_v38 = vmul.f32 1.442695, %v1882_v46  ;;  %v1890_v44 = vmul.f32 1.442695, %v1883_v56  ;;  %v2075_v37 = vsub.f32 %v8037_v14, %v2073_v27 }
 0x48d   :  { %v2264_v54 = vrot.slane %v2263_v34, 2  ;;  %v2076_v20 = vsub.f32 %v8041_v7, %v2073_v27  ;;  %v2077_v45 = vsub.f32 %v8045_v11, %v2073_v27  ;;  %v2074_v52 = vsub.f32 %v8033_v13, %v2073_v27 }
 0x48e   :  { %7126 = vpow2.f32 %v1886_v59  ;;  %v2080_v25 = vmul.f32 1.442695, %v2075_v37  ;;  %v2460_v61 = vmax.f32 %v2458_v39, %v2459_v36  ;;  %v1884_v14 = vmul.f32 1.442695, %v1880_v43  ;;  %v7329_v43 = vld [vmem:[%s9385_s1 + $0x30] sm:$0xff] }
 0x48f   :  { %v2265_v62 = vmax.f32 %v2263_v34, %v2264_v54  ;;  %7128 = vpow2.f32 %v1888_v38  ;;  %v2082_v50 = vmul.f32 1.442695, %v2076_v20  ;;  %v2084_v28 = vmul.f32 1.442695, %v2077_v45  ;;  %v7328_v45 = vld [vmem:[%s9385_s1 + $0x20] sm:$0xff] }
 0x490   :  { %7130 = vpow2.f32 %v1890_v44  ;;  %v2078_v19 = vmul.f32 1.442695, %v2074_v52  ;;  %v2461_v12 = vrot.slane %v2460_v61, 1 }
 0x491   :  { %v2266_v40 = vrot.slane %v2265_v62, 1  ;;  %7132 = vpow2.f32 %v2080_v25 }
 0x492   :  { %7134 = vpow2.f32 %v2082_v50  ;;  %v2462_v7 = vmax.f32 %v2460_v61, %v2461_v12 }
 0x493   :  { %v2267_v11 = vmax.f32 %v2265_v62, %v2266_v40  ;;  %7136 = vpow2.f32 %v2084_v28  ;;  %v7330_v62 = vld [vmem:[%s9385_s1] sm:$0xff]  ;;  %v7331_v28 = vld [vmem:[%s9385_s1 + $0x10] sm:$0xff]  ;;  %v7332_v40 = vld [vmem:[%s9385_s1 + $0x38] sm:$0xff] }
 0x494   :  { %7138 = vpow2.f32 %v2078_v19  ;;  %v2463_v60 = vsub.f32 %v8087_v30, %v2462_v7  ;;  %v2464_v47 = vsub.f32 %v8071_v49, %v2462_v7  ;;  %v2465_v39 = vsub.f32 %v8077_v16, %v2462_v7 }
 0x495   :  { %7140 = vpow2.f32 %v1884_v14  ;;  %v2466_v13 = vsub.f32 %v8081_v5, %v2462_v7  ;;  %v2268_v24 = vsub.f32 %v8099_v55, %v2267_v11  ;;  %v2269_v35 = vsub.f32 %v8057_v29, %v2267_v11 }
 0x496   :  { %v2467_v9 = vmul.f32 1.442695, %v2463_v60  ;;  %v2469_v4 = vmul.f32 1.442695, %v2464_v47  ;;  %v2471_v17 = vmul.f32 1.442695, %v2465_v39  ;;  %v2270_v34 = vsub.f32 %v8061_v58, %v2267_v11 }
 0x497   :  { %v2473_v46 = vmul.f32 1.442695, %v2466_v13  ;;  %v2271_v56 = vsub.f32 %v8065_v57, %v2267_v11  ;;  %v2272_v49 = vmul.f32 1.442695, %v2268_v24  ;;  %v2274_v16 = vmul.f32 1.442695, %v2269_v35 }
 0x498   :  { %v7127_v30 = vpop.eup %7126  ;;  %7142 = vpow2.f32 %v2467_v9  ;;  %v2276_v5 = vmul.f32 1.442695, %v2270_v34  ;;  %v7326_v58 = vld [vmem:[%s9385_s1 + $0x28] sm:$0xff]  ;;  %v7333_v47 = vld [vmem:[%s9385_s1 + $0x18] sm:$0xff] }
 0x499   :  { %v7129_v27 = vpop.eup %7128  ;;  %7144 = vpow2.f32 %v2469_v4  ;;  %v2278_v29 = vmul.f32 1.442695, %v2271_v56  ;;  %v7327_v57 = vld [vmem:[%s9385_s1 + $0x8] sm:$0xff]  ;;  %v7334_v4 = vld [vmem:[%s9385_s1 + $0x60] sm:$0xff] }
 0x49a   :  { %v7131_v36 = vpop.eup %7130  ;;  %7146 = vpow2.f32 %v2471_v17  ;;  %v8127_v38 = vmul.f32 %v7327_v57, %v7127_v30  ;;  %v8149_v19 = vmul.f32 %v7331_v28, %v7129_v27  ;;  %v7335_v30 = vld [vmem:[%s9385_s1 + $0x68] sm:$0xff] }
 0x49b   :  { %v7133_v55 = vpop.eup %7132  ;;  %7148 = vpow2.f32 %v2473_v46  ;;  %v8163_v39 = vmul.f32 %v7333_v47, %v7131_v36 }
 0x49c   :  { %v7135_v54 = vpop.eup %7134  ;;  %v8122_v59 = vmul.f32 %v7326_v58, %v7133_v55  ;;  %7150 = vpow2.f32 %v2272_v49  ;;  %v1897_v12 = vsel %vm57_vm0, %v8127_v38, 0.0  ;;  %v1899_v56 = vsel %vm57_vm0, %v8149_v19, 0.0 }
 0x49d   :  { %v7137_v44 = vpop.eup %7136  ;;  %7152 = vpow2.f32 %v2274_v16  ;;  %v8137_v25 = vmul.f32 %v7329_v43, %v7135_v54  ;;  %v1901_v57 = vsel %vm57_vm0, %v8163_v39, 0.0 }
 0x49e   :  { %v7139_v37 = vpop.eup %7138  ;;  %7154 = vpow2.f32 %v2276_v5  ;;  %v2091_v61 = vsel %vm57_vm0, %v8122_v59, 0.0  ;;  %v8156_v14 = vmul.f32 %v7332_v40, %v7137_v44  ;;  %v7336_v5 = vld [vmem:[%s9385_s1 + $0x70] sm:$0xff]  ;;  %v7337_v44 = vld [vmem:[%s9385_s1 + $0x78] sm:$0xff] }
 0x49f   :  { %v7141_v20 = vpop.eup %7140  ;;  %v8132_v52 = vmul.f32 %v7328_v45, %v7139_v37  ;;  %7156 = vpow2.f32 %v2278_v29  ;;  %v2093_v35 = vsel %vm57_vm0, %v8137_v25, 0.0 }
 0x4a0   :  { %v8144_v50 = vmul.f32 %v7330_v62, %v7141_v20  ;;  %v2095_v16 = vsel %vm57_vm0, %v8156_v14, 0.0  ;;  %v7338_v62 = vld [vmem:[%s9385_s1 + $0x40] sm:$0xff] }
 0x4a1   :  { %v2090_v7 = vsel %vm57_vm0, %v8132_v52, 0.0 }
 0x4a2   :  { %v7143_v11 = vpop.eup %7142  ;;  %v2092_v60 = vadd.f32 %v2091_v61, %v2090_v7  ;;  %v1896_v13 = vsel %vm57_vm0, %v8144_v50, 0.0 }
 0x4a3   :  { %v7145_v24 = vpop.eup %7144  ;;  %v1898_v9 = vadd.f32 %v1897_v12, %v1896_v13  ;;  %v8172_v17 = vmul.f32 %v7334_v4, %v7143_v11  ;;  %v7339_v11 = vld [vmem:[%s9385_s1 + $0x48] sm:$0xff] }
 0x4a4   :  { %v7147_v34 = vpop.eup %7146  ;;  %v2094_v46 = vadd.f32 %v2093_v35, %v2092_v60  ;;  %v8179_v49 = vmul.f32 %v7335_v30, %v7145_v24  ;;  %v7340_v35 = vld [vmem:[%s9385_s1 + $0x50] sm:$0xff] }
 0x4a5   :  { %v7149_v27 = vpop.eup %7148  ;;  %v1900_v36 = vadd.f32 %v1899_v56, %v1898_v9  ;;  %v8186_v55 = vmul.f32 %v7336_v5, %v7147_v34  ;;  %v2479_v29 = vsel %vm57_vm0, %v8172_v17, 0.0  ;;  %v7341_v56 = vld [vmem:[%s9385_s1 + $0x58] sm:$0xff] }
 0x4a6   :  { %v7151_v54 = vpop.eup %7150  ;;  %v2096_v58 = vadd.f32 %v2095_v16, %v2094_v46  ;;  %v8195_v37 = vmul.f32 %v7337_v44, %v7149_v27  ;;  %v2480_v20 = vsel %vm57_vm0, %v8179_v49, 0.0 }
 0x4a7   :  { %v7153_v45 = vpop.eup %7152  ;;  %v1902_v43 = vadd.f32 %v1901_v57, %v1900_v36  ;;  %v2481_v61 = vadd.f32 %v2480_v20, %v2479_v29  ;;  %v8202_v28 = vmul.f32 %v7338_v62, %v7151_v54  ;;  %v2482_v7 = vsel %vm57_vm0, %v8186_v55, 0.0 }
 0x4a8   :  { %v7155_v12 = vpop.eup %7154  ;;  %v2097_v40 = vrot.slane %v2096_v58, 4  ;;  %v8209_v60 = vmul.f32 %v7339_v11, %v7153_v45  ;;  %v2484_v46 = vsel %vm57_vm0, %v8195_v37, 0.0 }
 0x4a9   :  { %v7157_v47 = vpop.eup %7156  ;;  %v1903_v13 = vrot.slane %v1902_v43, 4  ;;  %v2483_v24 = vadd.f32 %v2482_v7, %v2481_v61  ;;  %v8214_v9 = vmul.f32 %v7340_v35, %v7155_v12  ;;  %v2284_v4 = vsel %vm57_vm0, %v8202_v28, 0.0 }
 0x4aa   :  { %v2098_v34 = vadd.f32 %v2097_v40, %v2096_v58  ;;  %v8223_v30 = vmul.f32 %v7341_v56, %v7157_v47  ;;  %v2285_v27 = vsel %vm57_vm0, %v8209_v60, 0.0 }
 0x4ab   :  { %v1904_v16 = vadd.f32 %v1903_v13, %v1902_v43  ;;  %v2485_v36 = vadd.f32 %v2484_v46, %v2483_v24  ;;  %v2286_v5 = vadd.f32 %v2285_v27, %v2284_v4  ;;  %v2287_v54 = vsel %vm57_vm0, %v8214_v9, 0.0 }
 0x4ac   :  { %v2099_v29 = vrot.slane %v2098_v34, 2  ;;  %v2289_v45 = vsel %vm57_vm0, %v8223_v30, 0.0 }
 0x4ad   :  { %v1905_v58 = vrot.slane %v1904_v16, 2  ;;  %v2486_v57 = vrot.slane %v2485_v36, 4  ;;  %v2288_v44 = vadd.f32 %v2287_v54, %v2286_v5 }
 0x4ae   :  { %v2100_v20 = vadd.f32 %v2099_v29, %v2098_v34 }
 0x4af   :  { %v1906_v61 = vadd.f32 %v1905_v58, %v1904_v16  ;;  %v2487_v62 = vadd.f32 %v2486_v57, %v2485_v36  ;;  %v2290_v12 = vadd.f32 %v2289_v45, %v2288_v44 }
 0x4b0   :  { %v2101_v40 = vrot.slane %v2100_v20, 1 }
 0x4b1   :  { %v1907_v7 = vrot.slane %v1906_v61, 1  ;;  %v2488_v11 = vrot.slane %v2487_v62, 2  ;;  %v2291_v43 = vrot.slane %v2290_v12, 4 }
 0x4b2   :  { %v2102_v47 = vadd.f32 %v2101_v40, %v2100_v20 }
 0x4b3   :  { %v1908_v13 = vadd.f32 %v1907_v7, %v1906_v61  ;;  %v2489_v24 = vadd.f32 %v2488_v11, %v2487_v62  ;;  %v2292_v35 = vadd.f32 %v2291_v43, %v2290_v12 }
 0x4b4   :  { %vm2103_vm3 = vcmp.le.f32.partialorder %v2102_v47, 0.0 }
 0x4b5   :  { %v2104_v4 = vsel %vm2103_vm3, 1.0, %v2102_v47  ;;  %vm1909_vm7 = vcmp.le.f32.partialorder %v1908_v13, 0.0  ;;  %v2293_v46 = vrot.slane %v2292_v35, 2  ;;  %v2490_v56 = vrot.slane %v2489_v24, 1 }
 0x4b6   :  { %7158 = vrcp.f32 %v2104_v4  ;;  %v1910_v34 = vsel %vm1909_vm7, 1.0, %v1908_v13  ;;  %vm9447_vm3 = vcmask 123905   ;;  %vm9446_vm7 = vcmask 122880  }
 0x4b7   :  { %7160 = vrcp.f32 %v1910_v34  ;;  %v2294_v27 = vadd.f32 %v2293_v46, %v2292_v35  ;;  %v2491_v36 = vadd.f32 %v2490_v56, %v2489_v24 }
 0x4b9   :  { %v2295_v16 = vrot.slane %v2294_v27, 1  ;;  %vm2492_vm9 = vcmp.le.f32.partialorder %v2491_v36, 0.0 }
 0x4ba   :  { %v2493_v57 = vsel %vm2492_vm9, 1.0, %v2491_v36  ;;  %vm9547_vm9 = vcmask 130048  }
 0x4bb   :  { %v2296_v5 = vadd.f32 %v2295_v16, %v2294_v27  ;;  %7162 = vrcp.f32 %v2493_v57 }
 0x4bd   :  { %vm2297_vm15 = vcmp.le.f32.partialorder %v2296_v5, 0.0 }
 0x4be   :  { %v2298_v20 = vsel %vm2297_vm15, 1.0, %v2296_v5  ;;  %vm9549_vm15 = vmmov %vm9547_vm9 }
 0x4bf   :  { %7164 = vrcp.f32 %v2298_v20 }
 0x4c0   :  { %v7159_v29 = vpop.eup %7158 }
 0x4c1   :  { %v7161_v54 = vpop.eup %7160  ;;  %v2106_v58 = vmul.f32 %v7159_v29, %v8132_v52  ;;  %v2107_v45 = vmul.f32 %v7159_v29, %v8122_v59  ;;  %v2108_v62 = vmul.f32 %v7159_v29, %v8137_v25  ;;  %v2109_v52 = vmul.f32 %v7159_v29, %v8156_v14 }
 0x4c2   :  { %v1912_v44 = vmul.f32 %v7161_v54, %v8144_v50  ;;  %v1913_v61 = vmul.f32 %v7161_v54, %v8127_v38  ;;  %v1914_v12 = vmul.f32 %v7161_v54, %v8149_v19  ;;  %v1915_v40 = vmul.f32 %v7161_v54, %v8163_v39 }
 0x4c3   :  { %2110 = vxpose.xlu1.b32.start [1/4] (short) (narrow) %v2106_v58, 32 }
 0x4c4   :  { %1916 = vxpose.xlu0.b32.start [1/4] (short) (narrow) %v1912_v44, 32 }
 0x4c5   :  { %v7163_v50 = vpop.eup %7162 }
 0x4c6   :  { %v2495_v59 = vmul.f32 %v7163_v50, %v8172_v17  ;;  %v2496_v25 = vmul.f32 %v7163_v50, %v8179_v49  ;;  %v2497_v14 = vmul.f32 %v7163_v50, %v8186_v55  ;;  %v2498_v39 = vmul.f32 %v7163_v50, %v8195_v37 }
 0x4c7   :  { %2111 = vxpose.xlu1.b32.cont [2/4] (short) (narrow) %v2107_v45, 32  ;;  %v567_v49 = vsel %vm9447_vm3, %v7982_v48, 0.0  ;;  %v532_v55 = vsel %vm9447_vm3, %v7986_v26, 0.0  ;;  %v1792_v37 = vsel %vm9446_vm7, %v7988_v53, 0.0  ;;  %v1835_v26 = vsel %vm9447_vm3, %v7988_v53, 0.0 }
 0x4c8   :  { %1917 = vxpose.xlu0.b32.cont [2/4] (short) (narrow) %v1913_v61, 32 }
 0x4c9   :  { %v7165_v7 = vpop.eup %7164 }
 0x4ca   :  { %v2300_v38 = vmul.f32 %v7165_v7, %v8202_v28  ;;  %v2301_v19 = vmul.f32 %v7165_v7, %v8209_v60  ;;  %v2302_v11 = vmul.f32 %v7165_v7, %v8214_v9  ;;  %v2303_v17 = vmul.f32 %v7165_v7, %v8223_v30 }
 0x4cb   :  { %2112 = vxpose.xlu1.b32.cont [3/4] (short) (narrow) %v2108_v62, 32  ;;  %v563_v28 = vsel %vm9446_vm7, %v7984_v0, 0.0  ;;  %v523_v60 = vsel %vm9446_vm7, %v7982_v48, 0.0  ;;  %v1831_v9 = vsel %vm9446_vm7, %v7990_v63, 0.0  ;;  %v1800_v0 = vsel %vm9447_vm3, %v7992_v51, 0.0  ;;  %vm9550_vm7 = vmmov %vm9547_vm9 }
 0x4cc   :  { %1918 = vxpose.xlu0.b32.cont [3/4] (short) (narrow) %v1914_v12, 32  ;;  %vm9551_vm3 = vmmov %vm9550_vm7 }
 0x4cf   :  { %2113 = vxpose.xlu1.b32.end [4/4] (short) (narrow) %v2109_v52, 32 }
 0x4d0   :  { %1919 = vxpose.xlu0.b32.end [4/4] (short) (narrow) %v1915_v40, 32 }
 0x4d3   :  { %2499 = vxpose.xlu1.b32.start [1/4] (short) (narrow) %v2495_v59, 32 }
 0x4d4   :  { %2304 = vxpose.xlu0.b32.start [1/4] (short) (narrow) %v2300_v38, 32 }
 0x4d7   :  { %2500 = vxpose.xlu1.b32.cont [2/4] (short) (narrow) %v2496_v25, 32 }
 0x4d8   :  { %2305 = vxpose.xlu0.b32.cont [2/4] (short) (narrow) %v2301_v19, 32 }
 0x4db   :  { %2501 = vxpose.xlu1.b32.cont [3/4] (short) (narrow) %v2497_v14, 32 }
 0x4dc   :  { %2306 = vxpose.xlu0.b32.cont [3/4] (short) (narrow) %v2302_v11, 32 }
 0x4df   :  { %2502 = vxpose.xlu1.b32.end [4/4] (short) (narrow) %v2498_v39, 32 }
 0x4e0   :  { %2307 = vxpose.xlu0.b32.end [4/4] (short) (narrow) %v2303_v17, 32 }
 0x506   :  { %568 = vadd.xlane.f32.xlu1 %v567_v49 }
 0x50a   :  { %564 = vadd.xlane.f32.xlu1 %v563_v28 }
 0x50d   :  { %533 = vadd.xlane.f32.xlu0 %v532_v55 }
 0x50e   :  { %1793 = vadd.xlane.f32.xlu1 %v1792_v37 }
 0x511   :  { %524 = vadd.xlane.f32.xlu0 %v523_v60 }
 0x512   :  { %1832 = vadd.xlane.f32.xlu1 %v1831_v9 }
 0x515   :  { %1801 = vadd.xlane.f32.xlu0 %v1800_v0  ;;  %v5948_v0 = vld [vmem:[%s9388_s11 + $0x20] sm:$0xff] }
 0x519   :  { %1836 = vadd.xlane.f32.xlu0 %v1835_v26  ;;  %v5949_v26 = vld [vmem:[%s9388_s11 + $0x28] sm:$0xff] }
 0x543   :  { %v2126_v30 = vpop.trf.xlu1 }
 0x544   :  { %v1932_v43 = vpop.trf.xlu0  ;;  %6481 = vmatprep.mubr.msk.f32.mxu0 %vm57_vm0, %v2126_v30 }
 0x545   :  { %6467 = vmatprep.mubr.msk.f32.mxu1 %vm57_vm0, %v1932_v43 }
 0x547   :  { %v2127_v48 = vpop.trf.xlu1 }
 0x548   :  { %v1933_v47 = vpop.trf.xlu0  ;;  %6482 = vmatmul.mubr.msk.f32.vlgmr.msra.gmra.mrb[18].mxu0 %vm57_vm0, %v2127_v48 }
 0x549   :  { %6468 = vmatmul.mubr.msk.f32.vlgmr.msra.gmra.mrb[20].mxu1 %vm57_vm0, %v1933_v47  ;;  %6873 = vmatpush3.bf16.msra.mxu0 %v7487_v8  ;;  %v6878_v47 = vpack.c.bf16 %v5949_v26, %v5948_v0 }
 0x54a   :  { %6865 = vmatpush3.bf16.msra.mxu1 %v7487_v8  ;;  %6875 = vmatprep.subr.bf16.mxu0 %v7493_v10 }
 0x54b   :  { %v2128_v53 = vpop.trf.xlu1  ;;  %6867 = vmatprep.subr.bf16.mxu1 %v7493_v10 }
 0x54c   :  { %v1934_v63 = vpop.trf.xlu0  ;;  %6484 = vmatprep.mubr.msk.f32.mxu0 %vm57_vm0, %v2128_v53 }
 0x54d   :  { %6470 = vmatprep.mubr.msk.f32.mxu1 %vm57_vm0, %v1934_v63  ;;  %6877 = vmatpush3.bf16.msra.mxu0 %v7493_v10 }
 0x54e   :  { %6869 = vmatpush3.bf16.msra.mxu1 %v7493_v10  ;;  %6902 = vmatprep.subr.bf16.mxu0 %v9504_v21 }
 0x54f   :  { %v2129_v51 = vpop.trf.xlu1  ;;  %6880 = vmatprep.subr.msk.bf16.mxu1 %vm7449_vm1, %v6878_v47 }
 0x550   :  { %v1935_v13 = vpop.trf.xlu0  ;;  %6485 = vmatmul.mubr.msk.f32.gmra.mrb[20].mxu0 %vm57_vm0, %v2129_v51 }
 0x551   :  { %6471 = vmatmul.mubr.msk.f32.gmra.mrb[22].mxu1 %vm57_vm0, %v1935_v13 }
 0x553   :  { %v2515_v8 = vpop.trf.xlu1 }
 0x554   :  { %v2320_v24 = vpop.trf.xlu0  ;;  %6509 = vmatprep.mubr.msk.f32.mxu0 %vm57_vm0, %v2515_v8 }
 0x555   :  { %6495 = vmatprep.mubr.msk.f32.mxu1 %vm57_vm0, %v2320_v24 }
 0x557   :  { %v2516_v35 = vpop.trf.xlu1 }
 0x558   :  { %v2321_v4 = vpop.trf.xlu0  ;;  %6510 = vmatmul.mubr.msk.f32.vlgmr.msra.gmra.mrb[22].mxu0 %vm57_vm0, %v2516_v35 }
 0x559   :  { %6496 = vmatmul.mubr.msk.f32.vlgmr.msra.gmra.mrb[24].mxu1 %vm57_vm0, %v2321_v4 }
 0x55a   :  { %6883 = vmatpush3.bf16.xpose.msk.msra.mxu1 %vm7449_vm1, %v6878_v47  ;;  %v50_v47 = vld [vmem:[%s9389_s3 + $0x8] sm:$0xff] }
 0x55b   :  { %v2517_v10 = vpop.trf.xlu1 }
 0x55c   :  { %v2322_v46 = vpop.trf.xlu0  ;;  %6512 = vmatprep.mubr.msk.f32.mxu0 %vm57_vm0, %v2517_v10 }
 0x55d   :  { %6498 = vmatprep.mubr.msk.f32.mxu1 %vm57_vm0, %v2322_v46 }
 0x55f   :  { %v2518_v34 = vpop.trf.xlu1 }
 0x560   :  { %v2323_v56 = vpop.trf.xlu0  ;;  %6513 = vmatmul.mubr.msk.f32.gmra.mrb[24].mxu0 %vm57_vm0, %v2518_v34 }
 0x561   :  { %6499 = vmatmul.mubr.msk.f32.gmra.mrb[26].mxu1 %vm57_vm0, %v2323_v56  ;;  %6551 = vmatprep.mubr.msk.f32.mxu0 %vm9506_vm2, %v9505_v23 }
 0x593   :  { %v569_v27 = vpop.xlane.xlu1 %568 }
 0x594   :  { %v570_v16 = vmul.f32 0.25, %v569_v27 }
 0x596   :  { %v572_v5 = vrot.slane %v570_v16, 1 }
 0x597   :  { %v565_v36 = vpop.xlane.xlu1 %564 }
 0x598   :  { %v566_v29 = vmul.f32 0.25, %v565_v36  ;;  %v5951_v36 = vld [vmem:[%s9388_s11 + $0x38] sm:$0xff] }
 0x59a   :  { %v574_v54 = vmax.f32 %v566_v29, %v572_v5  ;;  %v534_v58 = vpop.xlane.xlu0 %533 }
 0x59b   :  { %v535_v57 = vmul.f32 0.25, %v534_v58  ;;  %v1794_v12 = vpop.xlane.xlu1 %1793 }
 0x59c   :  { %v579_v44 = vrot.slane %v574_v54, 7  ;;  %v575_v20 = vsub.f32 %v566_v29, %v574_v54  ;;  %v1795_v14 = vmul.f32 0.25, %v1794_v12 }
 0x59d   :  { %v537_v62 = vrot.slane %v535_v57, 1 }
 0x59e   :  { %v581_v45 = vsub.f32 %v570_v16, %v579_v44  ;;  %v525_v61 = vpop.xlane.xlu0 %524  ;;  %v576_v40 = vmul.f32 1.442695, %v575_v20  ;;  %v5950_v16 = vld [vmem:[%s9388_s11 + $0x30] sm:$0xff] }
 0x59f   :  { %v526_v52 = vmul.f32 0.25, %v525_v61  ;;  %v1833_v39 = vpop.xlane.xlu1 %1832  ;;  %v6884_v5 = vpack.c.bf16 %v5951_v36, %v5950_v16  ;;  %v1408_v61 = vld [vmem:[%s9388_s11] sm:$0xff]  ;;  %v56_v16 = vld [vmem:[%s9390_s4 + $0x18] sm:$0xff] }
 0x5a0   :  { %v582_v50 = vmul.f32 1.442695, %v581_v45  ;;  %v1834_v9 = vmul.f32 0.25, %v1833_v39 }
 0x5a1   :  { %v539_v7 = vmax.f32 %v526_v52, %v537_v62  ;;  %6886 = vmatprep.subr.msk.bf16.mxu1 %vm7449_vm1, %v6884_v5  ;;  %v1409_v62 = vld [vmem:[%s9388_s11 + $0x8] sm:$0xff] }
 0x5a2   :  { %7166 = vpow2.f32 %v582_v50  ;;  %v1802_v59 = vpop.xlane.xlu0 %1801  ;;  %6889 = vmatpush3.bf16.xpose.msk.msra.mxu1 %vm7449_vm1, %v6884_v5 }
 0x5a3   :  { %v540_v38 = vsub.f32 %v526_v52, %v539_v7  ;;  %v544_v25 = vrot.slane %v539_v7, 7  ;;  %v1803_v19 = vmul.f32 0.25, %v1802_v59  ;;  %7168 = vpow2.f32 %v576_v40 }
 0x5a4   :  { %v8314_v52 = vpack.c.bf16 %v1409_v62, %v1408_v61 }
 0x5a5   :  { %v546_v11 = vsub.f32 %v535_v57, %v544_v25  ;;  %v1805_v17 = vrot.slane %v1803_v19, 1  ;;  %v541_v28 = vmul.f32 1.442695, %v540_v38 }
 0x5a6   :  { %v1837_v49 = vpop.xlane.xlu0 %1836  ;;  %6892 = vmatprep.subr.msk.bf16.mxu1 %vm7449_vm1, %v8314_v52 }
 0x5a7   :  { %v547_v55 = vmul.f32 1.442695, %v546_v11  ;;  %v1807_v37 = vmax.f32 %v1795_v14, %v1805_v17  ;;  %v1838_v60 = vmul.f32 0.25, %v1837_v49 }
 0x5a9   :  { %7170 = vpow2.f32 %v547_v55  ;;  %v1808_v30 = vsub.f32 %v1795_v14, %v1807_v37  ;;  %v1812_v43 = vrot.slane %v1807_v37, 7  ;;  %v1840_v48 = vrot.slane %v1838_v60, 1 }
 0x5aa   :  { %7172 = vpow2.f32 %v541_v28 }
 0x5ab   :  { %v1814_v53 = vsub.f32 %v1803_v19, %v1812_v43  ;;  %v1842_v63 = vmax.f32 %v1834_v9, %v1840_v48  ;;  %v1809_v13 = vmul.f32 1.442695, %v1808_v30  ;;  %v7370_v48 = vmov 0  }
 0x5ac   :  { %v7167_v51 = vpop.eup %7166  ;;  %7085 = vset.pattern.permute.xlu1 %v7370_v48  ;;  %7084 = vset.pattern.permute.xlu0 %v7370_v48 }
 0x5ad   :  { %v1815_v8 = vmul.f32 1.442695, %v1814_v53  ;;  %v1843_v24 = vsub.f32 %v1834_v9, %v1842_v63  ;;  %v1847_v35 = vrot.slane %v1842_v63, 7  ;;  %v585_v4 = vrot.slane %v7167_v51, 1  ;;  %v7169_v10 = vpop.eup %7168  ;;  %2882 = vperm.xlu1 %7085, %v50_v47  }
 0x5af   :  { %7174 = vpow2.f32 %v1815_v8  ;;  %v1849_v46 = vsub.f32 %v1838_v60, %v1847_v35  ;;  %v587_v34 = vadd.f32 %v7169_v10, %v585_v4  ;;  %v1844_v56 = vmul.f32 1.442695, %v1843_v24 }
 0x5b0   :  { %7176 = vpow2.f32 %v1809_v13  ;;  %v49_v13 = vld [vmem:[%s9389_s3] sm:$0xff] }
 0x5b1   :  { %v1850_v27 = vmul.f32 1.442695, %v1849_v46  ;;  %v591_v54 = vrot.slane %v587_v34, 7  ;;  %2877 = vperm.xlu0 %7084, %v49_v13  }
 0x5b3   :  { %v7171_v29 = vpop.eup %7170  ;;  %7178 = vpow2.f32 %v1850_v27  ;;  %v55_v27 = vld [vmem:[%s9390_s4 + $0x10] sm:$0xff] }
 0x5b4   :  { %v550_v58 = vrot.slane %v7171_v29, 1  ;;  %v7173_v57 = vpop.eup %7172  ;;  %7180 = vpow2.f32 %v1844_v56  ;;  %v52_v56 = vld [vmem:[%s9389_s3 + $0x18] sm:$0xff] }
 0x5b5   :  { %7182 = vrcp.f32 %v587_v34  ;;  %v51_v34 = vld [vmem:[%s9389_s3 + $0x10] sm:$0xff] }
 0x5b6   :  { %v552_v44 = vadd.f32 %v7173_v57, %v550_v58  ;;  %7184 = vrcp.f32 %v591_v54 }
 0x5b8   :  { %7186 = vrcp.f32 %v552_v44  ;;  %v556_v20 = vrot.slane %v552_v44, 7 }
 0x5b9   :  { %v7175_v45 = vpop.eup %7174 }
 0x5ba   :  { %v1818_v12 = vrot.slane %v7175_v45, 1  ;;  %7188 = vrcp.f32 %v556_v20  ;;  %v7177_v50 = vpop.eup %7176 }
 0x5bc   :  { %v1820_v40 = vadd.f32 %v7177_v50, %v1818_v12 }
 0x5bd   :  { %v7179_v7 = vpop.eup %7178 }
 0x5be   :  { %v1853_v59 = vrot.slane %v7179_v7, 1  ;;  %7190 = vrcp.f32 %v1820_v40  ;;  %v1824_v38 = vrot.slane %v1820_v40, 7  ;;  %v7181_v25 = vpop.eup %7180 }
 0x5bf   :  { %v7183_v19 = vpop.eup %7182 }
 0x5c0   :  { %v1855_v14 = vadd.f32 %v7181_v25, %v1853_v59  ;;  %7192 = vrcp.f32 %v1824_v38  ;;  %v7185_v11 = vpop.eup %7184  ;;  %v589_v55 = vmul.f32 %v7183_v19, %v7169_v10  ;;  %v54_v10 = vld [vmem:[%s9390_s4 + $0x8] sm:$0xff] }
 0x5c1   :  { %v594_v37 = vmul.f32 %v7185_v11, %v7167_v51  ;;  %v53_v51 = vld [vmem:[%s9390_s4] sm:$0xff] }
 0x5c2   :  { %v7187_v39 = vpop.eup %7186  ;;  %7194 = vrcp.f32 %v1855_v14  ;;  %v1859_v17 = vrot.slane %v1855_v14, 7  ;;  %2901 = vperm.xlu1 %7085, %v53_v51   ;;  %v9532_v14 = vld [vmem:[#allocation3_spill] sm:$0xff] }
 0x5c3   :  { %v554_v49 = vmul.f32 %v7187_v39, %v7173_v57  ;;  %v1396_v26 = vrot.slane %v594_v37, 1  ;;  %v9533_v39 = vld [vmem:[#allocation24_spill] sm:$0xff] }
 0x5c4   :  { %v7189_v28 = vpop.eup %7188  ;;  %7196 = vrcp.f32 %v1859_v17 }
 0x5c5   :  { %7048 = vpush %v554_v49  ;;  %v559_v60 = vmul.f32 %v7189_v28, %v7171_v29  ;;  %v9534_v49 = vld [vmem:[#allocation23_spill] sm:$0xff] }
 0x5c6   :  { %7050 = vpush %v589_v55  ;;  %2906 = vperm.xlu1 %7085, %v54_v10  }
 0x5c7   :  { %v1192_v9 = vrot.slane %v559_v60, 1 }
 0x5c8   :  { %v7191_v0 = vpop.eup %7190 }
 0x5c9   :  { %7052 = vpush %v1192_v9  ;;  %v1822_v30 = vmul.f32 %v7191_v0, %v7177_v50 }
 0x5ca   :  { %v7193_v43 = vpop.eup %7192  ;;  %7054 = vpush %v1396_v26  ;;  %2887 = vperm.xlu1 %7085, %v51_v34  }
 0x5cb   :  { %7056 = vpush %v1822_v30  ;;  %v1827_v53 = vmul.f32 %v7193_v43, %v7175_v45 }
 0x5cc   :  { %v7195_v63 = vpop.eup %7194 }
 0x5cd   :  { %v1857_v8 = vmul.f32 %v7195_v63, %v7181_v25  ;;  %v2434_v24 = vrot.slane %v1827_v53, 1  ;;  %v9531_v25 = vld [vmem:[#allocation4_spill] sm:$0xff] }
 0x5ce   :  { %v7197_v35 = vpop.eup %7196  ;;  %2892 = vperm.xlu1 %7085, %v52_v56  }
 0x5cf   :  { %7058 = vpush %v1857_v8  ;;  %v1862_v4 = vmul.f32 %v7197_v35, %v7179_v7 }
 0x5d0   :  { %7060 = vpush %v2434_v24 }
 0x5d1   :  { %v2629_v46 = vrot.slane %v1862_v4, 1 }
 0x5d2   :  { %2911 = vperm.xlu1 %7085, %v55_v27  }
 0x5d3   :  { %7062 = vpush %v2629_v46 }
 0x5d6   :  { %2916 = vperm.xlu1 %7085, %v56_v16  }
 0x5f6   :  { %s7049_s23 = spop %7048 }
 0x5f7   :  { %v787_v36 = vstv %s7049_s23  ;;  %s7051_s24 = spop %7050 }
 0x5f8   :  { %v789_v5 = vmul.f32 %v787_v36, %v7943_v18  ;;  %v790_v29 = vmul.f32 %v7941_v41, %v787_v36  ;;  %v791_v54 = vmul.f32 %v787_v36, %v7947_v22  ;;  %v792_v58 = vmul.f32 %v7945_v1, %v787_v36 }
 0x5f9   :  { %v990_v57 = vstv %s7051_s24 }
 0x5fa   :  { %v992_v44 = vmul.f32 %v990_v57, %v7980_v6  ;;  %v993_v20 = vmul.f32 %v7978_v31, %v990_v57  ;;  %v994_v45 = vmul.f32 %v990_v57, %v7996_v33  ;;  %v995_v61 = vmul.f32 %v7994_v3, %v990_v57  ;;  %s7053_s3 = spop %7052  ;;  %v9530_v6 = vld [vmem:[#allocation2_spill] sm:$0xff] }
 0x5fb   :  { %v1194_v62 = vstv %s7053_s3  ;;  %s7055_s4 = spop %7054 }
 0x5fc   :  { %v996_v12 = vadd.f32 %v992_v44, %v789_v5  ;;  %v997_v18 = vadd.f32 %v993_v20, %v790_v29  ;;  %v998_v50 = vadd.f32 %v994_v45, %v791_v54  ;;  %v999_v41 = vadd.f32 %v995_v61, %v792_v58  ;;  %s7057_s25 = spop %7056 }
 0x5fd   :  { %v1196_v22 = vmul.f32 %v1194_v62, %v7951_v15  ;;  %v1197_v1 = vmul.f32 %v7949_v42, %v1194_v62  ;;  %v1198_v40 = vmul.f32 %v1194_v62, %v7955_v32  ;;  %v1199_v7 = vmul.f32 %v9530_v6, %v1194_v62 }
 0x5fe   :  { %v1398_v31 = vstv %s7055_s4  ;;  %v2047_v9 = vstv %s7057_s25 }
 0x5ff   :  { %v1200_v59 = vadd.f32 %v1196_v22, %v996_v12  ;;  %v1201_v33 = vadd.f32 %v1197_v1, %v997_v18  ;;  %v1202_v38 = vadd.f32 %v1198_v40, %v998_v50  ;;  %v1203_v3 = vadd.f32 %v1199_v7, %v999_v41  ;;  %v1410_v12 = vld [vmem:[%s9388_s11 + $0x10] sm:$0xff]  ;;  %v1411_v18 = vld [vmem:[%s9388_s11 + $0x18] sm:$0xff] }
 0x600   :  { %v1400_v19 = vmul.f32 %v1398_v31, %v9531_v25  ;;  %v1401_v11 = vmul.f32 %v9532_v14, %v1398_v31  ;;  %v1402_v17 = vmul.f32 %v1398_v31, %v9533_v39  ;;  %v1403_v28 = vmul.f32 %v9534_v49, %v1398_v31  ;;  %s7059_s26 = spop %7058 }
 0x601   :  { %v2241_v37 = vstv %s7059_s26  ;;  %s7061_s27 = spop %7060  ;;  %v6896_v1 = vpack.c.bf16 %v1411_v18, %v1410_v12  ;;  %v5979_v12 = vld [vmem:[%s9382_s7 + $0x2] ss:$0 sm:$0xff] }
 0x602   :  { %v8359_v15 = vadd.f32 %v1400_v19, %v1200_v59  ;;  %v8361_v42 = vadd.f32 %v1401_v11, %v1201_v33  ;;  %v8363_v32 = vadd.f32 %v1402_v17, %v1202_v38  ;;  %v8365_v55 = vadd.f32 %v1403_v28, %v1203_v3  ;;  %v5987_v11 = vld [vmem:[%s9386_s9 + $0x28] sm:$0xff] }
 0x603   :  { %v2436_v36 = vstv %s7061_s27 }
 0x604   :  { %s7063_s28 = spop %7062 }
 0x605   :  { %v2631_v57 = vstv %s7063_s28 }
 0x61b   :  { %v6483_v60 = vpop.f32.mrb[18].mxu0 }
 0x61c   :  { %v6469_v0 = vpop.f32.mrb[20].mxu1  ;;  %v2244_v26 = vmul.f32 %v6483_v60, %v2241_v37  ;;  %v2220_v30 = vpop.f32.mrb[19].mxu0 }
 0x61d   :  { %v2050_v43 = vmul.f32 %v6469_v0, %v2047_v9  ;;  %v2026_v48 = vpop.f32.mrb[21].mxu1  ;;  %v2243_v47 = vmul.f32 %v2241_v37, %v2220_v30  ;;  %v7342_v30 = vld [vmem:[%s9381_s0 + $0x8] sm:$0xff] }
 0x61e   :  { %v2049_v53 = vmul.f32 %v2047_v9, %v2026_v48 }
 0x61f   :  { %v2248_v63 = vadd.f32 %v2244_v26, %v2050_v43 }
 0x620   :  { %v2247_v51 = vadd.f32 %v2243_v47, %v2049_v53  ;;  %v7343_v47 = vld [vmem:[%s9381_s0] sm:$0xff] }
 0x623   :  { %v6486_v13 = vpop.f32.mrb[20].mxu0 }
 0x624   :  { %v6472_v8 = vpop.f32.mrb[22].mxu1  ;;  %v2246_v24 = vmul.f32 %v6486_v13, %v2241_v37  ;;  %v2230_v35 = vpop.f32.mrb[21].mxu0 }
 0x625   :  { %v2052_v4 = vmul.f32 %v6472_v8, %v2047_v9  ;;  %v2036_v10 = vpop.f32.mrb[23].mxu1  ;;  %v2245_v46 = vmul.f32 %v2241_v37, %v2230_v35 }
 0x626   :  { %v2051_v34 = vmul.f32 %v2047_v9, %v2036_v10 }
 0x627   :  { %v2250_v56 = vadd.f32 %v2246_v24, %v2052_v4 }
 0x628   :  { %v2249_v27 = vadd.f32 %v2245_v46, %v2051_v34  ;;  %v7344_v46 = vld [vmem:[%s9381_s0 + $0x18] sm:$0xff] }
 0x62b   :  { %v6511_v16 = vpop.f32.mrb[22].mxu0 }
 0x62c   :  { %v6497_v5 = vpop.f32.mrb[24].mxu1  ;;  %v2609_v29 = vpop.f32.mrb[23].mxu0  ;;  %v2634_v45 = vmul.f32 %v6511_v16, %v2631_v57 }
 0x62d   :  { %v2439_v54 = vmul.f32 %v6497_v5, %v2436_v36  ;;  %v2414_v58 = vpop.f32.mrb[25].mxu1  ;;  %v2633_v62 = vmul.f32 %v2631_v57, %v2609_v29  ;;  %v8403_v17 = vpop.permute.xlu1 %2882  ;;  %v5970_v29 = vld [vmem:[%s9380_s6 + $0x20] sm:$0xff] }
 0x62e   :  { %v2438_v44 = vmul.f32 %v2436_v36, %v2414_v58  ;;  %9535 = vst [vmem:[#allocation2_spill] sm:$0xff] %v8403_v17 }
 0x62f   :  { %v2443_v20 = vadd.f32 %v2439_v54, %v2248_v63  ;;  %v5971_v54 = vld [vmem:[%s9380_s6 + $0x28] sm:$0xff] }
 0x630   :  { %v2442_v61 = vadd.f32 %v2438_v44, %v2247_v51  ;;  %v8412_v0 = vpop.permute.xlu0 %2877  ;;  %v6908_v44 = vpack.c.bf16 %v5971_v54, %v5970_v29 }
 0x631   :  { %v2638_v50 = vadd.f32 %v2634_v45, %v2443_v20  ;;  %9538 = vst [vmem:[#allocation24_spill] sm:$0xff] %v8412_v0  ;;  %v7346_v45 = vld [vmem:[%s9384_s2] sm:$0x3] }
 0x632   :  { %v2637_v41 = vadd.f32 %v2633_v62, %v2442_v61 }
 0x633   :  { %v6514_v22 = vpop.f32.mrb[24].mxu0 }
 0x634   :  { %v6500_v40 = vpop.f32.mrb[26].mxu1  ;;  %6523 = vmatprep.mubr.msk.f32.mxu1 %vm57_vm0, %v2637_v41  ;;  %v2619_v6 = vpop.f32.mrb[25].mxu0  ;;  %v2636_v38 = vmul.f32 %v6514_v22, %v2631_v57 }
 0x635   :  { %v2441_v7 = vmul.f32 %v6500_v40, %v2436_v36  ;;  %v2424_v31 = vpop.f32.mrb[27].mxu1  ;;  %6524 = vmatmul.mubr.msk.f32.vlgmr.msra.gmra.mrb[28].mxu1 %vm57_vm0, %v2638_v50  ;;  %v2635_v25 = vmul.f32 %v2631_v57, %v2619_v6 }
 0x636   :  { %v2440_v59 = vmul.f32 %v2436_v36, %v2424_v31  ;;  %6895 = vmatpush3.bf16.xpose.msk.msra.mxu1 %vm7449_vm1, %v8314_v52  ;;  %v5986_v52 = vld [vmem:[%s9386_s9 + $0x20] sm:$0xff] }
 0x637   :  { %v2445_v33 = vadd.f32 %v2441_v7, %v2250_v56  ;;  %6898 = vmatprep.subr.msk.bf16.mxu1 %vm7449_vm1, %v6896_v1  ;;  %v6923_v39 = vpack.c.bf16 %v5987_v11, %v5986_v52  ;;  %v5992_v52 = vld [vmem:[%s9387_s10 + $0x28] sm:$0xff]  ;;  %v5980_v11 = vld [vmem:[%s9383_s8 + $0x2] sm:$0x1] }
 0x638   :  { %v2444_v3 = vadd.f32 %v2440_v59, %v2249_v27  ;;  %v7345_v27 = vld [vmem:[%s9381_s0 + $0x10] sm:$0xff] }
 0x639   :  { %v2640_v19 = vadd.f32 %v2636_v38, %v2445_v33 }
 0x63a   :  { %v2639_v14 = vadd.f32 %v2635_v25, %v2444_v3 }
 0x63c   :  { %6526 = vmatprep.mubr.msk.f32.mxu1 %vm57_vm0, %v2639_v14  ;;  %v5991_v14 = vld [vmem:[%s9387_s10 + $0x20] sm:$0xff] }
 0x63d   :  { %6527 = vmatmul.mubr.msk.f32.gmra.mrb[30].mxu1 %vm57_vm0, %v2640_v19 }
 0x63e   :  { %6901 = vmatpush3.bf16.xpose.msk.msra.mxu1 %vm7449_vm1, %v6896_v1  ;;  %6537 = vmatprep.mubr.msk.f32.mxu1 %vm57_vm0, %v8359_v15 }
 0x63f   :  { %6922 = vmatprep.subr.bf16.mxu1 %v9504_v21 }
 0x641   :  { %v2902_v49 = vpop.permute.xlu1 %2901 }
 0x642   :  { %v8423_v53 = vmul.f32 %v7343_v47, %v2902_v49 }
 0x644   :  { %9540 = vst [vmem:[#allocation25_spill] sm:$0xff] %v8423_v53 }
 0x645   :  { %6538 = vmatmul.mubr.msk.f32.vlgmr.msra.gmra.mrb[28].mxu1 %vm57_vm0, %v8361_v42  ;;  %v2907_v28 = vpop.permute.xlu1 %2906 }
 0x646   :  { %6540 = vmatprep.mubr.msk.f32.mxu1 %vm57_vm0, %v8363_v32  ;;  %6925 = vmatpush3.bf16.xpose.msk.msra.mxu1 %vm7449_vm1, %v6923_v39  ;;  %v8417_v43 = vmul.f32 %v7342_v30, %v2907_v28  ;;  %v6927_v39 = vpack.c.bf16 %v5992_v52, %v5991_v14 }
 0x648   :  { %9539 = vst [vmem:[#allocation23_spill] sm:$0xff] %v8417_v43 }
 0x649   :  { %6541 = vmatmul.mubr.msk.f32.gmra.mrb[30].mxu1 %vm57_vm0, %v8365_v55  ;;  %v8405_v15 = vpop.permute.xlu1 %2887  ;;  %v5968_v55 = vld [vmem:[%s9391_s12] ss:$0 sm:$0xff] }
 0x64a   :  { %6579 = vmatprep.mubr.msk.f32.mxu1 %vm9506_vm2, %v9505_v23  ;;  %9536 = vst [vmem:[#allocation4_spill] sm:$0xff] %v8405_v15 }
 0x64d   :  { %v8407_v42 = vpop.permute.xlu1 %2892 }
 0x64e   :  { %9537 = vst [vmem:[#allocation3_spill] sm:$0xff] %v8407_v42 }
 0x651   :  { %v2912_v32 = vpop.permute.xlu1 %2911 }
 0x652   :  { %v8441_v16 = vmul.f32 %v7345_v27, %v2912_v32 }
 0x654   :  { %9544 = vst [vmem:[#allocation29_spill] sm:$0xff] %v8441_v16 }
 0x655   :  { %v2917_v63 = vpop.permute.xlu1 %2916 }
 0x656   :  { %v8435_v34 = vmul.f32 %v7344_v46, %v2917_v63 }
 0x658   :  { %9543 = vst [vmem:[#allocation28_spill] sm:$0xff] %v8435_v34 }
 0x718   :  { %v6539_v37 = vpop.f32.mrb[28].mxu1 }
 0x719   :  { %v2872_v60 = vadd.f32 %v6539_v37, %v5968_v55  ;;  %v2845_v9 = vpop.f32.mrb[29].mxu1 }
 0x71a   :  { %v2871_v26 = vadd.f32 %v5968_v55, %v2845_v9 }
 0x71b   :  { %v2896_v48 = vmul.f32 %v8403_v17, %v2872_v60  ;;  %v9552_v60 = vld [vmem:[#allocation6_spill] sm:$0xff] }
 0x71c   :  { %v2895_v51 = vmul.f32 %v8412_v0, %v2871_v26  ;;  %v6542_v13 = vpop.f32.mrb[30].mxu1 }
 0x71d   :  { %v8427_v8 = vadd.f32 %v8417_v43, %v2896_v48  ;;  %v2874_v24 = vadd.f32 %v6542_v13, %v5968_v55  ;;  %v2855_v35 = vpop.f32.mrb[31].mxu1 }
 0x71e   :  { %v8430_v4 = vadd.f32 %v8423_v53, %v2895_v51  ;;  %v2873_v10 = vadd.f32 %v5968_v55, %v2855_v35  ;;  %v9574_v53 = vld [vmem:[#allocation19_spill] sm:$0xff] }
 0x71f   :  { %9541 = vst [vmem:[#allocation26_spill] sm:$0xff] %v8427_v8  ;;  %v2898_v56 = vmul.f32 %v8407_v42, %v2874_v24 }
 0x720   :  { %9542 = vst [vmem:[#allocation27_spill] sm:$0xff] %v8430_v4  ;;  %v8445_v36 = vpack.c.bf16 %v8427_v8, %v8430_v4  ;;  %v2897_v5 = vmul.f32 %v8405_v15, %v2873_v10 }
 0x721   :  { %v8455_v58 = vadd.f32 %v8435_v34, %v2898_v56 }
 0x722   :  { %v8458_v57 = vadd.f32 %v8441_v16, %v2897_v5  ;;  %6904 = vmatpush3.bf16.msra.mxu0 %v8445_v36  ;;  %6931 = vmatprep.subr.bf16.mxu1 %v8445_v36  ;;  %v9572_v16 = vld [vmem:[#allocation18_spill] sm:$0xff] }
 0x723   :  { %9545 = vst [vmem:[#allocation30_spill] sm:$0xff] %v8455_v58  ;;  %6905 = vmatprep.subr.bf16.mxu0 %v9504_v21 }
 0x724   :  { %9546 = vst [vmem:[#allocation31_spill] sm:$0xff] %v8458_v57  ;;  %v8465_v20 = vpack.c.bf16 %v8455_v58, %v8458_v57 }
 0x726   :  { %6907 = vmatpush3.bf16.msra.mxu0 %v8465_v20 }
 0x727   :  { %6910 = vmatprep.subr.msk.bf16.mxu0 %vm7449_vm1, %v6908_v44 }
 0x729   :  { %6552 = vmatmul.mubr.msk.f32.vlgmr.msra.gmra.mrb[26].mxu0 %vm57_vm0, %v7346_v45 }
 0x72a   :  { %6558 = vmatprep.mubr.msk.f32.mxu0 %vm57_vm0, %v8430_v4 }
 0x72f   :  { %6913 = vmatpush3.bf16.xpose.msk.msra.mxu0 %vm7449_vm1, %v6908_v44  ;;  %v9553_v44 = vld [vmem:[#allocation14_spill] sm:$0xff] }
 0x730   :  { %6914 = vmatprep.subr.bf16.mxu0 %v9504_v21 }
 0x736   :  { %6559 = vmatmul.mubr.msk.f32.vlgmr.msra.gmra.mrb[28].mxu0 %vm57_vm0, %v8427_v8 }
 0x737   :  { %6561 = vmatprep.mubr.msk.f32.mxu0 %vm57_vm0, %v8458_v57 }
 0x73a   :  { %6562 = vmatmul.mubr.msk.f32.gmra.mrb[30].mxu0 %vm57_vm0, %v8455_v58 }
 0x73b   :  { %6572 = vmatprep.mubr.msk.f32.mxu0 %vm9506_vm2, %v9505_v23 }
 0x7fc   :  { %v8487_v61 = vpop.f32.mrb[26].mxu0 }
 0x7fd   :  { %6580 = vmatmul.mubr.msk.f32.vlgmr.msra.gmra.mrb[32].mxu1 %vm57_vm0, %v8487_v61  ;;  %v6553_v62 = vpop.f32.mrb[27].mxu0 }
 0x7fe   :  { %6933 = vmatpush3.bf16.msra.mxu1 %v8445_v36  ;;  %v9555_v62 = vld [vmem:[#allocation15_spill] sm:$0xff] }
 0x7ff   :  { %6935 = vmatprep.subr.bf16.mxu1 %v8465_v20 }
 0x802   :  { %6937 = vmatpush3.bf16.msra.mxu1 %v8465_v20 }
 0x803   :  { %6947 = vmatprep.subr.bf16.mxu1 %v8445_v36 }
 0x809   :  { %v6560_v18 = vpop.f32.mrb[28].mxu0 }
 0x80a   :  { %v3144_v50 = vmul.f32 %v6560_v18, %v5979_v12  ;;  %v3116_v41 = vpop.f32.mrb[29].mxu0 }
 0x80b   :  { %v3143_v22 = vmul.f32 %v5979_v12, %v3116_v41  ;;  %v6915_v1 = vpack.c.bf16 %v6560_v18, %v3116_v41 }
 0x80c   :  { %v3150_v40 = vsel %vm9547_vm9, %v3144_v50, 0.0  ;;  %vm9556_vm9 = vcmp.gt.f32.partialorder %v9555_v62, 0.0 }
 0x80d   :  { %3151 = vadd.xlane.f32.xlu0 %v3150_v40  ;;  %v6563_v6 = vpop.f32.mrb[30].mxu0  ;;  %6917 = vmatpush3.bf16.xpose.msk.msra.mxu0 %vm7508_vm4, %v6915_v1  ;;  %v3147_v31 = vsel %vm9549_vm15, %v3143_v22, 0.0 }
 0x80e   :  { %v3146_v59 = vmul.f32 %v6563_v6, %v5979_v12  ;;  %3148 = vadd.xlane.f32.xlu1 %v3147_v31  ;;  %v3126_v33 = vpop.f32.mrb[31].mxu0  ;;  %6918 = vmatprep.subr.bf16.mxu0 %v9504_v21 }
 0x80f   :  { %v3145_v38 = vmul.f32 %v5979_v12, %v3126_v33  ;;  %v6919_v3 = vpack.c.bf16 %v6563_v6, %v3126_v33 }
 0x810   :  { %v3156_v25 = vsel %vm9550_vm7, %v3146_v59, 0.0  ;;  %vm9554_vm7 = vcmp.gt.f32.partialorder %v9553_v44, 0.0 }
 0x811   :  { %v3153_v19 = vsel %vm9551_vm3, %v3145_v38, 0.0 }
 0x812   :  { %3157 = vadd.xlane.f32.xlu1 %v3156_v25  ;;  %3154 = vadd.xlane.f32.xlu0 %v3153_v19 }
 0x815   :  { %6921 = vmatpush3.bf16.xpose.msk.msra.mxu0 %vm7508_vm4, %v6919_v3 }
 0x816   :  { %6926 = vmatprep.subr.bf16.mxu0 %v9504_v21 }
 0x81c   :  { %6573 = vmatmul.mubr.msk.f32.vlgmr.msra.gmra.mrb[32].mxu0 %vm9551_vm3, %v5980_v11 }
 0x81d   :  { %6929 = vmatpush3.bf16.xpose.msk.msra.mxu0 %vm7449_vm1, %v6927_v39  ;;  %6586 = vmatprep.mubr.msk.f32.mxu0 %vm9506_vm2, %v9505_v23 }
 0x81e   :  { %6939 = vmatprep.subr.bf16.mxu0 %v8445_v36 }
 0x824   :  { %6587 = vmatmul.mubr.msk.f32.vlgmr.msra.gmra.mrb[34].mxu0 %vm57_vm0, %v8487_v61 }
 0x825   :  { %6941 = vmatpush3.bf16.msra.mxu0 %v8445_v36 }
 0x826   :  { %6943 = vmatprep.subr.bf16.mxu0 %v8465_v20 }
 0x829   :  { %6945 = vmatpush3.bf16.msra.mxu0 %v8465_v20 }
 0x82a   :  { %6955 = vmatprep.subr.bf16.mxu0 %v8445_v36 }
 0x89a   :  { %v3152_v32 = vpop.xlane.xlu0 %3151 }
 0x89b   :  { %v3149_v55 = vpop.xlane.xlu1 %3148 }
 0x89f   :  { %v3158_v30 = vpop.xlane.xlu1 %3157  ;;  %v3155_v48 = vpop.xlane.xlu0 %3154 }
 0x8d0   :  { %v8529_v49 = vpop.f32.mrb[32].mxu1 }
 0x8d1   :  { %v6581_v28 = vpop.f32.mrb[33].mxu1 }
 0x8ef   :  { %v3242_v37 = vpop.f32.mrb[32].mxu0 }
 0x8f0   :  { %v3249_v9 = vrot.slane %v3242_v37, %v9552_v60  ;;  %v6574_v26 = vpop.f32.mrb[33].mxu0 }
 0x8f2   :  { %v3250_v47 = vadd.f32 %v3249_v9, %v3149_v55  ;;  %v3251_v63 = vadd.f32 %v3249_v9, %v3152_v32  ;;  %v3252_v51 = vadd.f32 %v3249_v9, %v3155_v48  ;;  %v3253_v13 = vadd.f32 %v3249_v9, %v3158_v30  ;;  %v9564_v30 = vld [vmem:[#allocation11_spill] sm:$0xff] }
 0x8f3   :  { %vm9565_vm15 = vcmp.gt.f32.partialorder %v9564_v30, 0.0 }
 0x8f4   :  { %v3254_v24 = vmul.f32 0.01, %v3250_v47  ;;  %v3255_v35 = vmul.f32 0.01, %v3251_v63  ;;  %v3256_v10 = vmul.f32 0.01, %v3252_v51 }
 0x8f5   :  { %v3257_v46 = vmul.f32 0.01, %v3253_v13 }
 0x8f6   :  { %v3258_v56 = vmax.f32 %v3250_v47, %v3254_v24  ;;  %v3259_v27 = vmax.f32 %v3251_v63, %v3255_v35  ;;  %v3260_v5 = vmax.f32 %v3252_v51, %v3256_v10 }
 0x8f7   :  { %v3261_v29 = vmax.f32 %v3253_v13, %v3257_v46  ;;  %v3419_v54 = vpop.f32.mrb[34].mxu0  ;;  %v9568_v46 = vld [vmem:[#allocation9_spill] sm:$0xff] }
 0x8f8   :  { %v8534_v45 = vsel %vm9554_vm7, %v3258_v56, -1e+30  ;;  %v8538_v12 = vsel %vm9556_vm9, %v3259_v27, -1e+30  ;;  %v8542_v50 = vsel %vm601_vm14, %v3260_v5, -1e+30  ;;  %v8545_v41 = vmul.f32 %v3419_v54, %v8529_v49 }
 0x8f9   :  { %v8549_v1 = vsel %vm602_vm5, %v3261_v29, -1e+30  ;;  %v3499_v40 = vsel %vm57_vm0, %v8534_v45, -inf  ;;  %v3500_v6 = vsel %vm57_vm0, %v8538_v12, -inf  ;;  %v3501_v31 = vsel %vm57_vm0, %v8542_v50, -inf  ;;  %v6588_v59 = vpop.f32.mrb[35].mxu0 }
 0x8fa   :  { %9558 = vst [vmem:[#allocation5_spill] sm:$0xff] %v8545_v41  ;;  %v3502_v33 = vsel %vm57_vm0, %v8549_v1, -inf  ;;  %v3503_v38 = vmax.f32 %v3499_v40, %v3500_v6  ;;  %v8561_v25 = vsel %vm802_vm13, %v3258_v56, -1e+30  ;;  %v8565_v14 = vsel %vm803_vm12, %v3259_v27, -1e+30 }
 0x8fb   :  { %v3504_v52 = vmax.f32 %v3501_v31, %v3502_v33  ;;  %v8569_v39 = vsel %vm804_vm8, %v3260_v5, -1e+30  ;;  %v8573_v32 = vsel %vm805_vm6, %v3261_v29, -1e+30  ;;  %v3693_v55 = vsel %vm57_vm0, %v8561_v25, -inf }
 0x8fc   :  { %v3694_v37 = vsel %vm57_vm0, %v8565_v14, -inf  ;;  %v3695_v9 = vsel %vm57_vm0, %v8569_v39, -inf  ;;  %v3696_v26 = vsel %vm57_vm0, %v8573_v32, -inf  ;;  %v8585_v48 = vsel %vm9565_vm15, %v3258_v56, -1e+30 }
 0x8fd   :  { %v3505_v47 = vmax.f32 %v3503_v38, %v3504_v52  ;;  %v3697_v63 = vmax.f32 %v3693_v55, %v3694_v37  ;;  %v3698_v51 = vmax.f32 %v3695_v9, %v3696_v26  ;;  %v8589_v24 = vsel %vm1006_vm10, %v3259_v27, -1e+30  ;;  %v9570_v9 = vld [vmem:[#allocation17_spill] sm:$0xff] }
 0x8fe   :  { %v8593_v10 = vsel %vm1007_vm11, %v3260_v5, -1e+30  ;;  %vm9569_vm3 = vcmp.gt.f32.partialorder %v9568_v46, 0.0  ;;  %v3887_v6 = vsel %vm57_vm0, %v8585_v48, -inf  ;;  %v3888_v31 = vsel %vm57_vm0, %v8589_v24, -inf }
 0x8ff   :  { %v8597_v40 = vsel %vm9569_vm3, %v3261_v29, -1e+30  ;;  %v3506_v59 = vrot.slane %v3505_v47, 4  ;;  %v3699_v33 = vmax.f32 %v3697_v63, %v3698_v51  ;;  %v3889_v38 = vsel %vm57_vm0, %v8593_v10, -inf  ;;  %v9576_v51 = vld [vmem:[#allocation10_spill] sm:$0xff] }
 0x900   :  { %v3890_v52 = vsel %vm57_vm0, %v8597_v40, -inf  ;;  %v3891_v55 = vmax.f32 %v3887_v6, %v3888_v31  ;;  %vm9571_vm7 = vcmp.gt.f32.partialorder %v9570_v9, 0.0  ;;  %vm9573_vm9 = vcmp.gt.f32.partialorder %v9572_v16, 0.0 }
 0x901   :  { %v3892_v37 = vmax.f32 %v3889_v38, %v3890_v52  ;;  %v8609_v26 = vsel %vm9571_vm7, %v3258_v56, -1e+30  ;;  %v8613_v34 = vsel %vm9573_vm9, %v3259_v27, -1e+30  ;;  %v3507_v15 = vmax.f32 %v3505_v47, %v3506_v59 }
 0x902   :  { %v3700_v42 = vrot.slane %v3699_v33, 4  ;;  %vm9575_vm15 = vcmp.gt.f32.partialorder %v9574_v53, 0.0  ;;  %vm9577_vm3 = vcmp.gt.f32.partialorder %v9576_v51, 0.0  ;;  %v4082_v31 = vsel %vm57_vm0, %v8609_v26, -inf }
 0x903   :  { %v8617_v63 = vsel %vm9575_vm15, %v3260_v5, -1e+30  ;;  %v8621_v43 = vsel %vm9577_vm3, %v3261_v29, -1e+30  ;;  %v3893_v6 = vmax.f32 %v3891_v55, %v3892_v37  ;;  %v4083_v56 = vsel %vm57_vm0, %v8613_v34, -inf }
 0x904   :  { %v4084_v27 = vsel %vm57_vm0, %v8617_v63, -inf  ;;  %v3508_v47 = vrot.slane %v3507_v15, 2  ;;  %v3701_v59 = vmax.f32 %v3699_v33, %v3700_v42  ;;  %v4085_v5 = vsel %vm57_vm0, %v8621_v43, -inf }
 0x905   :  { %v4086_v38 = vmax.f32 %v4082_v31, %v4083_v56  ;;  %v3894_v52 = vrot.slane %v3893_v6, 4  ;;  %v4087_v0 = vmax.f32 %v4084_v27, %v4085_v5  ;;  %v3429_v29 = vrot.slane %v3419_v54, 7 }
 0x906   :  { %v3460_v17 = vrot.slane %v3419_v54, 1  ;;  %v3509_v55 = vmax.f32 %v3507_v15, %v3508_v47  ;;  %v3702_v37 = vrot.slane %v3701_v59, 2 }
 0x907   :  { %v3895_v41 = vmax.f32 %v3893_v6, %v3894_v52  ;;  %v4088_v51 = vmax.f32 %v4086_v38, %v4087_v0  ;;  %v8635_v16 = vmul.f32 %v3429_v29, %v8529_v49 }
 0x908   :  { %v8632_v53 = vmul.f32 %v3460_v17, %v8529_v49  ;;  %v3510_v9 = vrot.slane %v3509_v55, 1  ;;  %v3703_v42 = vmax.f32 %v3701_v59, %v3702_v37 }
 0x909   :  { %9579 = vst [vmem:[#allocation14_spill] sm:$0xff] %v8635_v16  ;;  %v3896_v33 = vrot.slane %v3895_v41, 2  ;;  %v4089_v46 = vrot.slane %v4088_v51, 4  ;;  %v8788_v16 = vld [vmem:[%s9385_s1 + $0x78] sm:$0xff] }
 0x90a   :  { %9578 = vst [vmem:[#allocation6_spill] sm:$0xff] %v8632_v53  ;;  %v3511_v35 = vmax.f32 %v3509_v55, %v3510_v9  ;;  %v3704_v31 = vrot.slane %v3703_v42, 1  ;;  %9593 = vst [vmem:[#allocation36_spill] sm:$0xff] %v8788_v16 }
 0x90b   :  { %v3897_v56 = vmax.f32 %v3895_v41, %v3896_v33  ;;  %v4090_v27 = vmax.f32 %v4088_v51, %v4089_v46 }
 0x90c   :  { %v3513_v54 = vsub.f32 %v8538_v12, %v3511_v35  ;;  %v3514_v15 = vsub.f32 %v8542_v50, %v3511_v35  ;;  %v3515_v0 = vsub.f32 %v8549_v1, %v3511_v35  ;;  %v3705_v6 = vmax.f32 %v3703_v42, %v3704_v31 }
 0x90d   :  { %v3898_v17 = vrot.slane %v3897_v56, 1  ;;  %v4091_v47 = vrot.slane %v4090_v27, 2  ;;  %v3512_v41 = vsub.f32 %v8534_v45, %v3511_v35 }
 0x90e   :  { %v3518_v5 = vmul.f32 1.442695, %v3513_v54  ;;  %v3520_v49 = vmul.f32 1.442695, %v3514_v15  ;;  %v3522_v38 = vmul.f32 1.442695, %v3515_v0  ;;  %v3707_v59 = vsub.f32 %v8565_v14, %v3705_v6 }
 0x90f   :  { %v3708_v52 = vsub.f32 %v8569_v39, %v3705_v6  ;;  %v3709_v9 = vsub.f32 %v8573_v32, %v3705_v6  ;;  %v3899_v12 = vmax.f32 %v3897_v56, %v3898_v17  ;;  %v4092_v46 = vmax.f32 %v4090_v27, %v4091_v47 }
 0x910   :  { %7198 = vpow2.f32 %v3518_v5  ;;  %v3712_v50 = vmul.f32 1.442695, %v3707_v59  ;;  %v3516_v31 = vmul.f32 1.442695, %v3512_v41  ;;  %v3706_v56 = vsub.f32 %v8561_v25, %v3705_v6  ;;  %v8664_v59 = vld [vmem:[%s9385_s1 + $0x8] sm:$0xff] }
 0x911   :  { %7200 = vpow2.f32 %v3520_v49  ;;  %v3714_v1 = vmul.f32 1.442695, %v3708_v52  ;;  %v3716_v51 = vmul.f32 1.442695, %v3709_v9  ;;  %v3900_v29 = vsub.f32 %v8585_v48, %v3899_v12  ;;  %v8656_v49 = vld [vmem:[%s9385_s1 + $0x48] sm:$0xff]  ;;  %9581 = vst [vmem:[#allocation16_spill] sm:$0xff] %v8664_v59 }
 0x912   :  { %7202 = vpow2.f32 %v3522_v38  ;;  %v3901_v55 = vsub.f32 %v8589_v24, %v3899_v12  ;;  %v3902_v14 = vsub.f32 %v8593_v10, %v3899_v12  ;;  %v3903_v39 = vsub.f32 %v8597_v40, %v3899_v12  ;;  %9580 = vst [vmem:[#allocation15_spill] sm:$0xff] %v8656_v49 }
 0x913   :  { %7204 = vpow2.f32 %v3712_v50  ;;  %v4093_v32 = vrot.slane %v4092_v46, 1  ;;  %v3904_v37 = vmul.f32 1.442695, %v3900_v29  ;;  %v3710_v25 = vmul.f32 1.442695, %v3706_v56  ;;  %v8718_v56 = vld [vmem:[%s9385_s1 + $0x68] sm:$0xff] }
 0x914   :  { %7206 = vpow2.f32 %v3714_v1  ;;  %v3906_v45 = vmul.f32 1.442695, %v3901_v55  ;;  %v3908_v35 = vmul.f32 1.442695, %v3902_v14  ;;  %v3910_v42 = vmul.f32 1.442695, %v3903_v39 }
 0x915   :  { %7208 = vpow2.f32 %v3716_v51  ;;  %v4094_v33 = vmax.f32 %v4092_v46, %v4093_v32  ;;  %v8672_v46 = vld [vmem:[%s9385_s1 + $0x40] sm:$0xff]  ;;  %v8680_v1 = vld [vmem:[%s9385_s1 + $0x50] sm:$0xff]  ;;  %9587 = vst [vmem:[#allocation11_spill] sm:$0xff] %v8718_v56 }
 0x916   :  { %7210 = vpow2.f32 %v3906_v45  ;;  %9582 = vst [vmem:[#allocation7_spill] sm:$0xff] %v8672_v46  ;;  %9583 = vst [vmem:[#allocation20_spill] sm:$0xff] %v8680_v1  ;;  %v8690_v55 = vld [vmem:[%s9385_s1 + $0x10] sm:$0xff]  ;;  %v8698_v32 = vld [vmem:[%s9385_s1] sm:$0xff] }
 0x917   :  { %7212 = vpow2.f32 %v3908_v35  ;;  %v4096_v48 = vsub.f32 %v8613_v34, %v4094_v33  ;;  %v4097_v24 = vsub.f32 %v8617_v63, %v4094_v33  ;;  %v4098_v10 = vsub.f32 %v8621_v43, %v4094_v33  ;;  %9584 = vst [vmem:[#allocation21_spill] sm:$0xff] %v8690_v55  ;;  %9585 = vst [vmem:[#allocation22_spill] sm:$0xff] %v8698_v32 }
 0x918   :  { %7214 = vpow2.f32 %v3910_v42  ;;  %v4095_v40 = vsub.f32 %v8609_v26, %v4094_v33  ;;  %v8708_v42 = vld [vmem:[%s9385_s1 + $0x58] sm:$0xff] }
 0x919   :  { %v4101_v27 = vmul.f32 1.442695, %v4096_v48  ;;  %v4103_v54 = vmul.f32 1.442695, %v4097_v24  ;;  %v4105_v15 = vmul.f32 1.442695, %v4098_v10  ;;  %7216 = vpow2.f32 %v3904_v37 }
 0x91a   :  { %v7199_v0 = vpop.eup %7198  ;;  %7218 = vpow2.f32 %v3516_v31  ;;  %v4099_v17 = vmul.f32 1.442695, %v4095_v40  ;;  %9586 = vst [vmem:[#allocation8_spill] sm:$0xff] %v8708_v42  ;;  %v8726_v24 = vld [vmem:[%s9385_s1 + $0x28] sm:$0xff] }
 0x91b   :  { %v7201_v47 = vpop.eup %7200  ;;  %7220 = vpow2.f32 %v4101_v27  ;;  %v8667_v52 = vmul.f32 %v8664_v59, %v7199_v0 }
 0x91c   :  { %v7203_v6 = vpop.eup %7202  ;;  %7222 = vpow2.f32 %v4103_v54  ;;  %v8693_v14 = vmul.f32 %v8690_v55, %v7201_v47  ;;  %v8734_v54 = vld [vmem:[%s9385_s1 + $0x18] sm:$0xff] }
 0x91d   :  { %v7205_v34 = vpop.eup %7204  ;;  %7224 = vpow2.f32 %v4105_v15  ;;  %v3529_v35 = vsel %vm57_vm0, %v8667_v52, 0.0  ;;  %9588 = vst [vmem:[#allocation12_spill] sm:$0xff] %v8734_v54  ;;  %v8737_v15 = vmul.f32 %v8734_v54, %v7203_v6 }
 0x91e   :  { %v7207_v63 = vpop.eup %7206  ;;  %7226 = vpow2.f32 %v4099_v17  ;;  %v8729_v10 = vmul.f32 %v8726_v24, %v7205_v34  ;;  %v3531_v34 = vsel %vm57_vm0, %v8693_v14, 0.0 }
 0x91f   :  { %v7209_v43 = vpop.eup %7208  ;;  %7228 = vpow2.f32 %v3710_v25 }
 0x920   :  { %v7211_v5 = vpop.eup %7210 }
 0x921   :  { %v7213_v26 = vpop.eup %7212  ;;  %v8659_v38 = vmul.f32 %v8656_v49, %v7211_v5  ;;  %v8748_v5 = vld [vmem:[%s9385_s1 + $0x30] sm:$0xff] }
 0x922   :  { %v7215_v9 = vpop.eup %7214  ;;  %v8683_v51 = vmul.f32 %v8680_v1, %v7213_v26  ;;  %9589 = vst [vmem:[#allocation32_spill] sm:$0xff] %v8748_v5  ;;  %v8751_v26 = vmul.f32 %v8748_v5, %v7207_v63 }
 0x923   :  { %v7217_v41 = vpop.eup %7216  ;;  %v3917_v29 = vsel %vm57_vm0, %v8659_v38, 0.0  ;;  %v8711_v33 = vmul.f32 %v8708_v42, %v7215_v9 }
 0x924   :  { %v7219_v12 = vpop.eup %7218  ;;  %v8675_v50 = vmul.f32 %v8672_v46, %v7217_v41  ;;  %v3919_v47 = vsel %vm57_vm0, %v8683_v51, 0.0  ;;  %v8756_v41 = vld [vmem:[%s9385_s1 + $0x60] sm:$0xff] }
 0x925   :  { %v7221_v39 = vpop.eup %7220  ;;  %v8701_v45 = vmul.f32 %v8698_v32, %v7219_v12  ;;  %9590 = vst [vmem:[#allocation33_spill] sm:$0xff] %v8756_v41 }
 0x926   :  { %v7223_v37 = vpop.eup %7222  ;;  %v3916_v31 = vsel %vm57_vm0, %v8675_v50, 0.0  ;;  %v8721_v48 = vmul.f32 %v8718_v56, %v7221_v39 }
 0x927   :  { %v7225_v40 = vpop.eup %7224  ;;  %v3918_v27 = vadd.f32 %v3917_v29, %v3916_v31  ;;  %v3528_v0 = vsel %vm57_vm0, %v8701_v45, 0.0  ;;  %v8764_v29 = vld [vmem:[%s9385_s1 + $0x70] sm:$0xff] }
 0x928   :  { %v7227_v17 = vpop.eup %7226  ;;  %v3530_v25 = vadd.f32 %v3529_v35, %v3528_v0  ;;  %9591 = vst [vmem:[#allocation34_spill] sm:$0xff] %v8764_v29  ;;  %v8767_v39 = vmul.f32 %v8764_v29, %v7223_v37  ;;  %v4112_v63 = vsel %vm57_vm0, %v8721_v48, 0.0  ;;  %v3921_v35 = vsel %vm57_vm0, %v8711_v33, 0.0 }
 0x929   :  { %v7229_v6 = vpop.eup %7228  ;;  %v3920_v9 = vadd.f32 %v3919_v47, %v3918_v27  ;;  %v8759_v12 = vmul.f32 %v8756_v41, %v7227_v17  ;;  %v8776_v27 = vld [vmem:[%s9385_s1 + $0x20] sm:$0xff]  ;;  %v3723_v17 = vsel %vm57_vm0, %v8729_v10, 0.0  ;;  %v3533_v47 = vsel %vm57_vm0, %v8737_v15, 0.0 }
 0x92a   :  { %v3532_v31 = vadd.f32 %v3531_v34, %v3530_v25  ;;  %9592 = vst [vmem:[#allocation35_spill] sm:$0xff] %v8776_v27  ;;  %v8779_v0 = vmul.f32 %v8776_v27, %v7229_v6  ;;  %v8791_v25 = vmul.f32 %v8788_v16, %v7225_v40  ;;  %v4114_v40 = vsel %vm57_vm0, %v8767_v39, 0.0 }
 0x92b   :  { %v3922_v37 = vadd.f32 %v3921_v35, %v3920_v9  ;;  %v4111_v34 = vsel %vm57_vm0, %v8759_v12, 0.0  ;;  %v8798_v9 = vld [vmem:[%s9385_s1 + $0x38] sm:$0xff] }
 0x92c   :  { %v3534_v6 = vadd.f32 %v3533_v47, %v3532_v31  ;;  %v4113_v53 = vadd.f32 %v4112_v63, %v4111_v34  ;;  %9594 = vst [vmem:[#allocation37_spill] sm:$0xff] %v8798_v9  ;;  %v8801_v35 = vmul.f32 %v8798_v9, %v7209_v43  ;;  %v3722_v42 = vsel %vm57_vm0, %v8779_v0, 0.0 }
 0x92d   :  { %v3923_v1 = vrot.slane %v3922_v37, 4  ;;  %v3724_v16 = vadd.f32 %v3723_v17, %v3722_v42  ;;  %v3725_v63 = vsel %vm57_vm0, %v8751_v26, 0.0  ;;  %v4116_v47 = vsel %vm57_vm0, %v8791_v25, 0.0 }
 0x92e   :  { %v3535_v46 = vrot.slane %v3534_v6, 4  ;;  %v4115_v29 = vadd.f32 %v4114_v40, %v4113_v53  ;;  %v3727_v54 = vsel %vm57_vm0, %v8801_v35, 0.0 }
 0x92f   :  { %v3924_v31 = vadd.f32 %v3923_v1, %v3922_v37  ;;  %v3726_v34 = vadd.f32 %v3725_v63, %v3724_v16 }
 0x930   :  { %v3536_v43 = vadd.f32 %v3535_v46, %v3534_v6  ;;  %v4117_v41 = vadd.f32 %v4116_v47, %v4115_v29 }
 0x931   :  { %v3925_v49 = vrot.slane %v3924_v31, 2  ;;  %v3728_v56 = vadd.f32 %v3727_v54, %v3726_v34 }
 0x932   :  { %v3537_v32 = vrot.slane %v3536_v43, 2  ;;  %v4118_v9 = vrot.slane %v4117_v41, 4 }
 0x933   :  { %v3926_v42 = vadd.f32 %v3925_v49, %v3924_v31  ;;  %v3729_v17 = vrot.slane %v3728_v56, 4 }
 0x934   :  { %v3538_v53 = vadd.f32 %v3537_v32, %v3536_v43  ;;  %v4119_v40 = vadd.f32 %v4118_v9, %v4117_v41 }
 0x935   :  { %v3927_v5 = vrot.slane %v3926_v42, 1  ;;  %v3730_v27 = vadd.f32 %v3729_v17, %v3728_v56 }
 0x936   :  { %v3539_v1 = vrot.slane %v3538_v53, 1  ;;  %v4120_v37 = vrot.slane %v4119_v40, 2 }
 0x937   :  { %v3928_v55 = vadd.f32 %v3927_v5, %v3926_v42  ;;  %v3731_v59 = vrot.slane %v3730_v27, 2 }
 0x938   :  { %v3540_v16 = vadd.f32 %v3539_v1, %v3538_v53  ;;  %v4121_v46 = vadd.f32 %v4120_v37, %v4119_v40 }
 0x939   :  { %vm3929_vm7 = vcmp.le.f32.partialorder %v3928_v55, 0.0  ;;  %v3732_v29 = vadd.f32 %v3731_v59, %v3730_v27 }
 0x93a   :  { %v3930_v6 = vsel %vm3929_vm7, 1.0, %v3928_v55  ;;  %vm3541_vm9 = vcmp.le.f32.partialorder %v3540_v16, 0.0  ;;  %v4122_v63 = vrot.slane %v4121_v46, 1 }
 0x93b   :  { %7230 = vrcp.f32 %v3930_v6  ;;  %v3542_v54 = vsel %vm3541_vm9, 1.0, %v3540_v16  ;;  %v3733_v49 = vrot.slane %v3732_v29, 1  ;;  %v6032_v6 = vld [vmem:[%s9386_s9 + $0x30] sm:$0xff] }
 0x93c   :  { %7232 = vrcp.f32 %v3542_v54  ;;  %v4123_v31 = vadd.f32 %v4122_v63, %v4121_v46  ;;  %v6033_v54 = vld [vmem:[%s9386_s9 + $0x38] sm:$0xff] }
 0x93d   :  { %v3734_v32 = vadd.f32 %v3733_v49, %v3732_v29  ;;  %v6977_v63 = vpack.c.bf16 %v6033_v54, %v6032_v6  ;;  %v6037_v49 = vld [vmem:[%s9387_s10 + $0x30] sm:$0xff] }
 0x93e   :  { %vm4124_vm15 = vcmp.le.f32.partialorder %v4123_v31, 0.0 }
 0x93f   :  { %vm3735_vm3 = vcmp.le.f32.partialorder %v3734_v32, 0.0  ;;  %v4125_v9 = vsel %vm4124_vm15, 1.0, %v4123_v31  ;;  %v6038_v31 = vld [vmem:[%s9387_s10 + $0x38] sm:$0xff] }
 0x940   :  { %v3736_v34 = vsel %vm3735_vm3, 1.0, %v3734_v32  ;;  %7234 = vrcp.f32 %v4125_v9  ;;  %v6981_v32 = vpack.c.bf16 %v6038_v31, %v6037_v49 }
 0x941   :  { %7236 = vrcp.f32 %v3736_v34 }
 0x945   :  { %v7231_v56 = vpop.eup %7230 }
 0x946   :  { %v7233_v41 = vpop.eup %7232  ;;  %v3932_v5 = vmul.f32 %v7231_v56, %v8675_v50  ;;  %v3933_v59 = vmul.f32 %v7231_v56, %v8659_v38  ;;  %v3934_v27 = vmul.f32 %v7231_v56, %v8683_v51  ;;  %v3935_v50 = vmul.f32 %v7231_v56, %v8711_v33 }
 0x947   :  { %v3544_v47 = vmul.f32 %v7233_v41, %v8701_v45  ;;  %v3545_v55 = vmul.f32 %v7233_v41, %v8667_v52  ;;  %v3546_v43 = vmul.f32 %v7233_v41, %v8693_v14  ;;  %v3547_v42 = vmul.f32 %v7233_v41, %v8737_v15 }
 0x948   :  { %3936 = vxpose.xlu1.b32.start [1/4] (short) (narrow) %v3932_v5, 32 }
 0x949   :  { %3548 = vxpose.xlu0.b32.start [1/4] (short) (narrow) %v3544_v47, 32 }
 0x94a   :  { %v7235_v45 = vpop.eup %7234 }
 0x94b   :  { %v7237_v17 = vpop.eup %7236  ;;  %v4127_v38 = vmul.f32 %v7235_v45, %v8759_v12  ;;  %v4128_v51 = vmul.f32 %v7235_v45, %v8721_v48  ;;  %v4129_v33 = vmul.f32 %v7235_v45, %v8767_v39  ;;  %v4130_v15 = vmul.f32 %v7235_v45, %v8791_v25 }
 0x94c   :  { %3937 = vxpose.xlu1.b32.cont [2/4] (short) (narrow) %v3933_v59, 32  ;;  %v3738_v52 = vmul.f32 %v7237_v17, %v8779_v0  ;;  %v3739_v14 = vmul.f32 %v7237_v17, %v8729_v10  ;;  %v3740_v53 = vmul.f32 %v7237_v17, %v8751_v26  ;;  %v3741_v12 = vmul.f32 %v7237_v17, %v8801_v35  ;;  %v6016_v10 = vld [vmem:[%s9380_s6 + $0x30] sm:$0xff]  ;;  %v6017_v26 = vld [vmem:[%s9380_s6 + $0x38] sm:$0xff] }
 0x94d   :  { %3549 = vxpose.xlu0.b32.cont [2/4] (short) (narrow) %v3545_v55, 32  ;;  %v6962_v25 = vpack.c.bf16 %v6017_v26, %v6016_v10 }
 0x950   :  { %3938 = vxpose.xlu1.b32.cont [3/4] (short) (narrow) %v3934_v27, 32 }
 0x951   :  { %3550 = vxpose.xlu0.b32.cont [3/4] (short) (narrow) %v3546_v43, 32 }
 0x954   :  { %3939 = vxpose.xlu1.b32.end [4/4] (short) (narrow) %v3935_v50, 32 }
 0x955   :  { %3551 = vxpose.xlu0.b32.end [4/4] (short) (narrow) %v3547_v42, 32 }
 0x958   :  { %4131 = vxpose.xlu1.b32.start [1/4] (short) (narrow) %v4127_v38, 32 }
 0x959   :  { %3742 = vxpose.xlu0.b32.start [1/4] (short) (narrow) %v3738_v52, 32 }
 0x95c   :  { %4132 = vxpose.xlu1.b32.cont [2/4] (short) (narrow) %v4128_v51, 32 }
 0x95d   :  { %3743 = vxpose.xlu0.b32.cont [2/4] (short) (narrow) %v3739_v14, 32 }
 0x960   :  { %4133 = vxpose.xlu1.b32.cont [3/4] (short) (narrow) %v4129_v33, 32 }
 0x961   :  { %3744 = vxpose.xlu0.b32.cont [3/4] (short) (narrow) %v3740_v53, 32 }
 0x964   :  { %4134 = vxpose.xlu1.b32.end [4/4] (short) (narrow) %v4130_v15, 32 }
 0x965   :  { %3745 = vxpose.xlu0.b32.end [4/4] (short) (narrow) %v3741_v12, 32 }
 0x9c8   :  { %v3952_v40 = vpop.trf.xlu1 }
 0x9c9   :  { %v3564_v0 = vpop.trf.xlu0 }
 0x9ca   :  { %6597 = vmatprep.mubr.msk.f32.mxu1 %vm57_vm0, %v3564_v0 }
 0x9cc   :  { %v3953_v39 = vpop.trf.xlu1 }
 0x9cd   :  { %v3565_v48 = vpop.trf.xlu0 }
 0x9ce   :  { %6598 = vmatmul.mubr.msk.f32.vlgmr.msra.gmra.mrb[34].mxu1 %vm57_vm0, %v3565_v48 }
 0x9cf   :  { %6949 = vmatpush3.bf16.msra.mxu1 %v8445_v36 }
 0x9d0   :  { %6951 = vmatprep.subr.bf16.mxu1 %v8465_v20  ;;  %v3954_v37 = vpop.trf.xlu1 }
 0x9d1   :  { %v3566_v35 = vpop.trf.xlu0 }
 0x9d2   :  { %6600 = vmatprep.mubr.msk.f32.mxu1 %vm57_vm0, %v3566_v35 }
 0x9d3   :  { %6953 = vmatpush3.bf16.msra.mxu1 %v8465_v20 }
 0x9d4   :  { %6964 = vmatprep.subr.msk.bf16.mxu1 %vm7449_vm1, %v6962_v25  ;;  %v3955_v46 = vpop.trf.xlu1 }
 0x9d5   :  { %v3567_v1 = vpop.trf.xlu0 }
 0x9d6   :  { %6601 = vmatmul.mubr.msk.f32.gmra.mrb[36].mxu1 %vm57_vm0, %v3567_v1 }
 0x9d7   :  { %6625 = vmatprep.mubr.msk.f32.mxu1 %vm57_vm0, %v3952_v40 }
 0x9d8   :  { %v4147_v41 = vpop.trf.xlu1 }
 0x9d9   :  { %v3758_v16 = vpop.trf.xlu0 }
 0x9da   :  { %6626 = vmatmul.mubr.msk.f32.vlgmr.msra.gmra.mrb[38].mxu1 %vm57_vm0, %v3953_v39  ;;  %6611 = vmatprep.mubr.msk.f32.mxu0 %vm57_vm0, %v3758_v16 }
 0x9db   :  { %6628 = vmatprep.mubr.msk.f32.mxu1 %vm57_vm0, %v3954_v37 }
 0x9dc   :  { %6967 = vmatpush3.bf16.xpose.msk.msra.mxu1 %vm7449_vm1, %v6962_v25  ;;  %v4148_v9 = vpop.trf.xlu1 }
 0x9dd   :  { %v3759_v29 = vpop.trf.xlu0  ;;  %6976 = vmatprep.subr.bf16.mxu1 %v9504_v21 }
 0x9de   :  { %6612 = vmatmul.mubr.msk.f32.vlgmr.msra.gmra.mrb[36].mxu0 %vm57_vm0, %v3759_v29  ;;  %6629 = vmatmul.mubr.msk.f32.gmra.mrb[40].mxu1 %vm57_vm0, %v3955_v46 }
 0x9df   :  { %6957 = vmatpush3.bf16.msra.mxu0 %v8445_v36  ;;  %6649 = vmatprep.mubr.msk.f32.mxu1 %vm57_vm0, %v8430_v4 }
 0x9e0   :  { %6959 = vmatprep.subr.bf16.mxu0 %v8465_v20 }
 0x9e1   :  { %v3760_v56 = vpop.trf.xlu0 }
 0x9e2   :  { %6614 = vmatprep.mubr.msk.f32.mxu0 %vm57_vm0, %v3760_v56 }
 0x9e3   :  { %6961 = vmatpush3.bf16.msra.mxu0 %v8465_v20  ;;  %6650 = vmatmul.mubr.msk.f32.vlgmr.msra.gmra.mrb[42].mxu1 %vm57_vm0, %v8427_v8 }
 0x9e4   :  { %6652 = vmatprep.mubr.msk.f32.mxu1 %vm57_vm0, %v8458_v57  ;;  %6979 = vmatpush3.bf16.xpose.msk.msra.mxu1 %vm7449_vm1, %v6977_v63 }
 0x9e5   :  { %6980 = vmatprep.subr.bf16.mxu1 %v9504_v21  ;;  %6968 = vmatprep.subr.bf16.mxu0 %v9504_v21  ;;  %v3761_v5 = vpop.trf.xlu0 }
 0x9e6   :  { %6615 = vmatmul.mubr.msk.f32.gmra.mrb[38].mxu0 %vm57_vm0, %v3761_v5 }
 0x9e7   :  { %6653 = vmatmul.mubr.msk.f32.gmra.mrb[44].mxu1 %vm57_vm0, %v8455_v58  ;;  %6639 = vmatprep.mubr.msk.f32.mxu0 %vm57_vm0, %v4147_v41 }
 0x9e8   :  { %6670 = vmatprep.mubr.msk.f32.mxu1 %vm9506_vm2, %v9505_v23 }
 0x9ea   :  { %6640 = vmatmul.mubr.msk.f32.vlgmr.msra.gmra.mrb[40].mxu0 %vm57_vm0, %v4148_v9 }
 0x9eb   :  { %6671 = vmatmul.mubr.msk.f32.vlgmr.msra.gmra.mrb[46].mxu1 %vm57_vm0, %v8487_v61 }
 0x9ec   :  { %6983 = vmatpush3.bf16.xpose.msk.msra.mxu1 %vm7449_vm1, %v6981_v32  ;;  %6677 = vmatprep.mubr.msk.f32.mxu1 %vm9506_vm2, %v9505_v23 }
 0x9ed   :  { %6993 = vmatprep.subr.bf16.mxu1 %v8445_v36 }
 0x9f3   :  { %6678 = vmatmul.mubr.msk.f32.vlgmr.msra.gmra.mrb[48].mxu1 %vm57_vm0, %v8487_v61  ;;  %v4149_v61 = vpop.trf.xlu1 }
 0x9f4   :  { %6995 = vmatpush3.bf16.msra.mxu1 %v8445_v36  ;;  %6642 = vmatprep.mubr.msk.f32.mxu0 %vm57_vm0, %v4149_v61 }
 0x9f5   :  { %6997 = vmatprep.subr.bf16.mxu1 %v8465_v20 }
 0x9f7   :  { %v4150_v47 = vpop.trf.xlu1 }
 0x9f8   :  { %6999 = vmatpush3.bf16.msra.mxu1 %v8465_v20  ;;  %6643 = vmatmul.mubr.msk.f32.gmra.mrb[42].mxu0 %vm57_vm0, %v4150_v47 }
 0x9f9   :  { %7009 = vmatprep.subr.bf16.mxu1 %v8445_v36  ;;  %6663 = vmatprep.mubr.msk.f32.mxu0 %vm9506_vm2, %v9505_v23  ;;  %v6025_v23 = vld [vmem:[%s9382_s7 + $0x3] ss:$0 sm:$0xff]  ;;  %vm9595_vm2 = vcmask 130048  }
 0x9fa   :  { %vm9596_vm7 = vmmov %vm9595_vm2 }
 0x9fb   :  { %vm9597_vm9 = vmmov %vm9595_vm2 }
 0x9fc   :  { %vm9598_vm15 = vmmov %vm9595_vm2 }
 0x9fd   :  { %vm9599_vm3 = vmmov %vm9595_vm2 }
 0xaa1   :  { %v8903_v34 = vpop.f32.mrb[34].mxu1 }
 0xaa2   :  { %v8905_v59 = vpop.f32.mrb[35].mxu1 }
 0xaa9   :  { %v8907_v55 = vpop.f32.mrb[36].mxu1 }
 0xaaa   :  { %v8909_v27 = vpop.f32.mrb[37].mxu1 }
 0xaad   :  { %v8911_v43 = vpop.f32.mrb[38].mxu1 }
 0xaae   :  { %v8913_v50 = vpop.f32.mrb[39].mxu1 }
 0xab1   :  { %v8915_v45 = vpop.f32.mrb[40].mxu1  ;;  %v8944_v7 = vpop.f32.mrb[36].mxu0 }
 0xab2   :  { %v8917_v42 = vpop.f32.mrb[41].mxu1  ;;  %v8946_v54 = vpop.f32.mrb[37].mxu0 }
 0xab6   :  { %v6651_v17 = vpop.f32.mrb[42].mxu1 }
 0xab7   :  { %v4381_v38 = vmul.f32 %v6651_v17, %v6025_v23  ;;  %v4353_v52 = vpop.f32.mrb[43].mxu1 }
 0xab8   :  { %v4380_v51 = vmul.f32 %v6025_v23, %v4353_v52  ;;  %v6969_v14 = vpack.c.bf16 %v6651_v17, %v4353_v52 }
 0xab9   :  { %v4387_v33 = vsel %vm9595_vm2, %v4381_v38, 0.0  ;;  %v8950_v63 = vpop.f32.mrb[38].mxu0  ;;  %vm9601_vm2 = vcmp.gt.f32.partialorder %v9555_v62, 0.0 }
 0xaba   :  { %4388 = vadd.xlane.f32.xlu1 %v4387_v33  ;;  %v6654_v53 = vpop.f32.mrb[44].mxu1  ;;  %6971 = vmatpush3.bf16.xpose.msk.msra.mxu0 %vm7508_vm4, %v6969_v14  ;;  %v4384_v15 = vsel %vm9596_vm7, %v4380_v51, 0.0  ;;  %v8952_v49 = vpop.f32.mrb[39].mxu0 }
 0xabb   :  { %v4383_v12 = vmul.f32 %v6654_v53, %v6025_v23  ;;  %4385 = vadd.xlane.f32.xlu0 %v4384_v15  ;;  %v4363_v0 = vpop.f32.mrb[45].mxu1  ;;  %6972 = vmatprep.subr.bf16.mxu0 %v9504_v21  ;;  %v6026_v21 = vld [vmem:[%s9383_s8 + $0x3] sm:$0x1] }
 0xabc   :  { %v4382_v40 = vmul.f32 %v6025_v23, %v4363_v0  ;;  %v6973_v48 = vpack.c.bf16 %v6654_v53, %v4363_v0 }
 0xabd   :  { %v4393_v10 = vsel %vm9597_vm9, %v4383_v12, 0.0  ;;  %v8954_v31 = vpop.f32.mrb[40].mxu0 }
 0xabe   :  { %4394 = vadd.xlane.f32.xlu1 %v4393_v10  ;;  %v4574_v26 = vpop.f32.mrb[46].mxu1  ;;  %v4390_v39 = vsel %vm9598_vm15, %v4382_v40, 0.0  ;;  %v8956_v32 = vpop.f32.mrb[41].mxu0  ;;  %vm9630_vm15 = vcmask 123905  }
 0xabf   :  { %v6672_v25 = vpop.f32.mrb[47].mxu1  ;;  %4391 = vadd.xlane.f32.xlu0 %v4390_v39 }
 0xac2   :  { %6975 = vmatpush3.bf16.xpose.msk.msra.mxu0 %vm7508_vm4, %v6973_v48  ;;  %vm9600_vm4 = vcmp.gt.f32.partialorder %v9553_v44, 0.0 }
 0xac3   :  { %6985 = vmatprep.subr.bf16.mxu0 %v8445_v36 }
 0xac6   :  { %v4653_v35 = vpop.f32.mrb[48].mxu1 }
 0xac7   :  { %v8935_v1 = vmul.f32 %v4653_v35, %v4574_v26  ;;  %v4663_v37 = vrot.slane %v4653_v35, 7  ;;  %v4694_v16 = vrot.slane %v4653_v35, 1  ;;  %v6679_v46 = vpop.f32.mrb[49].mxu1 }
 0xac9   :  { %6664 = vmatmul.mubr.msk.f32.vlgmr.msra.gmra.mrb[44].mxu0 %vm9599_vm3, %v6026_v21  ;;  %v8938_v29 = vmul.f32 %v4694_v16, %v4574_v26  ;;  %v8940_v6 = vmul.f32 %v4663_v37, %v4574_v26  ;;  %vm9632_vm3 = vcmask 122880  }
 0xaca   :  { %6987 = vmatpush3.bf16.msra.mxu0 %v8445_v36 }
 0xacb   :  { %6989 = vmatprep.subr.bf16.mxu0 %v8465_v20  ;;  %v8958_v56 = vpop.f32.mrb[42].mxu0 }
 0xacc   :  { %v8960_v41 = vpop.f32.mrb[43].mxu0 }
 0xace   :  { %6991 = vmatpush3.bf16.msra.mxu0 %v8465_v20 }
 0xacf   :  { %7001 = vmatprep.subr.bf16.mxu0 %v8445_v36 }
 0xb47   :  { %v4389_v5 = vpop.xlane.xlu1 %4388 }
 0xb48   :  { %v4386_v9 = vpop.xlane.xlu0 %4385 }
 0xb4b   :  { %v4395_v17 = vpop.xlane.xlu1 %4394 }
 0xb4c   :  { %v4392_v38 = vpop.xlane.xlu0 %4391 }
 0xb9c   :  { %v4479_v61 = vpop.f32.mrb[44].mxu0 }
 0xb9d   :  { %v4486_v47 = vrot.slane %v4479_v61, %v9552_v60  ;;  %v6665_v23 = vpop.f32.mrb[45].mxu0 }
 0xb9f   :  { %v4487_v52 = vadd.f32 %v4486_v47, %v4386_v9  ;;  %v4488_v51 = vadd.f32 %v4486_v47, %v4389_v5  ;;  %v4489_v14 = vadd.f32 %v4486_v47, %v4392_v38  ;;  %v4490_v33 = vadd.f32 %v4486_v47, %v4395_v17 }
 0xba1   :  { %v4491_v53 = vmul.f32 0.01, %v4487_v52  ;;  %v4492_v15 = vmul.f32 0.01, %v4488_v51  ;;  %v4493_v12 = vmul.f32 0.01, %v4489_v14 }
 0xba2   :  { %v4494_v0 = vmul.f32 0.01, %v4490_v33 }
 0xba3   :  { %v4495_v40 = vmax.f32 %v4487_v52, %v4491_v53  ;;  %v4496_v48 = vmax.f32 %v4488_v51, %v4492_v15  ;;  %v4497_v10 = vmax.f32 %v4489_v14, %v4493_v12  ;;  %v9604_v14 = vld [vmem:[#allocation9_spill] sm:$0xff] }
 0xba4   :  { %v4498_v26 = vmax.f32 %v4490_v33, %v4494_v0 }
 0xba5   :  { %v8965_v39 = vsel %vm9600_vm4, %v4495_v40, -1e+30  ;;  %v8969_v60 = vsel %vm9601_vm2, %v4496_v48, -1e+30  ;;  %v8973_v25 = vsel %vm601_vm14, %v4497_v10, -1e+30  ;;  %vm9634_vm4 = vmmov %vm9630_vm15 }
 0xba6   :  { %v8977_v35 = vsel %vm602_vm5, %v4498_v26, -1e+30  ;;  %v4733_v21 = vsel %vm57_vm0, %v8965_v39, -inf  ;;  %v4734_v44 = vsel %vm57_vm0, %v8969_v60, -inf  ;;  %v4735_v37 = vsel %vm57_vm0, %v8973_v25, -inf  ;;  %vm9635_vm2 = vmmov %vm9632_vm3 }
 0xba7   :  { %v4736_v62 = vsel %vm57_vm0, %v8977_v35, -inf  ;;  %v4737_v16 = vmax.f32 %v4733_v21, %v4734_v44  ;;  %v8989_v18 = vsel %vm802_vm13, %v4495_v40, -1e+30  ;;  %v8993_v22 = vsel %vm803_vm12, %v4496_v48, -1e+30 }
 0xba8   :  { %v4738_v46 = vmax.f32 %v4735_v37, %v4736_v62  ;;  %v8997_v5 = vsel %vm804_vm8, %v4497_v10, -1e+30  ;;  %v9001_v9 = vsel %vm805_vm6, %v4498_v26, -1e+30  ;;  %v4927_v61 = vsel %vm57_vm0, %v8989_v18, -inf  ;;  %v9606_v37 = vld [vmem:[#allocation17_spill] sm:$0xff] }
 0xba9   :  { %v4928_v3 = vsel %vm57_vm0, %v8993_v22, -inf  ;;  %v4929_v19 = vsel %vm57_vm0, %v8997_v5, -inf  ;;  %v4930_v47 = vsel %vm57_vm0, %v9001_v9, -inf  ;;  %vm9602_vm5 = vcmp.gt.f32.partialorder %v9564_v30, 0.0 }
 0xbaa   :  { %v9013_v11 = vsel %vm9602_vm5, %v4495_v40, -1e+30  ;;  %v4739_v23 = vmax.f32 %v4737_v16, %v4738_v46  ;;  %v4931_v28 = vmax.f32 %v4927_v61, %v4928_v3  ;;  %v4932_v17 = vmax.f32 %v4929_v19, %v4930_v47  ;;  %v9608_v16 = vld [vmem:[#allocation18_spill] sm:$0xff]  ;;  %v9610_v19 = vld [vmem:[#allocation19_spill] sm:$0xff]  ;;  %vm9636_vm5 = vmmov %vm9635_vm2 }
 0xbab   :  { %v9017_v38 = vsel %vm1006_vm10, %v4496_v48, -1e+30  ;;  %v9021_v51 = vsel %vm1007_vm11, %v4497_v10, -1e+30  ;;  %vm9605_vm6 = vcmp.gt.f32.partialorder %v9604_v14, 0.0  ;;  %v5121_v30 = vsel %vm57_vm0, %v9013_v11, -inf }
 0xbac   :  { %v9025_v33 = vsel %vm9605_vm6, %v4498_v26, -1e+30  ;;  %v5122_v53 = vsel %vm57_vm0, %v9017_v38, -inf  ;;  %v4740_v15 = vrot.slane %v4739_v23, 4  ;;  %v4933_v12 = vmax.f32 %v4931_v28, %v4932_v17  ;;  %v9612_v28 = vld [vmem:[#allocation10_spill] sm:$0xff]  ;;  %vm9637_vm6 = vmmov %vm9635_vm2 }
 0xbad   :  { %v5123_v13 = vsel %vm57_vm0, %v9021_v51, -inf  ;;  %v5124_v0 = vsel %vm57_vm0, %v9025_v33, -inf  ;;  %v5125_v21 = vmax.f32 %v5121_v30, %v5122_v53  ;;  %vm9607_vm8 = vcmp.gt.f32.partialorder %v9606_v37, 0.0 }
 0xbae   :  { %v5126_v44 = vmax.f32 %v5123_v13, %v5124_v0  ;;  %v9037_v62 = vsel %vm9607_vm8, %v4495_v40, -1e+30  ;;  %vm9609_vm10 = vcmp.gt.f32.partialorder %v9608_v16, 0.0  ;;  %v4741_v61 = vmax.f32 %v4739_v23, %v4740_v15  ;;  %vm9638_vm8 = vmmov %vm9634_vm4 }
 0xbaf   :  { %v9041_v46 = vsel %vm9609_vm10, %v4496_v48, -1e+30  ;;  %v4934_v3 = vrot.slane %v4933_v12, 4  ;;  %vm9611_vm11 = vcmp.gt.f32.partialorder %v9610_v19, 0.0  ;;  %vm9613_vm12 = vcmp.gt.f32.partialorder %v9612_v28, 0.0  ;;  %vm9639_vm10 = vmmov %vm9634_vm4 }
 0xbb0   :  { %v9045_v47 = vsel %vm9611_vm11, %v4497_v10, -1e+30  ;;  %v9049_v17 = vsel %vm9613_vm12, %v4498_v26, -1e+30  ;;  %v5127_v52 = vmax.f32 %v5125_v21, %v5126_v44  ;;  %v5316_v14 = vsel %vm57_vm0, %v9037_v62, -inf }
 0xbb1   :  { %v5317_v40 = vsel %vm57_vm0, %v9041_v46, -inf  ;;  %v5318_v48 = vsel %vm57_vm0, %v9045_v47, -inf  ;;  %v4742_v23 = vrot.slane %v4741_v61, 2  ;;  %v4935_v30 = vmax.f32 %v4933_v12, %v4934_v3 }
 0xbb2   :  { %v5319_v10 = vsel %vm57_vm0, %v9049_v17, -inf  ;;  %v5320_v53 = vmax.f32 %v5316_v14, %v5317_v40  ;;  %v5128_v15 = vrot.slane %v5127_v52, 4 }
 0xbb3   :  { %v5321_v13 = vmax.f32 %v5318_v48, %v5319_v10  ;;  %v4743_v26 = vmax.f32 %v4741_v61, %v4742_v23  ;;  %v4936_v0 = vrot.slane %v4935_v30, 2 }
 0xbb4   :  { %v5129_v21 = vmax.f32 %v5127_v52, %v5128_v15 }
 0xbb5   :  { %v5322_v44 = vmax.f32 %v5320_v53, %v5321_v13  ;;  %v4744_v37 = vrot.slane %v4743_v26, 1  ;;  %v4937_v16 = vmax.f32 %v4935_v30, %v4936_v0 }
 0xbb6   :  { %v5130_v19 = vrot.slane %v5129_v21, 2 }
 0xbb7   :  { %v5323_v28 = vrot.slane %v5322_v44, 4  ;;  %v4745_v57 = vmax.f32 %v4743_v26, %v4744_v37  ;;  %v4938_v58 = vrot.slane %v4937_v16, 1 }
 0xbb8   :  { %v5131_v4 = vmax.f32 %v5129_v21, %v5130_v19 }
 0xbb9   :  { %v5324_v8 = vmax.f32 %v5322_v44, %v5323_v28  ;;  %v4747_v12 = vsub.f32 %v8969_v60, %v4745_v57  ;;  %v4748_v3 = vsub.f32 %v8973_v25, %v4745_v57  ;;  %v4749_v14 = vsub.f32 %v8977_v35, %v4745_v57 }
 0xbba   :  { %v4939_v40 = vmax.f32 %v4937_v16, %v4938_v58  ;;  %v5132_v48 = vrot.slane %v5131_v4, 1  ;;  %v4746_v10 = vsub.f32 %v8965_v39, %v4745_v57 }
 0xbbb   :  { %v5325_v61 = vrot.slane %v5324_v8, 2  ;;  %v4752_v23 = vmul.f32 1.442695, %v4747_v12  ;;  %v4754_v52 = vmul.f32 1.442695, %v4748_v3 }
 0xbbc   :  { %v4756_v30 = vmul.f32 1.442695, %v4749_v14  ;;  %v4941_v53 = vsub.f32 %v8993_v22, %v4939_v40  ;;  %v4942_v15 = vsub.f32 %v8997_v5, %v4939_v40  ;;  %v4943_v13 = vsub.f32 %v9001_v9, %v4939_v40 }
 0xbbd   :  { %7238 = vpow2.f32 %v4752_v23  ;;  %v5133_v60 = vmax.f32 %v5131_v4, %v5132_v48  ;;  %v5326_v26 = vmax.f32 %v5324_v8, %v5325_v61  ;;  %v4940_v25 = vsub.f32 %v8989_v18, %v4939_v40 }
 0xbbe   :  { %7240 = vpow2.f32 %v4754_v52  ;;  %v4946_v58 = vmul.f32 1.442695, %v4941_v53  ;;  %v4948_v35 = vmul.f32 1.442695, %v4942_v15  ;;  %v4950_v0 = vmul.f32 1.442695, %v4943_v13 }
 0xbbf   :  { %7242 = vpow2.f32 %v4756_v30  ;;  %v5135_v21 = vsub.f32 %v9017_v38, %v5133_v60  ;;  %v5136_v57 = vsub.f32 %v9021_v51, %v5133_v60  ;;  %v5137_v39 = vsub.f32 %v9025_v33, %v5133_v60  ;;  %v9614_v52 = vld [vmem:[#allocation16_spill] sm:$0xff]  ;;  %v9615_v15 = vld [vmem:[#allocation21_spill] sm:$0xff] }
 0xbc0   :  { %7244 = vpow2.f32 %v4946_v58  ;;  %v5327_v22 = vrot.slane %v5326_v26, 1  ;;  %v4944_v4 = vmul.f32 1.442695, %v4940_v25  ;;  %v4750_v18 = vmul.f32 1.442695, %v4746_v10  ;;  %v9617_v58 = vld [vmem:[#allocation32_spill] sm:$0xff] }
 0xbc1   :  { %7246 = vpow2.f32 %v4948_v35  ;;  %v5140_v5 = vmul.f32 1.442695, %v5135_v21  ;;  %v5142_v9 = vmul.f32 1.442695, %v5136_v57  ;;  %v5144_v8 = vmul.f32 1.442695, %v5137_v39 }
 0xbc2   :  { %7248 = vpow2.f32 %v4950_v0  ;;  %v5328_v44 = vmax.f32 %v5326_v26, %v5327_v22  ;;  %v5134_v37 = vsub.f32 %v9013_v11, %v5133_v60  ;;  %v9616_v26 = vld [vmem:[#allocation35_spill] sm:$0xff]  ;;  %v9618_v0 = vld [vmem:[#allocation37_spill] sm:$0xff]  ;;  %v9619_v39 = vld [vmem:[#allocation22_spill] sm:$0xff] }
 0xbc3   :  { %7250 = vpow2.f32 %v5140_v5 }
 0xbc4   :  { %7252 = vpow2.f32 %v5142_v9  ;;  %v5329_v38 = vsub.f32 %v9037_v62, %v5328_v44  ;;  %v5330_v51 = vsub.f32 %v9041_v46, %v5328_v44  ;;  %v5331_v16 = vsub.f32 %v9045_v47, %v5328_v44 }
 0xbc5   :  { %7254 = vpow2.f32 %v5144_v8  ;;  %v5332_v33 = vsub.f32 %v9049_v17, %v5328_v44  ;;  %v5138_v11 = vmul.f32 1.442695, %v5134_v37  ;;  %v9620_v8 = vld [vmem:[#allocation11_spill] sm:$0xff] }
 0xbc6   :  { %v5335_v19 = vmul.f32 1.442695, %v5330_v51  ;;  %v5337_v28 = vmul.f32 1.442695, %v5331_v16  ;;  %7256 = vpow2.f32 %v4944_v4  ;;  %v5333_v3 = vmul.f32 1.442695, %v5329_v38 }
 0xbc7   :  { %v7239_v12 = vpop.eup %7238  ;;  %v5339_v14 = vmul.f32 1.442695, %v5332_v33  ;;  %7258 = vpow2.f32 %v4750_v18  ;;  %v9621_v18 = vld [vmem:[#allocation15_spill] sm:$0xff]  ;;  %v9622_v16 = vld [vmem:[#allocation12_spill] sm:$0xff] }
 0xbc8   :  { %v7241_v40 = vpop.eup %7240  ;;  %7260 = vpow2.f32 %v5335_v19  ;;  %v9079_v10 = vmul.f32 %v9614_v52, %v7239_v12 }
 0xbc9   :  { %v7243_v48 = vpop.eup %7242  ;;  %7262 = vpow2.f32 %v5337_v28  ;;  %v9082_v13 = vmul.f32 %v9615_v15, %v7241_v40  ;;  %v9625_v15 = vld [vmem:[#allocation7_spill] sm:$0xff] }
 0xbca   :  { %v7245_v62 = vpop.eup %7244  ;;  %7264 = vpow2.f32 %v5339_v14  ;;  %v4763_v5 = vsel %vm57_vm0, %v9079_v10, 0.0  ;;  %v9109_v33 = vmul.f32 %v9622_v16, %v7243_v48  ;;  %v9624_v48 = vld [vmem:[#allocation34_spill] sm:$0xff] }
 0xbcb   :  { %v7247_v46 = vpop.eup %7246  ;;  %7266 = vpow2.f32 %v5333_v3  ;;  %v9076_v17 = vmul.f32 %v8726_v24, %v7245_v62  ;;  %v4765_v40 = vsel %vm57_vm0, %v9082_v13, 0.0 }
 0xbcc   :  { %v7249_v47 = vpop.eup %7248  ;;  %7268 = vpow2.f32 %v5138_v11  ;;  %v9088_v35 = vmul.f32 %v9617_v58, %v7247_v46  ;;  %v9623_v46 = vld [vmem:[#allocation33_spill] sm:$0xff] }
 0xbcd   :  { %v7251_v61 = vpop.eup %7250  ;;  %v9091_v21 = vmul.f32 %v9618_v0, %v7249_v47  ;;  %v4957_v24 = vsel %vm57_vm0, %v9076_v17, 0.0 }
 0xbce   :  { %v7253_v23 = vpop.eup %7252  ;;  %v9106_v37 = vmul.f32 %v9621_v18, %v7251_v61  ;;  %v4959_v12 = vsel %vm57_vm0, %v9088_v35, 0.0  ;;  %v9628_v18 = vld [vmem:[#allocation8_spill] sm:$0xff] }
 0xbcf   :  { %v7255_v30 = vpop.eup %7254  ;;  %v4961_v3 = vsel %vm57_vm0, %v9091_v21, 0.0 }
 0xbd0   :  { %v7257_v53 = vpop.eup %7256  ;;  %v5151_v0 = vsel %vm57_vm0, %v9106_v37, 0.0 }
 0xbd1   :  { %v7259_v60 = vpop.eup %7258  ;;  %v9085_v25 = vmul.f32 %v9616_v26, %v7257_v53  ;;  %v9626_v26 = vld [vmem:[#allocation20_spill] sm:$0xff] }
 0xbd2   :  { %v7261_v57 = vpop.eup %7260  ;;  %v9096_v22 = vmul.f32 %v9619_v39, %v7259_v60  ;;  %v9131_v58 = vmul.f32 %v9626_v26, %v7253_v23  ;;  %v9627_v39 = vld [vmem:[#allocation36_spill] sm:$0xff] }
 0xbd3   :  { %v7263_v9 = vpop.eup %7262  ;;  %v4956_v4 = vsel %vm57_vm0, %v9085_v25, 0.0  ;;  %v9103_v44 = vmul.f32 %v9620_v8, %v7261_v57  ;;  %v4767_v57 = vsel %vm57_vm0, %v9109_v33, 0.0 }
 0xbd4   :  { %v7265_v38 = vpop.eup %7264  ;;  %v4958_v51 = vadd.f32 %v4957_v24, %v4956_v4  ;;  %v4762_v19 = vsel %vm57_vm0, %v9096_v22, 0.0  ;;  %v9123_v61 = vmul.f32 %v9624_v48, %v7263_v9 }
 0xbd5   :  { %v7267_v28 = vpop.eup %7266  ;;  %v4764_v14 = vadd.f32 %v4763_v5, %v4762_v19  ;;  %v5346_v52 = vsel %vm57_vm0, %v9103_v44, 0.0  ;;  %v9138_v5 = vmul.f32 %v9627_v39, %v7265_v38  ;;  %v5153_v38 = vsel %vm57_vm0, %v9131_v58, 0.0 }
 0xbd6   :  { %v7269_v11 = vpop.eup %7268  ;;  %v4960_v62 = vadd.f32 %v4959_v12, %v4958_v51  ;;  %v9120_v47 = vmul.f32 %v9623_v46, %v7267_v28  ;;  %v9143_v51 = vmul.f32 %v9628_v18, %v7255_v30  ;;  %v5348_v19 = vsel %vm57_vm0, %v9123_v61, 0.0 }
 0xbd7   :  { %v4766_v53 = vadd.f32 %v4765_v40, %v4764_v14  ;;  %v9128_v60 = vmul.f32 %v9625_v15, %v7269_v11  ;;  %v5350_v40 = vsel %vm57_vm0, %v9138_v5, 0.0 }
 0xbd8   :  { %v4962_v24 = vadd.f32 %v4961_v3, %v4960_v62  ;;  %v5345_v9 = vsel %vm57_vm0, %v9120_v47, 0.0  ;;  %v5155_v46 = vsel %vm57_vm0, %v9143_v51, 0.0 }
 0xbd9   :  { %v4768_v4 = vadd.f32 %v4767_v57, %v4766_v53  ;;  %v5347_v8 = vadd.f32 %v5346_v52, %v5345_v9  ;;  %v5150_v23 = vsel %vm57_vm0, %v9128_v60, 0.0 }
 0xbda   :  { %v4963_v16 = vrot.slane %v4962_v24, 4  ;;  %v5152_v28 = vadd.f32 %v5151_v0, %v5150_v23 }
 0xbdb   :  { %v4769_v12 = vrot.slane %v4768_v4, 4  ;;  %v5349_v3 = vadd.f32 %v5348_v19, %v5347_v8 }
 0xbdc   :  { %v4964_v14 = vadd.f32 %v4963_v16, %v4962_v24  ;;  %v5154_v11 = vadd.f32 %v5153_v38, %v5152_v28 }
 0xbdd   :  { %v4770_v30 = vadd.f32 %v4769_v12, %v4768_v4  ;;  %v5351_v62 = vadd.f32 %v5350_v40, %v5349_v3 }
 0xbde   :  { %v4965_v48 = vrot.slane %v4964_v14, 2  ;;  %v5156_v52 = vadd.f32 %v5155_v46, %v5154_v11 }
 0xbdf   :  { %v4771_v53 = vrot.slane %v4770_v30, 2  ;;  %v5352_v15 = vrot.slane %v5351_v62, 4 }
 0xbe0   :  { %v4966_v26 = vadd.f32 %v4965_v48, %v4964_v14  ;;  %v5157_v0 = vrot.slane %v5156_v52, 4 }
 0xbe1   :  { %v4772_v57 = vadd.f32 %v4771_v53, %v4770_v30  ;;  %v5353_v39 = vadd.f32 %v5352_v15, %v5351_v62 }
 0xbe2   :  { %v4967_v9 = vrot.slane %v4966_v26, 1  ;;  %v5158_v8 = vadd.f32 %v5157_v0, %v5156_v52 }
 0xbe3   :  { %v4773_v24 = vrot.slane %v4772_v57, 1  ;;  %v5354_v18 = vrot.slane %v5353_v39, 2 }
 0xbe4   :  { %v4968_v23 = vadd.f32 %v4967_v9, %v4966_v26  ;;  %v5159_v16 = vrot.slane %v5158_v8, 2 }
 0xbe5   :  { %v4774_v19 = vadd.f32 %v4773_v24, %v4772_v57  ;;  %v5355_v4 = vadd.f32 %v5354_v18, %v5353_v39  ;;  %v9633_v18 = vld [vmem:[#allocation14_spill] sm:$0xff] }
 0xbe6   :  { %vm4969_vm13 = vcmp.le.f32.partialorder %v4968_v23, 0.0  ;;  %v5160_v28 = vadd.f32 %v5159_v16, %v5158_v8  ;;  %v4701_v16 = vsel %vm9639_vm10, %v8935_v1, 0.0 }
 0xbe7   :  { %v4970_v12 = vsel %vm4969_vm13, 1.0, %v4968_v23  ;;  %vm4775_vm14 = vcmp.le.f32.partialorder %v4774_v19, 0.0  ;;  %v5356_v38 = vrot.slane %v5355_v4, 1  ;;  %v4666_v23 = vsel %vm9638_vm8, %v8940_v6, 0.0  ;;  %v6082_v6 = vld [vmem:[%s9392_s5 + $0x30] sm:$0xff] }
 0xbe8   :  { %7270 = vrcp.f32 %v4970_v12  ;;  %v4776_v3 = vsel %vm4775_vm14, 1.0, %v4774_v19  ;;  %v5161_v14 = vrot.slane %v5160_v28, 1  ;;  %v2928_v19 = vld [vmem:[%s9392_s5 + $0x8] sm:$0xff] }
 0xbe9   :  { %7272 = vrcp.f32 %v4776_v3  ;;  %v5357_v40 = vadd.f32 %v5356_v38, %v5355_v4  ;;  %v2929_v4 = vld [vmem:[%s9392_s5 + $0x10] sm:$0xff]  ;;  %v6081_v12 = vld [vmem:[%s9392_s5 + $0x28] sm:$0xff]  ;;  %v6083_v3 = vld [vmem:[%s9392_s5 + $0x38] sm:$0xff] }
 0xbea   :  { %v5162_v11 = vadd.f32 %v5161_v14, %v5160_v28  ;;  %v2930_v28 = vld [vmem:[%s9392_s5 + $0x18] sm:$0xff] }
 0xbeb   :  { %vm5358_vm7 = vcmp.le.f32.partialorder %v5357_v40, 0.0 }
 0xbec   :  { %vm5163_vm9 = vcmp.le.f32.partialorder %v5162_v11, 0.0  ;;  %v5359_v48 = vsel %vm5358_vm7, 1.0, %v5357_v40 }
 0xbed   :  { %v5164_v53 = vsel %vm5163_vm9, 1.0, %v5162_v11  ;;  %7274 = vrcp.f32 %v5359_v48 }
 0xbee   :  { %7276 = vrcp.f32 %v5164_v53 }
 0xbf2   :  { %v7271_v30 = vpop.eup %7270 }
 0xbf3   :  { %v7273_v62 = vpop.eup %7272  ;;  %v4972_v46 = vmul.f32 %v7271_v30, %v9085_v25  ;;  %v4973_v15 = vmul.f32 %v7271_v30, %v9076_v17  ;;  %v4974_v0 = vmul.f32 %v7271_v30, %v9088_v35  ;;  %v4975_v25 = vmul.f32 %v7271_v30, %v9091_v21 }
 0xbf4   :  { %v4778_v52 = vmul.f32 %v7273_v62, %v9096_v22  ;;  %v4779_v26 = vmul.f32 %v7273_v62, %v9079_v10  ;;  %v4780_v57 = vmul.f32 %v7273_v62, %v9082_v13  ;;  %v4781_v39 = vmul.f32 %v7273_v62, %v9109_v33 }
 0xbf5   :  { %4976 = vxpose.xlu1.b32.start [1/4] (short) (narrow) %v4972_v46, 32 }
 0xbf6   :  { %4782 = vxpose.xlu0.b32.start [1/4] (short) (narrow) %v4778_v52, 32 }
 0xbf7   :  { %v7275_v22 = vpop.eup %7274 }
 0xbf8   :  { %v7277_v9 = vpop.eup %7276  ;;  %v5361_v17 = vmul.f32 %v7275_v22, %v9120_v47  ;;  %v5362_v35 = vmul.f32 %v7275_v22, %v9103_v44  ;;  %v5363_v21 = vmul.f32 %v7275_v22, %v9123_v61  ;;  %v5364_v33 = vmul.f32 %v7275_v22, %v9138_v5  ;;  %v9631_v44 = vld [vmem:[#allocation6_spill] sm:$0xff] }
 0xbf9   :  { %4977 = vxpose.xlu1.b32.cont [2/4] (short) (narrow) %v4973_v15, 32  ;;  %v5166_v10 = vmul.f32 %v7277_v9, %v9128_v60  ;;  %v5167_v13 = vmul.f32 %v7277_v9, %v9106_v37  ;;  %v5168_v8 = vmul.f32 %v7277_v9, %v9131_v58  ;;  %v5169_v47 = vmul.f32 %v7277_v9, %v9143_v51  ;;  %v9629_v60 = vld [vmem:[#allocation5_spill] sm:$0xff] }
 0xbfa   :  { %4783 = vxpose.xlu0.b32.cont [2/4] (short) (narrow) %v4779_v26, 32  ;;  %v3467_v24 = vsel %vm9630_vm15, %v9629_v60, 0.0  ;;  %v3463_v37 = vsel %vm9632_vm3, %v9631_v44, 0.0  ;;  %v3432_v61 = vsel %vm9634_vm4, %v9633_v18, 0.0  ;;  %v4658_v58 = vsel %vm9635_vm2, %v8935_v1, 0.0  ;;  %v2927_v1 = vld [vmem:[%s9392_s5] sm:$0xff] }
 0xbfb   :  { %v3424_v5 = vsel %vm9636_vm5, %v9629_v60, 0.0  ;;  %v4697_v51 = vsel %vm9637_vm6, %v8938_v29, 0.0  ;;  %v6080_v29 = vld [vmem:[%s9392_s5 + $0x20] sm:$0xff] }
 0xbfd   :  { %4978 = vxpose.xlu1.b32.cont [3/4] (short) (narrow) %v4974_v0, 32 }
 0xbfe   :  { %4784 = vxpose.xlu0.b32.cont [3/4] (short) (narrow) %v4780_v57, 32 }
 0xc01   :  { %4979 = vxpose.xlu1.b32.end [4/4] (short) (narrow) %v4975_v25, 32 }
 0xc02   :  { %4785 = vxpose.xlu0.b32.end [4/4] (short) (narrow) %v4781_v39, 32 }
 0xc05   :  { %5365 = vxpose.xlu1.b32.start [1/4] (short) (narrow) %v5361_v17, 32 }
 0xc06   :  { %5170 = vxpose.xlu0.b32.start [1/4] (short) (narrow) %v5166_v10, 32 }
 0xc09   :  { %5366 = vxpose.xlu1.b32.cont [2/4] (short) (narrow) %v5362_v35, 32 }
 0xc0a   :  { %5171 = vxpose.xlu0.b32.cont [2/4] (short) (narrow) %v5167_v13, 32 }
 0xc0d   :  { %5367 = vxpose.xlu1.b32.cont [3/4] (short) (narrow) %v5363_v21, 32 }
 0xc0e   :  { %5172 = vxpose.xlu0.b32.cont [3/4] (short) (narrow) %v5168_v8, 32 }
 0xc11   :  { %5368 = vxpose.xlu1.b32.end [4/4] (short) (narrow) %v5364_v33, 32 }
 0xc12   :  { %5173 = vxpose.xlu0.b32.end [4/4] (short) (narrow) %v5169_v47, 32 }
 0xc38   :  { %3468 = vadd.xlane.f32.xlu1 %v3467_v24 }
 0xc3c   :  { %3464 = vadd.xlane.f32.xlu1 %v3463_v37 }
 0xc3f   :  { %3433 = vadd.xlane.f32.xlu0 %v3432_v61 }
 0xc40   :  { %4659 = vadd.xlane.f32.xlu1 %v4658_v58 }
 0xc43   :  { %3425 = vadd.xlane.f32.xlu0 %v3424_v5 }
 0xc44   :  { %4698 = vadd.xlane.f32.xlu1 %v4697_v51 }
 0xc47   :  { %4667 = vadd.xlane.f32.xlu0 %v4666_v23 }
 0xc4b   :  { %4702 = vadd.xlane.f32.xlu0 %v4701_v16 }
 0xc55   :  { %2938 = vperm.xlu1 %7085, %v2928_v19  }
 0xc59   :  { %2943 = vperm.xlu1 %7085, %v2929_v4  }
 0xc5d   :  { %5757 = vperm.xlu1 %7085, %v6080_v29  }
 0xc61   :  { %2933 = vperm.xlu0 %7084, %v2927_v1   ;;  %5767 = vperm.xlu1 %7085, %v6082_v6   ;;  %v6058_v6 = vld [vmem:[%s9388_s11 + $0x60] sm:$0xff] }
 0xc65   :  { %2948 = vperm.xlu0 %7084, %v2930_v28   ;;  %v6059_v28 = vld [vmem:[%s9388_s11 + $0x68] sm:$0xff] }
 0xc69   :  { %5762 = vperm.xlu0 %7084, %v6081_v12  }
 0xc6d   :  { %5772 = vperm.xlu0 %7084, %v6083_v3  }
 0xc75   :  { %v4992_v38 = vpop.trf.xlu1 }
 0xc76   :  { %v4798_v14 = vpop.trf.xlu0  ;;  %6702 = vmatprep.mubr.msk.f32.mxu1 %vm57_vm0, %v4992_v38 }
 0xc77   :  { %6688 = vmatprep.mubr.msk.f32.mxu0 %vm57_vm0, %v4798_v14 }
 0xc79   :  { %v4993_v40 = vpop.trf.xlu1 }
 0xc7a   :  { %v4799_v11 = vpop.trf.xlu0  ;;  %6703 = vmatmul.mubr.msk.f32.vlgmr.msra.gmra.mrb[50].mxu1 %vm57_vm0, %v4993_v40 }
 0xc7b   :  { %6689 = vmatmul.mubr.msk.f32.vlgmr.msra.gmra.mrb[46].mxu0 %vm57_vm0, %v4799_v11  ;;  %7011 = vmatpush3.bf16.msra.mxu1 %v8445_v36  ;;  %v7016_v11 = vpack.c.bf16 %v6059_v28, %v6058_v6 }
 0xc7c   :  { %7003 = vmatpush3.bf16.msra.mxu0 %v8445_v36  ;;  %7013 = vmatprep.subr.bf16.mxu1 %v8465_v20 }
 0xc7d   :  { %7005 = vmatprep.subr.bf16.mxu0 %v8465_v20  ;;  %v4994_v30 = vpop.trf.xlu1 }
 0xc7e   :  { %v4800_v62 = vpop.trf.xlu0  ;;  %6705 = vmatprep.mubr.msk.f32.mxu1 %vm57_vm0, %v4994_v30 }
 0xc7f   :  { %7015 = vmatpush3.bf16.msra.mxu1 %v8465_v20  ;;  %6691 = vmatprep.mubr.msk.f32.mxu0 %vm57_vm0, %v4800_v62 }
 0xc80   :  { %7007 = vmatpush3.bf16.msra.mxu0 %v8465_v20 }
 0xc81   :  { %v4995_v46 = vpop.trf.xlu1  ;;  %7018 = vmatprep.subr.msk.bf16.mxu0 %vm7449_vm1, %v7016_v11 }
 0xc82   :  { %v4801_v48 = vpop.trf.xlu0  ;;  %6706 = vmatmul.mubr.msk.f32.gmra.mrb[52].mxu1 %vm57_vm0, %v4995_v46 }
 0xc83   :  { %6692 = vmatmul.mubr.msk.f32.gmra.mrb[48].mxu0 %vm57_vm0, %v4801_v48 }
 0xc85   :  { %v5381_v36 = vpop.trf.xlu1 }
 0xc86   :  { %v5186_v52 = vpop.trf.xlu0  ;;  %6730 = vmatprep.mubr.msk.f32.mxu1 %vm57_vm0, %v5381_v36 }
 0xc87   :  { %6716 = vmatprep.mubr.msk.f32.mxu0 %vm57_vm0, %v5186_v52 }
 0xc89   :  { %v5382_v53 = vpop.trf.xlu1 }
 0xc8a   :  { %v5187_v15 = vpop.trf.xlu0  ;;  %6731 = vmatmul.mubr.msk.f32.vlgmr.msra.gmra.mrb[54].mxu1 %vm57_vm0, %v5382_v53 }
 0xc8b   :  { %6717 = vmatmul.mubr.msk.f32.vlgmr.msra.gmra.mrb[50].mxu0 %vm57_vm0, %v5187_v15 }
 0xc8c   :  { %7021 = vmatpush3.bf16.xpose.msk.msra.mxu0 %vm7449_vm1, %v7016_v11 }
 0xc8d   :  { %v5383_v26 = vpop.trf.xlu1 }
 0xc8e   :  { %v5188_v20 = vpop.trf.xlu0  ;;  %6733 = vmatprep.mubr.msk.f32.mxu1 %vm57_vm0, %v5383_v26 }
 0xc8f   :  { %6719 = vmatprep.mubr.msk.f32.mxu0 %vm57_vm0, %v5188_v20 }
 0xc91   :  { %v5384_v0 = vpop.trf.xlu1 }
 0xc92   :  { %v5189_v57 = vpop.trf.xlu0  ;;  %6734 = vmatmul.mubr.msk.f32.gmra.mrb[56].mxu1 %vm57_vm0, %v5384_v0 }
 0xc93   :  { %6720 = vmatmul.mubr.msk.f32.gmra.mrb[52].mxu0 %vm57_vm0, %v5189_v57  ;;  %v6060_v57 = vld [vmem:[%s9388_s11 + $0x70] sm:$0xff] }
 0xcc5   :  { %v3469_v25 = vpop.xlane.xlu1 %3468 }
 0xcc6   :  { %v3470_v22 = vmul.f32 0.25, %v3469_v25  ;;  %v6061_v25 = vld [vmem:[%s9388_s11 + $0x78] sm:$0xff] }
 0xcc8   :  { %v3472_v9 = vrot.slane %v3470_v22, 1 }
 0xcc9   :  { %v3465_v39 = vpop.xlane.xlu1 %3464 }
 0xcca   :  { %v3466_v17 = vmul.f32 0.25, %v3465_v39 }
 0xccc   :  { %v3474_v10 = vmax.f32 %v3466_v17, %v3472_v9  ;;  %v3434_v35 = vpop.xlane.xlu0 %3433 }
 0xccd   :  { %v3435_v13 = vmul.f32 0.25, %v3434_v35  ;;  %v4660_v24 = vpop.xlane.xlu1 %4659 }
 0xcce   :  { %v3479_v21 = vrot.slane %v3474_v10, 7  ;;  %v3475_v8 = vsub.f32 %v3466_v17, %v3474_v10  ;;  %v4661_v16 = vmul.f32 0.25, %v4660_v24  ;;  %v7022_v17 = vpack.c.bf16 %v6061_v25, %v6060_v57  ;;  %v6013_v24 = vld [vmem:[%s9388_s11 + $0x48] sm:$0xff] }
 0xccf   :  { %v3437_v60 = vrot.slane %v3435_v13, 1 }
 0xcd0   :  { %v3481_v33 = vsub.f32 %v3470_v22, %v3479_v21  ;;  %v3426_v47 = vpop.xlane.xlu0 %3425  ;;  %v3476_v18 = vmul.f32 1.442695, %v3475_v8  ;;  %7024 = vmatprep.subr.msk.bf16.mxu0 %vm7449_vm1, %v7022_v17 }
 0xcd1   :  { %v3427_v44 = vmul.f32 0.25, %v3426_v47  ;;  %v4699_v4 = vpop.xlane.xlu1 %4698  ;;  %7027 = vmatpush3.bf16.xpose.msk.msra.mxu0 %vm7449_vm1, %v7022_v17 }
 0xcd2   :  { %v3482_v37 = vmul.f32 1.442695, %v3481_v33  ;;  %v4700_v40 = vmul.f32 0.25, %v4699_v4 }
 0xcd3   :  { %v3439_v61 = vmax.f32 %v3427_v44, %v3437_v60  ;;  %v6012_v60 = vld [vmem:[%s9388_s11 + $0x40] sm:$0xff] }
 0xcd4   :  { %7278 = vpow2.f32 %v3482_v37  ;;  %v4668_v58 = vpop.xlane.xlu0 %4667 }
 0xcd5   :  { %v3440_v5 = vsub.f32 %v3427_v44, %v3439_v61  ;;  %v3444_v51 = vrot.slane %v3439_v61, 7  ;;  %v4669_v23 = vmul.f32 0.25, %v4668_v58  ;;  %7280 = vpow2.f32 %v3476_v18 }
 0xcd6   :  { %v9259_v44 = vpack.c.bf16 %v6013_v24, %v6012_v60 }
 0xcd7   :  { %v3446_v19 = vsub.f32 %v3435_v13, %v3444_v51  ;;  %v4671_v29 = vrot.slane %v4669_v23, 1  ;;  %v3441_v12 = vmul.f32 1.442695, %v3440_v5 }
 0xcd8   :  { %v4703_v1 = vpop.xlane.xlu0 %4702  ;;  %7030 = vmatprep.subr.msk.bf16.mxu0 %vm7449_vm1, %v9259_v44 }
 0xcd9   :  { %v3447_v3 = vmul.f32 1.442695, %v3446_v19  ;;  %v4673_v38 = vmax.f32 %v4661_v16, %v4671_v29  ;;  %v4704_v14 = vmul.f32 0.25, %v4703_v1 }
 0xcdb   :  { %7282 = vpow2.f32 %v3447_v3  ;;  %v4674_v30 = vsub.f32 %v4661_v16, %v4673_v38  ;;  %v4678_v62 = vrot.slane %v4673_v38, 7  ;;  %v4706_v46 = vrot.slane %v4704_v14, 1 }
 0xcdc   :  { %7284 = vpow2.f32 %v3441_v12 }
 0xcdd   :  { %v4680_v48 = vsub.f32 %v4669_v23, %v4678_v62  ;;  %v4708_v36 = vmax.f32 %v4700_v40, %v4706_v46  ;;  %v4675_v53 = vmul.f32 1.442695, %v4674_v30 }
 0xcde   :  { %v7279_v52 = vpop.eup %7278 }
 0xcdf   :  { %v4681_v15 = vmul.f32 1.442695, %v4680_v48  ;;  %v4709_v26 = vsub.f32 %v4700_v40, %v4708_v36  ;;  %v4713_v20 = vrot.slane %v4708_v36, 7  ;;  %v3485_v0 = vrot.slane %v7279_v52, 1  ;;  %v7281_v22 = vpop.eup %7280 }
 0xce1   :  { %7286 = vpow2.f32 %v4681_v15  ;;  %v4715_v39 = vsub.f32 %v4704_v14, %v4713_v20  ;;  %v3487_v9 = vadd.f32 %v7281_v22, %v3485_v0  ;;  %v4710_v10 = vmul.f32 1.442695, %v4709_v26 }
 0xce2   :  { %7288 = vpow2.f32 %v4675_v53 }
 0xce3   :  { %v4716_v35 = vmul.f32 1.442695, %v4715_v39  ;;  %v3491_v21 = vrot.slane %v3487_v9, 7 }
 0xce5   :  { %v7283_v13 = vpop.eup %7282  ;;  %7290 = vpow2.f32 %v4716_v35 }
 0xce6   :  { %v3450_v8 = vrot.slane %v7283_v13, 1  ;;  %v7285_v33 = vpop.eup %7284  ;;  %7292 = vpow2.f32 %v4710_v10 }
 0xce7   :  { %7294 = vrcp.f32 %v3487_v9 }
 0xce8   :  { %v3452_v47 = vadd.f32 %v7285_v33, %v3450_v8  ;;  %7296 = vrcp.f32 %v3491_v21 }
 0xcea   :  { %7298 = vrcp.f32 %v3452_v47  ;;  %v3456_v37 = vrot.slane %v3452_v47, 7 }
 0xceb   :  { %v7287_v18 = vpop.eup %7286 }
 0xcec   :  { %v4684_v61 = vrot.slane %v7287_v18, 1  ;;  %7300 = vrcp.f32 %v3456_v37  ;;  %v7289_v58 = vpop.eup %7288 }
 0xcee   :  { %v4686_v5 = vadd.f32 %v7289_v58, %v4684_v61 }
 0xcef   :  { %v7291_v51 = vpop.eup %7290 }
 0xcf0   :  { %v4719_v23 = vrot.slane %v7291_v51, 1  ;;  %7302 = vrcp.f32 %v4686_v5  ;;  %v4690_v16 = vrot.slane %v4686_v5, 7  ;;  %v7293_v19 = vpop.eup %7292 }
 0xcf1   :  { %v7295_v4 = vpop.eup %7294 }
 0xcf2   :  { %v4721_v29 = vadd.f32 %v7293_v19, %v4719_v23  ;;  %7304 = vrcp.f32 %v4690_v16  ;;  %v7297_v1 = vpop.eup %7296  ;;  %v3489_v38 = vmul.f32 %v7295_v4, %v7281_v22 }
 0xcf3   :  { %v3494_v14 = vmul.f32 %v7297_v1, %v7279_v52 }
 0xcf4   :  { %v7299_v6 = vpop.eup %7298  ;;  %7306 = vrcp.f32 %v4721_v29  ;;  %v4725_v28 = vrot.slane %v4721_v29, 7 }
 0xcf5   :  { %v3454_v12 = vmul.f32 %v7299_v6, %v7285_v33  ;;  %v4261_v62 = vrot.slane %v3494_v14, 1 }
 0xcf6   :  { %v7301_v3 = vpop.eup %7300  ;;  %7308 = vrcp.f32 %v4725_v28 }
 0xcf7   :  { %7064 = vpush %v3454_v12  ;;  %v3459_v40 = vmul.f32 %v7301_v3, %v7283_v13 }
 0xcf8   :  { %7066 = vpush %v3489_v38 }
 0xcf9   :  { %v4066_v11 = vrot.slane %v3459_v40, 1 }
 0xcfa   :  { %v7303_v30 = vpop.eup %7302 }
 0xcfb   :  { %7068 = vpush %v4066_v11  ;;  %v4688_v46 = vmul.f32 %v7303_v30, %v7289_v58 }
 0xcfc   :  { %v7305_v48 = vpop.eup %7304  ;;  %7070 = vpush %v4261_v62 }
 0xcfd   :  { %7072 = vpush %v4688_v46  ;;  %v4693_v36 = vmul.f32 %v7305_v48, %v7287_v18 }
 0xcfe   :  { %v7307_v53 = vpop.eup %7306 }
 0xcff   :  { %v4723_v15 = vmul.f32 %v7307_v53, %v7293_v19  ;;  %v5300_v26 = vrot.slane %v4693_v36, 1 }
 0xd00   :  { %v7309_v20 = vpop.eup %7308 }
 0xd01   :  { %7074 = vpush %v4723_v15  ;;  %v4728_v0 = vmul.f32 %v7309_v20, %v7291_v51 }
 0xd02   :  { %7076 = vpush %v5300_v26 }
 0xd03   :  { %v5495_v52 = vrot.slane %v4728_v0, 1 }
 0xd05   :  { %7078 = vpush %v5495_v52 }
 0xd28   :  { %s7065_s25 = spop %7064 }
 0xd29   :  { %v3679_v57 = vstv %s7065_s25  ;;  %s7067_s26 = spop %7066 }
 0xd2a   :  { %v3681_v25 = vmul.f32 %v3679_v57, %v8905_v59  ;;  %v3682_v22 = vmul.f32 %v8903_v34, %v3679_v57  ;;  %v3683_v39 = vmul.f32 %v3679_v57, %v8909_v27  ;;  %v3684_v9 = vmul.f32 %v8907_v55, %v3679_v57 }
 0xd2b   :  { %v3873_v17 = vstv %s7067_s26 }
 0xd2c   :  { %v3875_v10 = vmul.f32 %v3873_v17, %v8946_v54  ;;  %v3876_v35 = vmul.f32 %v8944_v7, %v3873_v17  ;;  %v3877_v13 = vmul.f32 %v3873_v17, %v8952_v49  ;;  %v3878_v21 = vmul.f32 %v8950_v63, %v3873_v17  ;;  %s7069_s27 = spop %7068  ;;  %v6015_v17 = vld [vmem:[%s9388_s11 + $0x58] sm:$0xff] }
 0xd2d   :  { %v4068_v8 = vstv %s7069_s27  ;;  %s7071_s28 = spop %7070 }
 0xd2e   :  { %v3879_v33 = vadd.f32 %v3875_v10, %v3681_v25  ;;  %v3880_v59 = vadd.f32 %v3876_v35, %v3682_v22  ;;  %v3881_v47 = vadd.f32 %v3877_v13, %v3683_v39  ;;  %v3882_v34 = vadd.f32 %v3878_v21, %v3684_v9  ;;  %s7073_s29 = spop %7072  ;;  %v6014_v9 = vld [vmem:[%s9388_s11 + $0x50] sm:$0xff] }
 0xd2f   :  { %v4070_v27 = vmul.f32 %v4068_v8, %v8913_v50  ;;  %v4071_v55 = vmul.f32 %v8911_v43, %v4068_v8  ;;  %v4072_v60 = vmul.f32 %v4068_v8, %v8917_v42  ;;  %v4073_v54 = vmul.f32 %v8915_v45, %v4068_v8 }
 0xd30   :  { %v4263_v7 = vstv %s7071_s28  ;;  %v4913_v16 = vstv %s7073_s29  ;;  %v7034_v21 = vpack.c.bf16 %v6015_v17, %v6014_v9 }
 0xd31   :  { %v4074_v24 = vadd.f32 %v4070_v27, %v3879_v33  ;;  %v4075_v49 = vadd.f32 %v4071_v55, %v3880_v59  ;;  %v4076_v37 = vadd.f32 %v4072_v60, %v3881_v47  ;;  %v4077_v63 = vadd.f32 %v4073_v54, %v3882_v34 }
 0xd32   :  { %v4265_v18 = vmul.f32 %v4263_v7, %v8956_v32  ;;  %v4266_v61 = vmul.f32 %v8954_v31, %v4263_v7  ;;  %v4267_v58 = vmul.f32 %v4263_v7, %v8960_v41  ;;  %v4268_v5 = vmul.f32 %v8958_v56, %v4263_v7  ;;  %s7075_s30 = spop %7074 }
 0xd33   :  { %v5107_v51 = vstv %s7075_s30  ;;  %s7077_s14 = spop %7076 }
 0xd34   :  { %v9280_v50 = vadd.f32 %v4265_v18, %v4074_v24  ;;  %v9282_v43 = vadd.f32 %v4266_v61, %v4075_v49  ;;  %v9284_v42 = vadd.f32 %v4267_v58, %v4076_v37  ;;  %v9286_v45 = vadd.f32 %v4268_v5, %v4077_v63  ;;  %v2939_v49 = vpop.permute.xlu1 %2938 }
 0xd35   :  { %v5302_v36 = vstv %s7077_s14 }
 0xd36   :  { %s7079_s15 = spop %7078 }
 0xd37   :  { %v5497_v0 = vstv %s7079_s15 }
 0xd38   :  { %v2944_v63 = vpop.permute.xlu1 %2943 }
 0xd4d   :  { %v6704_v23 = vpop.f32.mrb[50].mxu1 }
 0xd4e   :  { %v6690_v32 = vpop.f32.mrb[46].mxu0  ;;  %v5110_v19 = vmul.f32 %v6704_v23, %v5107_v51  ;;  %v5086_v31 = vpop.f32.mrb[51].mxu1 }
 0xd4f   :  { %v4916_v4 = vmul.f32 %v6690_v32, %v4913_v16  ;;  %v4892_v41 = vpop.f32.mrb[47].mxu0  ;;  %v5109_v29 = vmul.f32 %v5107_v51, %v5086_v31 }
 0xd50   :  { %v4915_v56 = vmul.f32 %v4913_v16, %v4892_v41  ;;  %v9644_v41 = vld [vmem:[#allocation23_spill] sm:$0xff] }
 0xd51   :  { %v5114_v1 = vadd.f32 %v5110_v19, %v4916_v4  ;;  %v5758_v4 = vpop.permute.xlu1 %5757 }
 0xd52   :  { %v5113_v6 = vadd.f32 %v5109_v29, %v4915_v56 }
 0xd55   :  { %v6707_v28 = vpop.f32.mrb[52].mxu1  ;;  %v5768_v17 = vpop.permute.xlu1 %5767 }
 0xd56   :  { %v6693_v12 = vpop.f32.mrb[48].mxu0  ;;  %v5112_v3 = vmul.f32 %v6707_v28, %v5107_v51  ;;  %v5096_v38 = vpop.f32.mrb[53].mxu1 }
 0xd57   :  { %v4918_v14 = vmul.f32 %v6693_v12, %v4913_v16  ;;  %v4902_v40 = vpop.f32.mrb[49].mxu0  ;;  %v5111_v11 = vmul.f32 %v5107_v51, %v5096_v38  ;;  %v9641_v51 = vld [vmem:[#allocation2_spill] sm:$0xff] }
 0xd58   :  { %v4917_v30 = vmul.f32 %v4913_v16, %v4902_v40 }
 0xd59   :  { %v5116_v62 = vadd.f32 %v5112_v3, %v4918_v14  ;;  %v7363_v3 = vld [vmem:[%s9381_s0 + $0x8] sm:$0xff]  ;;  %v9646_v14 = vld [vmem:[#allocation30_spill] sm:$0xff] }
 0xd5a   :  { %v5115_v46 = vadd.f32 %v5111_v11, %v4917_v30  ;;  %v9647_v30 = vld [vmem:[#allocation3_spill] sm:$0xff] }
 0xd5d   :  { %v6732_v48 = vpop.f32.mrb[54].mxu1 }
 0xd5e   :  { %v6718_v53 = vpop.f32.mrb[50].mxu0  ;;  %v5475_v15 = vpop.f32.mrb[55].mxu1  ;;  %v5500_v25 = vmul.f32 %v6732_v48, %v5497_v0 }
 0xd5f   :  { %v5305_v26 = vmul.f32 %v6718_v53, %v5302_v36  ;;  %v5280_v20 = vpop.f32.mrb[51].mxu0  ;;  %v5499_v39 = vmul.f32 %v5497_v0, %v5475_v15 }
 0xd60   :  { %v5304_v52 = vmul.f32 %v5302_v36, %v5280_v20 }
 0xd61   :  { %v5309_v57 = vadd.f32 %v5305_v26, %v5114_v1  ;;  %v9649_v26 = vld [vmem:[#allocation4_spill] sm:$0xff] }
 0xd62   :  { %v5308_v22 = vadd.f32 %v5304_v52, %v5113_v6  ;;  %v9645_v6 = vld [vmem:[#allocation25_spill] sm:$0xff] }
 0xd63   :  { %v5504_v10 = vadd.f32 %v5500_v25, %v5309_v57 }
 0xd64   :  { %v5503_v35 = vadd.f32 %v5499_v39, %v5308_v22  ;;  %v9651_v22 = vld [vmem:[#allocation29_spill] sm:$0xff] }
 0xd65   :  { %v6735_v13 = vpop.f32.mrb[56].mxu1 }
 0xd66   :  { %v6721_v8 = vpop.f32.mrb[52].mxu0  ;;  %6744 = vmatprep.mubr.msk.f32.mxu0 %vm57_vm0, %v5503_v35  ;;  %v5485_v33 = vpop.f32.mrb[57].mxu1  ;;  %v5502_v55 = vmul.f32 %v6735_v13, %v5497_v0 }
 0xd67   :  { %v5307_v59 = vmul.f32 %v6721_v8, %v5302_v36  ;;  %v5290_v47 = vpop.f32.mrb[53].mxu0  ;;  %6745 = vmatmul.mubr.msk.f32.vlgmr.msra.gmra.mrb[54].mxu0 %vm57_vm0, %v5504_v10  ;;  %v5501_v54 = vmul.f32 %v5497_v0, %v5485_v33  ;;  %v9650_v0 = vld [vmem:[#allocation28_spill] sm:$0xff]  ;;  %v7365_v10 = vld [vmem:[%s9381_s0 + $0x18] sm:$0xff] }
 0xd68   :  { %v5306_v34 = vmul.f32 %v5302_v36, %v5290_v47  ;;  %7033 = vmatpush3.bf16.xpose.msk.msra.mxu0 %vm7449_vm1, %v9259_v44  ;;  %v2934_v44 = vpop.permute.xlu0 %2933  ;;  %v7364_v36 = vld [vmem:[%s9381_s0] sm:$0xff]  ;;  %v7366_v8 = vld [vmem:[%s9381_s0 + $0x10] sm:$0xff] }
 0xd69   :  { %v5311_v27 = vadd.f32 %v5307_v59, %v5116_v62  ;;  %7036 = vmatprep.subr.msk.bf16.mxu0 %vm7449_vm1, %v7034_v21 }
 0xd6a   :  { %v5310_v60 = vadd.f32 %v5306_v34, %v5115_v46  ;;  %v9648_v46 = vld [vmem:[#allocation31_spill] sm:$0xff] }
 0xd6b   :  { %v5506_v7 = vadd.f32 %v5502_v55, %v5311_v27  ;;  %v2953_v48 = vmul.f32 %v2944_v63, %v9648_v46 }
 0xd6c   :  { %v5505_v24 = vadd.f32 %v5501_v54, %v5310_v60  ;;  %v2949_v37 = vpop.permute.xlu0 %2948 }
 0xd6d   :  { %v2954_v40 = vmul.f32 %v2949_v37, %v9646_v14  ;;  %v2957_v33 = vadd.f32 %v7366_v8, %v2953_v48 }
 0xd6e   :  { %6747 = vmatprep.mubr.msk.f32.mxu0 %vm57_vm0, %v5505_v24 }
 0xd6f   :  { %6748 = vmatmul.mubr.msk.f32.gmra.mrb[56].mxu0 %vm57_vm0, %v5506_v7  ;;  %v2958_v35 = vadd.f32 %v7365_v10, %v2954_v40 }
 0xd70   :  { %7039 = vmatpush3.bf16.xpose.msk.msra.mxu0 %vm7449_vm1, %v7034_v21  ;;  %6758 = vmatprep.mubr.msk.f32.mxu0 %vm57_vm0, %v9280_v50  ;;  %v9640_v50 = vld [vmem:[#allocation26_spill] sm:$0xff]  ;;  %v5763_v32 = vpop.permute.xlu0 %5762 }
 0xd74   :  { %v5773_v25 = vpop.permute.xlu0 %5772 }
 0xd77   :  { %6759 = vmatmul.mubr.msk.f32.vlgmr.msra.gmra.mrb[54].mxu0 %vm57_vm0, %v9282_v43  ;;  %v2952_v43 = vmul.f32 %v2939_v49, %v9640_v50 }
 0xd78   :  { %6761 = vmatprep.mubr.msk.f32.mxu0 %vm57_vm0, %v9284_v42  ;;  %v9642_v42 = vld [vmem:[#allocation27_spill] sm:$0xff] }
 0xd79   :  { %v2951_v16 = vmul.f32 %v2934_v44, %v9642_v42  ;;  %v2956_v38 = vadd.f32 %v7363_v3, %v2952_v43 }
 0xd7b   :  { %6762 = vmatmul.mubr.msk.f32.gmra.mrb[56].mxu0 %vm57_vm0, %v9286_v45  ;;  %v9643_v45 = vld [vmem:[#allocation24_spill] sm:$0xff]  ;;  %v2955_v53 = vadd.f32 %v7364_v36, %v2951_v16 }
 0xe4a   :  { %v6760_v18 = vpop.f32.mrb[54].mxu0 }
 0xe4b   :  { %v5739_v61 = vadd.f32 %v6760_v18, %v6079_v2  ;;  %v5711_v58 = vpop.f32.mrb[55].mxu0 }
 0xe4c   :  { %v5738_v5 = vadd.f32 %v6079_v2, %v5711_v58 }
 0xe4d   :  { %v5743_v23 = vmul.f32 %v5739_v61, %v9641_v51 }
 0xe4e   :  { %v5742_v19 = vmul.f32 %v5738_v5, %v9643_v45  ;;  %v6763_v31 = vpop.f32.mrb[56].mxu0 }
 0xe4f   :  { %v5747_v29 = vadd.f32 %v5743_v23, %v9644_v41  ;;  %v5741_v56 = vadd.f32 %v6763_v31, %v6079_v2  ;;  %v5721_v1 = vpop.f32.mrb[57].mxu0 }
 0xe50   :  { %v5746_v28 = vadd.f32 %v5742_v19, %v9645_v6  ;;  %v5740_v12 = vadd.f32 %v6079_v2, %v5721_v1 }
 0xe51   :  { %v5776_v11 = vmul.f32 %v5763_v32, %v5747_v29  ;;  %v5745_v62 = vmul.f32 %v5741_v56, %v9647_v30 }
 0xe52   :  { %v5775_v15 = vmul.f32 %v5758_v4, %v5746_v28  ;;  %v5744_v20 = vmul.f32 %v5740_v12, %v9649_v26 }
 0xe53   :  { %v5749_v52 = vadd.f32 %v5745_v62, %v9650_v0  ;;  %v9333_v57 = vadd.f32 %v5776_v11, %v2956_v38 }
 0xe54   :  { %v5748_v39 = vadd.f32 %v5744_v20, %v9651_v22  ;;  %v9336_v9 = vadd.f32 %v5775_v15, %v2955_v53 }
 0xe55   :  { %v5778_v13 = vmul.f32 %v5773_v25, %v5749_v52  ;;  %v5784_v21 = vmul.f32 %v9333_v57, %v9333_v57 }
 0xe56   :  { %v5777_v59 = vmul.f32 %v5768_v17, %v5748_v39  ;;  %v5783_v47 = vmul.f32 %v9336_v9, %v9336_v9 }
 0xe57   :  { %v5790_v34 = vsel %vm57_vm0, %v5784_v21, 0.0  ;;  %v9349_v27 = vadd.f32 %v5778_v13, %v2958_v35 }
 0xe58   :  { %5791 = vadd.xlane.f32.xlu0 %v5790_v34  ;;  %v5787_v55 = vsel %vm57_vm0, %v5783_v47, 0.0  ;;  %v9352_v60 = vadd.f32 %v5777_v59, %v2957_v33 }
 0xe59   :  { %5788 = vadd.xlane.f32.xlu1 %v5787_v55  ;;  %v5786_v54 = vmul.f32 %v9349_v27, %v9349_v27 }
 0xe5a   :  { %v5785_v7 = vmul.f32 %v9352_v60, %v9352_v60 }
 0xe5b   :  { %v5796_v24 = vsel %vm57_vm0, %v5786_v54, 0.0 }
 0xe5c   :  { %v5793_v44 = vsel %vm57_vm0, %v5785_v7, 0.0 }
 0xe5d   :  { %5794 = vadd.xlane.f32.xlu0 %v5793_v44  ;;  %5797 = vadd.xlane.f32.xlu1 %v5796_v24 }
 0xee5   :  { %v5792_v49 = vpop.xlane.xlu0 %5791 }
 0xee6   :  { %7310 = vrsqrt.f32 %v5792_v49  ;;  %v5789_v37 = vpop.xlane.xlu1 %5788  ;;  %vm5808_vm1 = vcmp.eq.f32.partialorder %v5792_v49, inf  ;;  %v5811_v5 = vand.u32 2147483648, %v5792_v49  ;;  %vm5810_vm11 = vcmp.eq.f32.partialorder %v5792_v49, 0.0 }
 0xee7   :  { %7312 = vrsqrt.f32 %v5789_v37  ;;  %vm5801_vm12 = vcmp.eq.f32.partialorder %v5789_v37, inf  ;;  %v5804_v51 = vand.u32 2147483648, %v5789_v37  ;;  %vm5803_vm13 = vcmp.eq.f32.partialorder %v5789_v37, 0.0 }
 0xeea   :  { %v5798_v2 = vpop.xlane.xlu1 %5797  ;;  %v5795_v63 = vpop.xlane.xlu0 %5794 }
 0xeeb   :  { %7314 = vrsqrt.f32 %v5798_v2  ;;  %vm5822_vm14 = vcmp.eq.f32.partialorder %v5798_v2, inf  ;;  %vm5824_vm7 = vcmp.eq.f32.partialorder %v5798_v2, 0.0  ;;  %v5825_v41 = vand.u32 2147483648, %v5798_v2 }
 0xeec   :  { %7316 = vrsqrt.f32 %v5795_v63  ;;  %vm5815_vm9 = vcmp.eq.f32.partialorder %v5795_v63, inf  ;;  %v5818_v1 = vand.u32 2147483648, %v5795_v63  ;;  %vm5817_vm15 = vcmp.eq.f32.partialorder %v5795_v63, 0.0 }
 0xef0   :  { %v7311_v18 = vpop.eup %7310 }
 0xef1   :  { %v7313_v61 = vpop.eup %7312  ;;  %v5807_v58 = vmul.f32 %v7311_v18, %v5792_v49 }
 0xef2   :  { %v5800_v50 = vmul.f32 %v7313_v61, %v5789_v37 }
 0xef3   :  { %v5809_v43 = vsel %vm5808_vm1, %v5792_v49, %v5807_v58 }
 0xef4   :  { %v5812_v23 = vsel %vm5810_vm11, %v5811_v5, %v5809_v43  ;;  %v5802_v42 = vsel %vm5801_vm12, %v5789_v37, %v5800_v50 }
 0xef5   :  { %v7315_v16 = vpop.eup %7314  ;;  %v5832_v32 = vadd.f32 1e-07, %v5812_v23  ;;  %v5805_v45 = vsel %vm5803_vm13, %v5804_v51, %v5802_v42  ;;  %vm5828_vm3 = vcmp.gt.f32.partialorder %v5812_v23, 4.0 }
 0xef6   :  { %v7317_v19 = vpop.eup %7316  ;;  %v5831_v31 = vadd.f32 1e-07, %v5805_v45  ;;  %v5821_v4 = vmul.f32 %v7315_v16, %v5798_v2  ;;  %vm5827_vm4 = vcmp.gt.f32.partialorder %v5805_v45, 4.0 }
 0xef7   :  { %7318 = vrcp.f32 %v5832_v32  ;;  %v5814_v29 = vmul.f32 %v7317_v19, %v5795_v63 }
 0xef8   :  { %7320 = vrcp.f32 %v5831_v31  ;;  %v5823_v56 = vsel %vm5822_vm14, %v5798_v2, %v5821_v4 }
 0xef9   :  { %v5826_v6 = vsel %vm5824_vm7, %v5825_v41, %v5823_v56  ;;  %v5816_v28 = vsel %vm5815_vm9, %v5795_v63, %v5814_v29 }
 0xefa   :  { %v5834_v12 = vadd.f32 1e-07, %v5826_v6  ;;  %v5819_v3 = vsel %vm5817_vm15, %v5818_v1, %v5816_v28  ;;  %vm5830_vm2 = vcmp.gt.f32.partialorder %v5826_v6, 4.0 }
 0xefb   :  { %v5833_v38 = vadd.f32 1e-07, %v5819_v3  ;;  %vm5829_vm5 = vcmp.gt.f32.partialorder %v5819_v3, 4.0 }
 0xefc   :  { %7322 = vrcp.f32 %v5834_v12 }
 0xefd   :  { %7324 = vrcp.f32 %v5833_v38 }
 0xf01   :  { %v7319_v14 = vpop.eup %7318 }
 0xf02   :  { %v7321_v40 = vpop.eup %7320  ;;  %v5838_v11 = vmul.f32 4.0, %v7319_v14 }
 0xf03   :  { %v5836_v30 = vmul.f32 4.0, %v7321_v40 }
 0xf04   :  { %v5844_v62 = vsel %vm5828_vm3, %v5838_v11, 1.0 }
 0xf05   :  { %v5848_v46 = vmul.f32 %v5844_v62, %v9333_v57  ;;  %v5843_v48 = vsel %vm5827_vm4, %v5836_v30, 1.0 }
 0xf06   :  { %v7323_v36 = vpop.eup %7322  ;;  %v5847_v53 = vmul.f32 %v5843_v48, %v9336_v9 }
 0xf07   :  { %v7325_v15 = vpop.eup %7324  ;;  %5852 = vst.msk [vmem:[%s9393_s13 + $0x8] sm:$0xff] %vm57_vm0, %v5848_v46  ;;  %v5842_v26 = vmul.f32 4.0, %v7323_v36 }
 0xf08   :  { %5851 = vst.msk [vmem:[%s9393_s13] sm:$0xff] %vm57_vm0, %v5847_v53  ;;  %v5840_v20 = vmul.f32 4.0, %v7325_v15 }
 0xf09   :  { %v5846_v0 = vsel %vm5830_vm2, %v5842_v26, 1.0 }
 0xf0a   :  { %v5850_v52 = vmul.f32 %v5846_v0, %v9349_v27  ;;  %v5845_v57 = vsel %vm5829_vm5, %v5840_v20, 1.0 }
 0xf0b   :  { %v5849_v25 = vmul.f32 %v5845_v57, %v9352_v60 }
 0xf0c   :  { %5854 = vst.msk [vmem:[%s9393_s13 + $0x18] sm:$0xff] %vm57_vm0, %v5850_v52 }
 0xf0d   :  { %5853 = vst.msk [vmem:[%s9393_s13 + $0x10] sm:$0xff] %vm57_vm0, %v5849_v25 }

</bundles_post_ra>
